<compile_context>
chip_gen: v7x
topology: tpu7x:2x2x1
jax: 0.10.0
libtpu: 0.0.40
codegen_flags: <defaults>
</compile_context>

<pallas_src>
import functools

import jax
import jax.numpy as jnp
from jax.experimental import pallas as pl
from jax.experimental.pallas import tpu as pltpu


# ---------------------------------------------------------------------------
# helpers used inside kernels (all f32)
# ---------------------------------------------------------------------------
def _layer_norm(x, g, b, eps):
    # PyTorch nn.LayerNorm: biased variance over last dim.
    mean = jnp.mean(x, axis=-1, keepdims=True)
    var = jnp.mean((x - mean) ** 2, axis=-1, keepdims=True)
    return (x - mean) * jax.lax.rsqrt(var + eps) * g + b


def _gelu_exact(x):
    # nn.GELU() default = exact erf-based gelu
    return 0.5 * x * (1.0 + jax.lax.erf(x * 0.7071067811865476))


def _vmem_spec():
    # Untiled, single-buffered, whole array resident in VMEM (block-invariant
    # weights/biases: avoids the 2x double-buffer cost of a blocked spec).
    return pl.BlockSpec(memory_space=pltpu.MemorySpace.VMEM)


# ---------------------------------------------------------------------------
# fused embedding add + layernorm kernel
# ---------------------------------------------------------------------------
def embed_ln_kernel(word_ref, pos_ref, g_ref, b_ref, o_ref, *, eps):
    x = word_ref[0] + pos_ref[...]                       # (S, H) f32
    o_ref[0] = _layer_norm(x, g_ref[...], b_ref[...], eps).astype(o_ref.dtype)


def embed_layernorm(word, pos, g, b, eps):
    B, S, H = word.shape
    return pl.pallas_call(
        functools.partial(embed_ln_kernel, eps=eps),
        out_shape=jax.ShapeDtypeStruct((B, S, H), jnp.float32),
        grid=(B,),
        in_specs=[
            pl.BlockSpec((1, S, H), lambda b_: (b_, 0, 0)),
            _vmem_spec(),          # pos (S, H)
            _vmem_spec(),          # gamma (1, H)
            _vmem_spec(),          # beta  (1, H)
        ],
        out_specs=pl.BlockSpec((1, S, H), lambda b_: (b_, 0, 0)),
        compiler_params=pltpu.CompilerParams(dimension_semantics=("parallel",)),
    )(word, pos, g, b)


# ---------------------------------------------------------------------------
# one BertEncoderLayer (self-attention + FFN, post-layernorm) kernel
#   grid = (B, S // TQ); QKV projection cached in VMEM scratch at q-block 0
# ---------------------------------------------------------------------------
def encoder_layer_kernel(x_full_ref, x_q_ref, mask_ref,
                         wqkv_ref, bqkv_ref, wo_ref, bo_ref,
                         ln1g_ref, ln1b_ref,
                         w1_ref, b1_ref, w2_ref, b2_ref,
                         ln2g_ref, ln2b_ref,
                         o_ref, qkv_scratch, *, num_heads, eps):
    S = x_full_ref.shape[1]
    H = x_full_ref.shape[2]
    TQ = x_q_ref.shape[1]
    hd = H // num_heads
    scale = 1.0 / (hd ** 0.5)
    qi = pl.program_id(1)

    # --- fused QKV projection for the whole sequence, once per batch row ---
    @pl.when(qi == 0)
    def _():
        xf = x_full_ref[0].astype(jnp.bfloat16)                      # (S, H)
        qkv = (jnp.dot(xf, wqkv_ref[...],
                       preferred_element_type=jnp.float32)
               + bqkv_ref[...])                                      # (S, 3H) f32
        qkv_scratch[0] = (qkv[:, 0:H] * scale).astype(jnp.bfloat16)  # Q pre-scaled
        qkv_scratch[1] = qkv[:, H:2 * H].astype(jnp.bfloat16)        # K
        qkv_scratch[2] = qkv[:, 2 * H:3 * H].astype(jnp.bfloat16)    # V

    # --- head-batched attention for this query block ---
    q_start = pl.multiple_of(qi * TQ, TQ)
    q = qkv_scratch[0, pl.ds(q_start, TQ), :]                        # (TQ, H) bf16
    k = qkv_scratch[1]                                               # (S, H) bf16
    v = qkv_scratch[2]                                               # (S, H) bf16

    q_h = q.reshape(TQ, num_heads, hd)
    k_h = k.reshape(S, num_heads, hd)
    v_h = v.reshape(S, num_heads, hd)

    s = jnp.einsum('qnd,knd->nqk', q_h, k_h,
                   preferred_element_type=jnp.float32)               # (nh, TQ, S)
    s = s + mask_ref[0]                                              # additive key mask
    s = s - jnp.max(s, axis=-1, keepdims=True)
    p = jnp.exp(s)
    p = p * pl.reciprocal(jnp.sum(p, axis=-1, keepdims=True), approx=True)

    ctx = jnp.einsum('nqk,knd->qnd', p.astype(jnp.bfloat16), v_h,
                     preferred_element_type=jnp.float32)             # (TQ, nh, hd)
    ctx = ctx.reshape(TQ, H)
    attn = (jnp.dot(ctx.astype(jnp.bfloat16), wo_ref[...],
                    preferred_element_type=jnp.float32) + bo_ref[...])

    # --- residual + post-attention layernorm (f32) ---
    x_q = x_q_ref[0]                                                 # (TQ, H) f32
    h1 = _layer_norm(x_q + attn, ln1g_ref[...], ln1b_ref[...], eps)

    # --- feed-forward: Linear -> GELU(exact) -> Linear ---
    ff = (jnp.dot(h1.astype(jnp.bfloat16), w1_ref[...],
                  preferred_element_type=jnp.float32) + b1_ref[...])
    ff = _gelu_exact(ff)
    ff = (jnp.dot(ff.astype(jnp.bfloat16), w2_ref[...],
                  preferred_element_type=jnp.float32) + b2_ref[...])

    # --- residual + post-FFN layernorm (f32) ---
    out = _layer_norm(h1 + ff, ln2g_ref[...], ln2b_ref[...], eps)
    o_ref[0] = out.astype(o_ref.dtype)


def encoder_layer(x, mask_add, p, *, num_heads, eps, tq):
    B, S, H = x.shape
    n_q = S // tq

    return pl.pallas_call(
        functools.partial(encoder_layer_kernel, num_heads=num_heads, eps=eps),
        out_shape=jax.ShapeDtypeStruct((B, S, H), jnp.float32),
        grid=(B, n_q),
        in_specs=[
            pl.BlockSpec((1, S, H), lambda b, q: (b, 0, 0)),    # x (full seq, K/V source)
            pl.BlockSpec((1, tq, H), lambda b, q: (b, q, 0)),   # x (query block, residual)
            pl.BlockSpec((1, 1, S), lambda b, q: (b, 0, 0)),    # additive key-pad mask
            _vmem_spec(), _vmem_spec(),                         # wqkv (H,3H) bf16, bqkv
            _vmem_spec(), _vmem_spec(),                         # wo (H,H) bf16, bo
            _vmem_spec(), _vmem_spec(),                         # attn-norm gamma, beta
            _vmem_spec(), _vmem_spec(),                         # ffn w1 (H,FF) bf16, b1
            _vmem_spec(), _vmem_spec(),                         # ffn w2 (FF,H) bf16, b2
            _vmem_spec(), _vmem_spec(),                         # ffn-norm gamma, beta
        ],
        out_specs=pl.BlockSpec((1, tq, H), lambda b, q: (b, q, 0)),
        scratch_shapes=[pltpu.VMEM((3, S, H), jnp.bfloat16)],   # cached Q(scaled)/K/V
        compiler_params=pltpu.CompilerParams(
            dimension_semantics=("parallel", "arbitrary"),
            vmem_limit_bytes=48 * 1024 * 1024),
    )(x, x, mask_add,
      p["wqkv"], p["bqkv"], p["wo"], p["bo"], p["ln1_g"], p["ln1_b"],
      p["w1"], p["b1"], p["w2"], p["b2"], p["ln2_g"], p["ln2_b"])


# ---------------------------------------------------------------------------
# full BertModel forward
# ---------------------------------------------------------------------------
def _choose_tq(S):
    for cand in (256, 128, 64, 32, 16, 8):
        if S % cand == 0:
            return cand
    return S


def bert_forward(input_ids, attention_mask, params, *, num_heads, eps):
    B, S = input_ids.shape
    # TODO(synk): embedding-table gather stays in plain JAX (XLA gather).
    word = params["word_emb"][input_ids]                 # (B, S, H) f32
    pos = params["pos_emb"][:S]                          # (S, H)    f32
    x = embed_layernorm(word, pos, params["emb_ln_g"], params["emb_ln_b"], eps)

    if attention_mask is None:
        attention_mask = jnp.ones((B, S), dtype=jnp.int32)
    # key_padding_mask = (attention_mask == 0) -> additive float mask.
    # Finite -1e30 (not -inf) so fully-masked rows don't produce NaN.
    mask_add = jnp.where(attention_mask == 0, -1e30, 0.0).astype(
        jnp.float32).reshape(B, 1, S)

    tq = _choose_tq(S)
    for layer in params["layers"]:
        x = encoder_layer(x, mask_add, layer, num_heads=num_heads, eps=eps, tq=tq)
    return x


# ---------------------------------------------------------------------------
# deterministic parameter construction
# ---------------------------------------------------------------------------
def make_params(key, *, vocab, max_pos, hidden, ff, num_layers):
    def nrm(k, shape, scale=0.02, dtype=jnp.float32):
        return (scale * jax.random.normal(k, shape, dtype=jnp.float32)).astype(dtype)

    k_word, k_pos, k_layers = jax.random.split(key, 3)
    params = {
        "word_emb": nrm(k_word, (vocab, hidden)),
        "pos_emb": nrm(k_pos, (max_pos, hidden)),
        "emb_ln_g": jnp.ones((1, hidden), jnp.float32),
        "emb_ln_b": jnp.zeros((1, hidden), jnp.float32),
        "layers": [],
    }
    for lk in jax.random.split(k_layers, num_layers):
        ks = jax.random.split(lk, 4)
        params["layers"].append({
            # fused QKV weight (in, 3*out), bf16 for the MXU / half the DMA
            "wqkv": nrm(ks[0], (hidden, 3 * hidden), dtype=jnp.bfloat16),
            "bqkv": jnp.zeros((1, 3 * hidden), jnp.float32),
            "wo": nrm(ks[1], (hidden, hidden), dtype=jnp.bfloat16),
            "bo": jnp.zeros((1, hidden), jnp.float32),
            "ln1_g": jnp.ones((1, hidden), jnp.float32),
            "ln1_b": jnp.zeros((1, hidden), jnp.float32),
            "w1": nrm(ks[2], (hidden, ff), dtype=jnp.bfloat16),
            "b1": jnp.zeros((1, ff), jnp.float32),
            "w2": nrm(ks[3], (ff, hidden), dtype=jnp.bfloat16),
            "b2": jnp.zeros((1, hidden), jnp.float32),
            "ln2_g": jnp.ones((1, hidden), jnp.float32),
            "ln2_b": jnp.zeros((1, hidden), jnp.float32),
        })
    return params


if __name__ == "__main__":
    # small BertConfig-consistent shapes
    B, S = 2, 8
    HIDDEN, NUM_HEADS, NUM_LAYERS = 32, 4, 2
    FF = 4 * HIDDEN
    VOCAB, MAX_POS = 100, 64
    EPS = 1e-12

    key = jax.random.PRNGKey(0)
    k_params, k_ids = jax.random.split(key)
    params = make_params(k_params, vocab=VOCAB, max_pos=MAX_POS,
                         hidden=HIDDEN, ff=FF, num_layers=NUM_LAYERS)

    input_ids = jax.random.randint(k_ids, (B, S), 0, VOCAB, dtype=jnp.int32)
    # batch 0 fully valid; batch 1 has 2 padded positions
    attention_mask = jnp.array(
        [[1, 1, 1, 1, 1, 1, 1, 1],
         [1, 1, 1, 1, 1, 1, 0, 0]], dtype=jnp.int32)

    fwd = jax.jit(functools.partial(bert_forward, num_heads=NUM_HEADS, eps=EPS))
    out = fwd(input_ids, attention_mask, params)
    jax.block_until_ready(out)
    assert out.shape == (B, S, HIDDEN)
    assert bool(jnp.all(jnp.isfinite(out)))
    print("KERNEL_OK")
</pallas_src>

<mosaic_0001>
module attributes {stable_mosaic.version = 11 : i64} {
  func.func @embed_ln_kernel(%arg0: i32, %arg1: memref<1x8x32xf32, #tpu.memory_space<vmem>>, %arg2: memref<8x32xf32, #tpu.memory_space<vmem>>, %arg3: memref<1x32xf32, #tpu.memory_space<vmem>>, %arg4: memref<1x32xf32, #tpu.memory_space<vmem>>, %arg5: memref<1x8x32xf32, #tpu.memory_space<vmem>>) attributes {dimension_semantics = [#tpu.dimension_semantics<parallel>], iteration_bounds = array<i64: 2>, scalar_prefetch = 0 : i64, scratch_operands = 0 : i64, tpu.core_type = #tpu.core_type<tc>, window_params = [{transform_indices = @transform_0, window_bounds = array<i64: 1, 8, 32>}, {pipeline_mode = #tpu.pipeline_mode<synchronous>, transform_indices = @transform_1, window_bounds = array<i64: 8, 32>}, {pipeline_mode = #tpu.pipeline_mode<synchronous>, transform_indices = @transform_2, window_bounds = array<i64: 1, 32>}, {pipeline_mode = #tpu.pipeline_mode<synchronous>, transform_indices = @transform_3, window_bounds = array<i64: 1, 32>}, {transform_indices = @transform_4, window_bounds = array<i64: 1, 8, 32>}]} {
    %c0 = arith.constant 0 : index
    %c0_0 = arith.constant 0 : index
    %c0_1 = arith.constant 0 : index
    %0 = vector.load %arg1[%c0, %c0_0, %c0_1] : memref<1x8x32xf32, #tpu.memory_space<vmem>>, vector<1x8x32xf32>
    %1 = vector.shape_cast %0 : vector<1x8x32xf32> to vector<8x32xf32>
    %c0_2 = arith.constant 0 : index
    %c0_3 = arith.constant 0 : index
    %2 = vector.load %arg2[%c0_2, %c0_3] : memref<8x32xf32, #tpu.memory_space<vmem>>, vector<8x32xf32>
    %3 = arith.addf %1, %2 : vector<8x32xf32>
    %c0_4 = arith.constant 0 : index
    %c0_5 = arith.constant 0 : index
    %4 = vector.load %arg3[%c0_4, %c0_5] : memref<1x32xf32, #tpu.memory_space<vmem>>, vector<1x32xf32>
    %c0_6 = arith.constant 0 : index
    %c0_7 = arith.constant 0 : index
    %5 = vector.load %arg4[%c0_6, %c0_7] : memref<1x32xf32, #tpu.memory_space<vmem>>, vector<1x32xf32>
    %cst = arith.constant dense<0.000000e+00> : vector<8xf32>
    %6 = vector.multi_reduction <add>, %3, %cst [1] : vector<8x32xf32> to vector<8xf32>
    %7 = vector.shape_cast %6 : vector<8xf32> to vector<8x1xf32>
    %cst_8 = arith.constant 3.200000e+01 : f32
    %8 = vector.broadcast %cst_8 : f32 to vector<8x1xf32>
    %9 = arith.divf %7, %8 : vector<8x1xf32>
    %10 = vector.broadcast %9 : vector<8x1xf32> to vector<8x32xf32>
    %11 = arith.subf %3, %10 : vector<8x32xf32>
    %12 = arith.mulf %11, %11 : vector<8x32xf32>
    %cst_9 = arith.constant dense<0.000000e+00> : vector<8xf32>
    %13 = vector.multi_reduction <add>, %12, %cst_9 [1] : vector<8x32xf32> to vector<8xf32>
    %14 = vector.shape_cast %13 : vector<8xf32> to vector<8x1xf32>
    %cst_10 = arith.constant 3.200000e+01 : f32
    %15 = vector.broadcast %cst_10 : f32 to vector<8x1xf32>
    %16 = arith.divf %14, %15 : vector<8x1xf32>
    %17 = vector.broadcast %9 : vector<8x1xf32> to vector<8x32xf32>
    %18 = arith.subf %3, %17 : vector<8x32xf32>
    %cst_11 = arith.constant 9.99999996E-13 : f32
    %19 = vector.broadcast %cst_11 : f32 to vector<8x1xf32>
    %20 = arith.addf %16, %19 : vector<8x1xf32>
    %21 = math.rsqrt %20 : vector<8x1xf32>
    %22 = vector.broadcast %21 : vector<8x1xf32> to vector<8x32xf32>
    %23 = arith.mulf %18, %22 : vector<8x32xf32>
    %24 = vector.broadcast %4 : vector<1x32xf32> to vector<8x32xf32>
    %25 = arith.mulf %23, %24 : vector<8x32xf32>
    %26 = vector.broadcast %5 : vector<1x32xf32> to vector<8x32xf32>
    %27 = arith.addf %25, %26 : vector<8x32xf32>
    %c0_12 = arith.constant 0 : index
    %c0_13 = arith.constant 0 : index
    %c0_14 = arith.constant 0 : index
    %28 = vector.load %arg5[%c0_12, %c0_13, %c0_14] : memref<1x8x32xf32, #tpu.memory_space<vmem>>, vector<1x8x32xf32>
    %29 = vector.shape_cast %28 : vector<1x8x32xf32> to vector<8x32xf32>
    %30 = vector.shape_cast %27 : vector<8x32xf32> to vector<1x8x32xf32>
    tpu.vector_store %arg5[%c0_12, %c0_13, %c0_14], %30 {strides = array<i32>} : memref<1x8x32xf32, #tpu.memory_space<vmem>>, vector<1x8x32xf32>,
    return
  }
  func.func @transform_0(%arg0: i32) -> (i32, i32, i32) {
    %c0_i32 = arith.constant 0 : i32
    %c0_i32_0 = arith.constant 0 : i32
    %c0_i32_1 = arith.constant 0 : i32
    return %arg0, %c0_i32, %c0_i32_0 : i32, i32, i32
  }
  func.func @transform_1(%arg0: i32) -> (i32, i32) {
    %c0_i32 = arith.constant 0 : i32
    %c0_i32_0 = arith.constant 0 : i32
    %c0_i32_1 = arith.constant 0 : i32
    return %c0_i32, %c0_i32_0 : i32, i32
  }
  func.func @transform_2(%arg0: i32) -> (i32, i32) {
    %c0_i32 = arith.constant 0 : i32
    %c0_i32_0 = arith.constant 0 : i32
    %c0_i32_1 = arith.constant 0 : i32
    return %c0_i32, %c0_i32_0 : i32, i32
  }
  func.func @transform_3(%arg0: i32) -> (i32, i32) {
    %c0_i32 = arith.constant 0 : i32
    %c0_i32_0 = arith.constant 0 : i32
    %c0_i32_1 = arith.constant 0 : i32
    return %c0_i32, %c0_i32_0 : i32, i32
  }
  func.func @transform_4(%arg0: i32) -> (i32, i32, i32) {
    %c0_i32 = arith.constant 0 : i32
    %c0_i32_0 = arith.constant 0 : i32
    %c0_i32_1 = arith.constant 0 : i32
    return %arg0, %c0_i32, %c0_i32_0 : i32, i32, i32
  }
}

module attributes {stable_mosaic.version = 11 : i64} {
  func.func @encoder_layer_kernel(%arg0: i32, %arg1: i32, %arg2: memref<1x8x32xf32, #tpu.memory_space<vmem>>, %arg3: memref<1x8x32xf32, #tpu.memory_space<vmem>>, %arg4: memref<1x1x8xf32, #tpu.memory_space<vmem>>, %arg5: memref<32x96xbf16, #tpu.memory_space<vmem>>, %arg6: memref<1x96xf32, #tpu.memory_space<vmem>>, %arg7: memref<32x32xbf16, #tpu.memory_space<vmem>>, %arg8: memref<1x32xf32, #tpu.memory_space<vmem>>, %arg9: memref<1x32xf32, #tpu.memory_space<vmem>>, %arg10: memref<1x32xf32, #tpu.memory_space<vmem>>, %arg11: memref<32x128xbf16, #tpu.memory_space<vmem>>, %arg12: memref<1x128xf32, #tpu.memory_space<vmem>>, %arg13: memref<128x32xbf16, #tpu.memory_space<vmem>>, %arg14: memref<1x32xf32, #tpu.memory_space<vmem>>, %arg15: memref<1x32xf32, #tpu.memory_space<vmem>>, %arg16: memref<1x32xf32, #tpu.memory_space<vmem>>, %arg17: memref<1x8x32xf32, #tpu.memory_space<vmem>>, %arg18: memref<3x8x32xbf16, #tpu.memory_space<vmem>>) attributes {dimension_semantics = [#tpu.dimension_semantics<parallel>, #tpu.dimension_semantics<arbitrary>], iteration_bounds = array<i64: 2, 1>, scalar_prefetch = 0 : i64, scratch_operands = 1 : i64, tpu.core_type = #tpu.core_type<tc>, window_params = [{transform_indices = @transform_0, window_bounds = array<i64: 1, 8, 32>}, {transform_indices = @transform_1, window_bounds = array<i64: 1, 8, 32>}, {transform_indices = @transform_2, window_bounds = array<i64: 1, 1, 8>}, {pipeline_mode = #tpu.pipeline_mode<synchronous>, transform_indices = @transform_3, window_bounds = array<i64: 32, 96>}, {pipeline_mode = #tpu.pipeline_mode<synchronous>, transform_indices = @transform_4, window_bounds = array<i64: 1, 96>}, {pipeline_mode = #tpu.pipeline_mode<synchronous>, transform_indices = @transform_5, window_bounds = array<i64: 32, 32>}, {pipeline_mode = #tpu.pipeline_mode<synchronous>, transform_indices = @transform_6, window_bounds = array<i64: 1, 32>}, {pipeline_mode = #tpu.pipeline_mode<synchronous>, transform_indices = @transform_7, window_bounds = array<i64: 1, 32>}, {pipeline_mode = #tpu.pipeline_mode<synchronous>, transform_indices = @transform_8, window_bounds = array<i64: 1, 32>}, {pipeline_mode = #tpu.pipeline_mode<synchronous>, transform_indices = @transform_9, window_bounds = array<i64: 32, 128>}, {pipeline_mode = #tpu.pipeline_mode<synchronous>, transform_indices = @transform_10, window_bounds = array<i64: 1, 128>}, {pipeline_mode = #tpu.pipeline_mode<synchronous>, transform_indices = @transform_11, window_bounds = array<i64: 128, 32>}, {pipeline_mode = #tpu.pipeline_mode<synchronous>, transform_indices = @transform_12, window_bounds = array<i64: 1, 32>}, {pipeline_mode = #tpu.pipeline_mode<synchronous>, transform_indices = @transform_13, window_bounds = array<i64: 1, 32>}, {pipeline_mode = #tpu.pipeline_mode<synchronous>, transform_indices = @transform_14, window_bounds = array<i64: 1, 32>}, {transform_indices = @transform_15, window_bounds = array<i64: 1, 8, 32>}]} {
    %c0_i32 = arith.constant 0 : i32
    %0 = arith.cmpi eq, %arg1, %c0_i32 : i32
    %1 = arith.extui %0 : i1 to i32
    %c0_i32_0 = arith.constant 0 : i32
    %2 = arith.cmpi ne, %1, %c0_i32_0 : i32
    scf.if %2 {
      %c0_54 = arith.constant 0 : index
      %c0_55 = arith.constant 0 : index
      %c0_56 = arith.constant 0 : index
      %116 = vector.load %arg2[%c0_54, %c0_55, %c0_56] : memref<1x8x32xf32, #tpu.memory_space<vmem>>, vector<1x8x32xf32>
      %117 = vector.shape_cast %116 : vector<1x8x32xf32> to vector<8x32xf32>
      %118 = arith.truncf %117 : vector<8x32xf32> to vector<8x32xbf16>
      %c0_57 = arith.constant 0 : index
      %c0_58 = arith.constant 0 : index
      %119 = vector.load %arg5[%c0_57, %c0_58] : memref<32x96xbf16, #tpu.memory_space<vmem>>, vector<32x96xbf16>
      %cst_59 = arith.constant dense<0.000000e+00> : vector<8x96xf32>
      %120 = tpu.matmul %118, %119, %cst_59 {dimension_numbers = #tpu.dot_dimension_numbers<[1], [0], [0], [1], [0, 0, 1, 1], [], []>} : vector<8x32xbf16>, vector<32x96xbf16>, vector<8x96xf32> -> vector<8x96xf32>
      %c0_60 = arith.constant 0 : index
      %c0_61 = arith.constant 0 : index
      %121 = vector.load %arg6[%c0_60, %c0_61] : memref<1x96xf32, #tpu.memory_space<vmem>>, vector<1x96xf32>
      %122 = vector.broadcast %121 : vector<1x96xf32> to vector<8x96xf32>
      %123 = arith.addf %120, %122 : vector<8x96xf32>
      %124 = vector.extract_strided_slice %123 {offsets = [0, 0], sizes = [8, 32], strides = [1, 1]} : vector<8x96xf32> to vector<8x32xf32>
      %cst_62 = arith.constant 0.353553385 : f32
      %125 = vector.broadcast %cst_62 : f32 to vector<8x32xf32>
      %126 = arith.mulf %124, %125 : vector<8x32xf32>
      %127 = arith.truncf %126 : vector<8x32xf32> to vector<8x32xbf16>
      %c0_63 = arith.constant 0 : index
      %c0_64 = arith.constant 0 : index
      %c0_65 = arith.constant 0 : index
      %128 = vector.load %arg18[%c0_63, %c0_64, %c0_65] : memref<3x8x32xbf16, #tpu.memory_space<vmem>>, vector<1x8x32xbf16>
      %129 = vector.shape_cast %128 : vector<1x8x32xbf16> to vector<8x32xbf16>
      %130 = vector.shape_cast %127 : vector<8x32xbf16> to vector<1x8x32xbf16>
      tpu.vector_store %arg18[%c0_63, %c0_64, %c0_65], %130 {strides = array<i32>} : memref<3x8x32xbf16, #tpu.memory_space<vmem>>, vector<1x8x32xbf16>,
      %131 = vector.extract_strided_slice %123 {offsets = [0, 32], sizes = [8, 32], strides = [1, 1]} : vector<8x96xf32> to vector<8x32xf32>
      %132 = arith.truncf %131 : vector<8x32xf32> to vector<8x32xbf16>
      %c1_66 = arith.constant 1 : index
      %c0_67 = arith.constant 0 : index
      %c0_68 = arith.constant 0 : index
      %133 = vector.load %arg18[%c1_66, %c0_67, %c0_68] : memref<3x8x32xbf16, #tpu.memory_space<vmem>>, vector<1x8x32xbf16>
      %134 = vector.shape_cast %133 : vector<1x8x32xbf16> to vector<8x32xbf16>
      %135 = vector.shape_cast %132 : vector<8x32xbf16> to vector<1x8x32xbf16>
      tpu.vector_store %arg18[%c1_66, %c0_67, %c0_68], %135 {strides = array<i32>} : memref<3x8x32xbf16, #tpu.memory_space<vmem>>, vector<1x8x32xbf16>,
      %136 = vector.extract_strided_slice %123 {offsets = [0, 64], sizes = [8, 32], strides = [1, 1]} : vector<8x96xf32> to vector<8x32xf32>
      %137 = arith.truncf %136 : vector<8x32xf32> to vector<8x32xbf16>
      %c2_69 = arith.constant 2 : index
      %c0_70 = arith.constant 0 : index
      %c0_71 = arith.constant 0 : index
      %138 = vector.load %arg18[%c2_69, %c0_70, %c0_71] : memref<3x8x32xbf16, #tpu.memory_space<vmem>>, vector<1x8x32xbf16>
      %139 = vector.shape_cast %138 : vector<1x8x32xbf16> to vector<8x32xbf16>
      %140 = vector.shape_cast %137 : vector<8x32xbf16> to vector<1x8x32xbf16>
      tpu.vector_store %arg18[%c2_69, %c0_70, %c0_71], %140 {strides = array<i32>} : memref<3x8x32xbf16, #tpu.memory_space<vmem>>, vector<1x8x32xbf16>,
    } else {
    }
    %c8_i32 = arith.constant 8 : i32
    %3 = arith.muli %arg1, %c8_i32 : i32
    %4 = tpu.assume_multiple %3, 8 : i32
    %c0 = arith.constant 0 : index
    %5 = arith.index_cast %4 : i32 to index
    %c0_1 = arith.constant 0 : index
    %6 = vector.load %arg18[%c0, %5, %c0_1] : memref<3x8x32xbf16, #tpu.memory_space<vmem>>, vector<1x8x32xbf16>
    %7 = vector.shape_cast %6 : vector<1x8x32xbf16> to vector<8x32xbf16>
    %c1 = arith.constant 1 : index
    %c0_2 = arith.constant 0 : index
    %c0_3 = arith.constant 0 : index
    %8 = vector.load %arg18[%c1, %c0_2, %c0_3] : memref<3x8x32xbf16, #tpu.memory_space<vmem>>, vector<1x8x32xbf16>
    %9 = vector.shape_cast %8 : vector<1x8x32xbf16> to vector<8x32xbf16>
    %c2 = arith.constant 2 : index
    %c0_4 = arith.constant 0 : index
    %c0_5 = arith.constant 0 : index
    %10 = vector.load %arg18[%c2, %c0_4, %c0_5] : memref<3x8x32xbf16, #tpu.memory_space<vmem>>, vector<1x8x32xbf16>
    %11 = vector.shape_cast %10 : vector<1x8x32xbf16> to vector<8x32xbf16>
    %12 = vector.shape_cast %7 : vector<8x32xbf16> to vector<8x4x8xbf16>
    %13 = vector.shape_cast %9 : vector<8x32xbf16> to vector<8x4x8xbf16>
    %14 = vector.shape_cast %11 : vector<8x32xbf16> to vector<8x4x8xbf16>
    "tpu.trace_start"() <{level = 10 : i32, message = "qnd,knd->nqk"}> : () -> ()
    %cst = arith.constant dense<0.000000e+00> : vector<4x8x8xf32>
    %15 = tpu.matmul %12, %13, %cst {dimension_numbers = #tpu.dot_dimension_numbers<[2], [2], [0], [0], [0, 1, 0, 0, 1, 0], [1], [1]>} : vector<8x4x8xbf16>, vector<8x4x8xbf16>, vector<4x8x8xf32> -> vector<4x8x8xf32>
    "tpu.trace_stop"() : () -> ()
    %c0_6 = arith.constant 0 : index
    %c0_7 = arith.constant 0 : index
    %c0_8 = arith.constant 0 : index
    %16 = vector.load %arg4[%c0_6, %c0_7, %c0_8] : memref<1x1x8xf32, #tpu.memory_space<vmem>>, vector<1x1x8xf32>
    %17 = vector.shape_cast %16 : vector<1x1x8xf32> to vector<1x8xf32>
    %18 = vector.shape_cast %17 : vector<1x8xf32> to vector<1x1x8xf32>
    %19 = vector.broadcast %18 : vector<1x1x8xf32> to vector<4x8x8xf32>
    %20 = arith.addf %15, %19 : vector<4x8x8xf32>
    %cst_9 = arith.constant dense<0xFF800000> : vector<4x8xf32>
    %21 = vector.multi_reduction <maximumf>, %20, %cst_9 [2] : vector<4x8x8xf32> to vector<4x8xf32>
    %22 = vector.shape_cast %21 : vector<4x8xf32> to vector<4x8x1xf32>
    %23 = vector.broadcast %22 : vector<4x8x1xf32> to vector<4x8x8xf32>
    %24 = arith.subf %20, %23 : vector<4x8x8xf32>
    %25 = math.exp %24 : vector<4x8x8xf32>
    %cst_10 = arith.constant dense<0.000000e+00> : vector<4x8xf32>
    %26 = vector.multi_reduction <add>, %25, %cst_10 [2] : vector<4x8x8xf32> to vector<4x8xf32>
    %27 = vector.shape_cast %26 : vector<4x8xf32> to vector<4x8x1xf32>
    %28 = tpu.reciprocal %27 {approx = true} : vector<4x8x1xf32> -> vector<4x8x1xf32>
    %29 = vector.broadcast %28 : vector<4x8x1xf32> to vector<4x8x8xf32>
    %30 = arith.mulf %25, %29 : vector<4x8x8xf32>
    %31 = arith.truncf %30 : vector<4x8x8xf32> to vector<4x8x8xbf16>
    "tpu.trace_start"() <{level = 10 : i32, message = "nqk,knd->qnd"}> : () -> ()
    %cst_11 = arith.constant dense<0.000000e+00> : vector<4x8x8xf32>
    %32 = tpu.matmul %14, %31, %cst_11 {dimension_numbers = #tpu.dot_dimension_numbers<[0], [2], [2], [1], [0, 1, 0, 2, 1, 1], [1], [0]>} : vector<8x4x8xbf16>, vector<4x8x8xbf16>, vector<4x8x8xf32> -> vector<4x8x8xf32>
    %33 = tpu.transpose %32, [2, 0, 1] : vector<4x8x8xf32> -> vector<8x4x8xf32>
    "tpu.trace_stop"() : () -> ()
    %34 = vector.shape_cast %33 : vector<8x4x8xf32> to vector<8x32xf32>
    %35 = arith.truncf %34 : vector<8x32xf32> to vector<8x32xbf16>
    %c0_12 = arith.constant 0 : index
    %c0_13 = arith.constant 0 : index
    %36 = vector.load %arg7[%c0_12, %c0_13] : memref<32x32xbf16, #tpu.memory_space<vmem>>, vector<32x32xbf16>
    %cst_14 = arith.constant dense<0.000000e+00> : vector<8x32xf32>
    %37 = tpu.matmul %35, %36, %cst_14 {dimension_numbers = #tpu.dot_dimension_numbers<[1], [0], [0], [1], [0, 0, 1, 1], [], []>} : vector<8x32xbf16>, vector<32x32xbf16>, vector<8x32xf32> -> vector<8x32xf32>
    %c0_15 = arith.constant 0 : index
    %c0_16 = arith.constant 0 : index
    %38 = vector.load %arg8[%c0_15, %c0_16] : memref<1x32xf32, #tpu.memory_space<vmem>>, vector<1x32xf32>
    %39 = vector.broadcast %38 : vector<1x32xf32> to vector<8x32xf32>
    %40 = arith.addf %37, %39 : vector<8x32xf32>
    %c0_17 = arith.constant 0 : index
    %c0_18 = arith.constant 0 : index
    %c0_19 = arith.constant 0 : index
    %41 = vector.load %arg3[%c0_17, %c0_18, %c0_19] : memref<1x8x32xf32, #tpu.memory_space<vmem>>, vector<1x8x32xf32>
    %42 = vector.shape_cast %41 : vector<1x8x32xf32> to vector<8x32xf32>
    %43 = arith.addf %42, %40 : vector<8x32xf32>
    %c0_20 = arith.constant 0 : index
    %c0_21 = arith.constant 0 : index
    %44 = vector.load %arg9[%c0_20, %c0_21] : memref<1x32xf32, #tpu.memory_space<vmem>>, vector<1x32xf32>
    %c0_22 = arith.constant 0 : index
    %c0_23 = arith.constant 0 : index
    %45 = vector.load %arg10[%c0_22, %c0_23] : memref<1x32xf32, #tpu.memory_space<vmem>>, vector<1x32xf32>
    %cst_24 = arith.constant dense<0.000000e+00> : vector<8xf32>
    %46 = vector.multi_reduction <add>, %43, %cst_24 [1] : vector<8x32xf32> to vector<8xf32>
    %47 = vector.shape_cast %46 : vector<8xf32> to vector<8x1xf32>
    %cst_25 = arith.constant 3.200000e+01 : f32
    %48 = vector.broadcast %cst_25 : f32 to vector<8x1xf32>
    %49 = arith.divf %47, %48 : vector<8x1xf32>
    %50 = vector.broadcast %49 : vector<8x1xf32> to vector<8x32xf32>
    %51 = arith.subf %43, %50 : vector<8x32xf32>
    %52 = arith.mulf %51, %51 : vector<8x32xf32>
    %cst_26 = arith.constant dense<0.000000e+00> : vector<8xf32>
    %53 = vector.multi_reduction <add>, %52, %cst_26 [1] : vector<8x32xf32> to vector<8xf32>
    %54 = vector.shape_cast %53 : vector<8xf32> to vector<8x1xf32>
    %cst_27 = arith.constant 3.200000e+01 : f32
    %55 = vector.broadcast %cst_27 : f32 to vector<8x1xf32>
    %56 = arith.divf %54, %55 : vector<8x1xf32>
    %57 = vector.broadcast %49 : vector<8x1xf32> to vector<8x32xf32>
    %58 = arith.subf %43, %57 : vector<8x32xf32>
    %cst_28 = arith.constant 9.99999996E-13 : f32
    %59 = vector.broadcast %cst_28 : f32 to vector<8x1xf32>
    %60 = arith.addf %56, %59 : vector<8x1xf32>
    %61 = math.rsqrt %60 : vector<8x1xf32>
    %62 = vector.broadcast %61 : vector<8x1xf32> to vector<8x32xf32>
    %63 = arith.mulf %58, %62 : vector<8x32xf32>
    %64 = vector.broadcast %44 : vector<1x32xf32> to vector<8x32xf32>
    %65 = arith.mulf %63, %64 : vector<8x32xf32>
    %66 = vector.broadcast %45 : vector<1x32xf32> to vector<8x32xf32>
    %67 = arith.addf %65, %66 : vector<8x32xf32>
    %68 = arith.truncf %67 : vector<8x32xf32> to vector<8x32xbf16>
    %c0_29 = arith.constant 0 : index
    %c0_30 = arith.constant 0 : index
    %69 = vector.load %arg11[%c0_29, %c0_30] : memref<32x128xbf16, #tpu.memory_space<vmem>>, vector<32x128xbf16>
    %cst_31 = arith.constant dense<0.000000e+00> : vector<8x128xf32>
    %70 = tpu.matmul %68, %69, %cst_31 {dimension_numbers = #tpu.dot_dimension_numbers<[1], [0], [0], [1], [0, 0, 1, 1], [], []>} : vector<8x32xbf16>, vector<32x128xbf16>, vector<8x128xf32> -> vector<8x128xf32>
    %c0_32 = arith.constant 0 : index
    %c0_33 = arith.constant 0 : index
    %71 = vector.load %arg12[%c0_32, %c0_33] : memref<1x128xf32, #tpu.memory_space<vmem>>, vector<1x128xf32>
    %72 = vector.broadcast %71 : vector<1x128xf32> to vector<8x128xf32>
    %73 = arith.addf %70, %72 : vector<8x128xf32>
    %cst_34 = arith.constant 5.000000e-01 : f32
    %74 = vector.broadcast %cst_34 : f32 to vector<8x128xf32>
    %75 = arith.mulf %74, %73 : vector<8x128xf32>
    %cst_35 = arith.constant 0.707106769 : f32
    %76 = vector.broadcast %cst_35 : f32 to vector<8x128xf32>
    %77 = arith.mulf %73, %76 : vector<8x128xf32>
    %78 = math.erf %77 : vector<8x128xf32>
    %cst_36 = arith.constant 1.000000e+00 : f32
    %79 = vector.broadcast %cst_36 : f32 to vector<8x128xf32>
    %80 = arith.addf %79, %78 : vector<8x128xf32>
    %81 = arith.mulf %75, %80 : vector<8x128xf32>
    %82 = arith.truncf %81 : vector<8x128xf32> to vector<8x128xbf16>
    %c0_37 = arith.constant 0 : index
    %c0_38 = arith.constant 0 : index
    %83 = vector.load %arg13[%c0_37, %c0_38] : memref<128x32xbf16, #tpu.memory_space<vmem>>, vector<128x32xbf16>
    %cst_39 = arith.constant dense<0.000000e+00> : vector<8x32xf32>
    %84 = tpu.matmul %82, %83, %cst_39 {dimension_numbers = #tpu.dot_dimension_numbers<[1], [0], [0], [1], [0, 0, 1, 1], [], []>} : vector<8x128xbf16>, vector<128x32xbf16>, vector<8x32xf32> -> vector<8x32xf32>
    %c0_40 = arith.constant 0 : index
    %c0_41 = arith.constant 0 : index
    %85 = vector.load %arg14[%c0_40, %c0_41] : memref<1x32xf32, #tpu.memory_space<vmem>>, vector<1x32xf32>
    %86 = vector.broadcast %85 : vector<1x32xf32> to vector<8x32xf32>
    %87 = arith.addf %84, %86 : vector<8x32xf32>
    %88 = arith.addf %67, %87 : vector<8x32xf32>
    %c0_42 = arith.constant 0 : index
    %c0_43 = arith.constant 0 : index
    %89 = vector.load %arg15[%c0_42, %c0_43] : memref<1x32xf32, #tpu.memory_space<vmem>>, vector<1x32xf32>
    %c0_44 = arith.constant 0 : index
    %c0_45 = arith.constant 0 : index
    %90 = vector.load %arg16[%c0_44, %c0_45] : memref<1x32xf32, #tpu.memory_space<vmem>>, vector<1x32xf32>
    %cst_46 = arith.constant dense<0.000000e+00> : vector<8xf32>
    %91 = vector.multi_reduction <add>, %88, %cst_46 [1] : vector<8x32xf32> to vector<8xf32>
    %92 = vector.shape_cast %91 : vector<8xf32> to vector<8x1xf32>
    %cst_47 = arith.constant 3.200000e+01 : f32
    %93 = vector.broadcast %cst_47 : f32 to vector<8x1xf32>
    %94 = arith.divf %92, %93 : vector<8x1xf32>
    %95 = vector.broadcast %94 : vector<8x1xf32> to vector<8x32xf32>
    %96 = arith.subf %88, %95 : vector<8x32xf32>
    %97 = arith.mulf %96, %96 : vector<8x32xf32>
    %cst_48 = arith.constant dense<0.000000e+00> : vector<8xf32>
    %98 = vector.multi_reduction <add>, %97, %cst_48 [1] : vector<8x32xf32> to vector<8xf32>
    %99 = vector.shape_cast %98 : vector<8xf32> to vector<8x1xf32>
    %cst_49 = arith.constant 3.200000e+01 : f32
    %100 = vector.broadcast %cst_49 : f32 to vector<8x1xf32>
    %101 = arith.divf %99, %100 : vector<8x1xf32>
    %102 = vector.broadcast %94 : vector<8x1xf32> to vector<8x32xf32>
    %103 = arith.subf %88, %102 : vector<8x32xf32>
    %cst_50 = arith.constant 9.99999996E-13 : f32
    %104 = vector.broadcast %cst_50 : f32 to vector<8x1xf32>
    %105 = arith.addf %101, %104 : vector<8x1xf32>
    %106 = math.rsqrt %105 : vector<8x1xf32>
    %107 = vector.broadcast %106 : vector<8x1xf32> to vector<8x32xf32>
    %108 = arith.mulf %103, %107 : vector<8x32xf32>
    %109 = vector.broadcast %89 : vector<1x32xf32> to vector<8x32xf32>
    %110 = arith.mulf %108, %109 : vector<8x32xf32>
    %111 = vector.broadcast %90 : vector<1x32xf32> to vector<8x32xf32>
    %112 = arith.addf %110, %111 : vector<8x32xf32>
    %c0_51 = arith.constant 0 : index
    %c0_52 = arith.constant 0 : index
    %c0_53 = arith.constant 0 : index
    %113 = vector.load %arg17[%c0_51, %c0_52, %c0_53] : memref<1x8x32xf32, #tpu.memory_space<vmem>>, vector<1x8x32xf32>
    %114 = vector.shape_cast %113 : vector<1x8x32xf32> to vector<8x32xf32>
    %115 = vector.shape_cast %112 : vector<8x32xf32> to vector<1x8x32xf32>
    tpu.vector_store %arg17[%c0_51, %c0_52, %c0_53], %115 {strides = array<i32>} : memref<1x8x32xf32, #tpu.memory_space<vmem>>, vector<1x8x32xf32>,
    return
  }
  func.func @transform_0(%arg0: i32, %arg1: i32) -> (i32, i32, i32) {
    %c0_i32 = arith.constant 0 : i32
    %c0_i32_0 = arith.constant 0 : i32
    %c0_i32_1 = arith.constant 0 : i32
    return %arg0, %c0_i32, %c0_i32_0 : i32, i32, i32
  }
  func.func @transform_1(%arg0: i32, %arg1: i32) -> (i32, i32, i32) {
    %c0_i32 = arith.constant 0 : i32
    %c0_i32_0 = arith.constant 0 : i32
    return %arg0, %arg1, %c0_i32 : i32, i32, i32
  }
  func.func @transform_2(%arg0: i32, %arg1: i32) -> (i32, i32, i32) {
    %c0_i32 = arith.constant 0 : i32
    %c0_i32_0 = arith.constant 0 : i32
    %c0_i32_1 = arith.constant 0 : i32
    return %arg0, %c0_i32, %c0_i32_0 : i32, i32, i32
  }
  func.func @transform_3(%arg0: i32, %arg1: i32) -> (i32, i32) {
    %c0_i32 = arith.constant 0 : i32
    %c0_i32_0 = arith.constant 0 : i32
    %c0_i32_1 = arith.constant 0 : i32
    return %c0_i32, %c0_i32_0 : i32, i32
  }
  func.func @transform_4(%arg0: i32, %arg1: i32) -> (i32, i32) {
    %c0_i32 = arith.constant 0 : i32
    %c0_i32_0 = arith.constant 0 : i32
    %c0_i32_1 = arith.constant 0 : i32
    return %c0_i32, %c0_i32_0 : i32, i32
  }
  func.func @transform_5(%arg0: i32, %arg1: i32) -> (i32, i32) {
    %c0_i32 = arith.constant 0 : i32
    %c0_i32_0 = arith.constant 0 : i32
    %c0_i32_1 = arith.constant 0 : i32
    return %c0_i32, %c0_i32_0 : i32, i32
  }
  func.func @transform_6(%arg0: i32, %arg1: i32) -> (i32, i32) {
    %c0_i32 = arith.constant 0 : i32
    %c0_i32_0 = arith.constant 0 : i32
    %c0_i32_1 = arith.constant 0 : i32
    return %c0_i32, %c0_i32_0 : i32, i32
  }
  func.func @transform_7(%arg0: i32, %arg1: i32) -> (i32, i32) {
    %c0_i32 = arith.constant 0 : i32
    %c0_i32_0 = arith.constant 0 : i32
    %c0_i32_1 = arith.constant 0 : i32
    return %c0_i32, %c0_i32_0 : i32, i32
  }
  func.func @transform_8(%arg0: i32, %arg1: i32) -> (i32, i32) {
    %c0_i32 = arith.constant 0 : i32
    %c0_i32_0 = arith.constant 0 : i32
    %c0_i32_1 = arith.constant 0 : i32
    return %c0_i32, %c0_i32_0 : i32, i32
  }
  func.func @transform_9(%arg0: i32, %arg1: i32) -> (i32, i32) {
    %c0_i32 = arith.constant 0 : i32
    %c0_i32_0 = arith.constant 0 : i32
    %c0_i32_1 = arith.constant 0 : i32
    return %c0_i32, %c0_i32_0 : i32, i32
  }
  func.func @transform_10(%arg0: i32, %arg1: i32) -> (i32, i32) {
    %c0_i32 = arith.constant 0 : i32
    %c0_i32_0 = arith.constant 0 : i32
    %c0_i32_1 = arith.constant 0 : i32
    return %c0_i32, %c0_i32_0 : i32, i32
  }
  func.func @transform_11(%arg0: i32, %arg1: i32) -> (i32, i32) {
    %c0_i32 = arith.constant 0 : i32
    %c0_i32_0 = arith.constant 0 : i32
    %c0_i32_1 = arith.constant 0 : i32
    return %c0_i32, %c0_i32_0 : i32, i32
  }
  func.func @transform_12(%arg0: i32, %arg1: i32) -> (i32, i32) {
    %c0_i32 = arith.constant 0 : i32
    %c0_i32_0 = arith.constant 0 : i32
    %c0_i32_1 = arith.constant 0 : i32
    return %c0_i32, %c0_i32_0 : i32, i32
  }
  func.func @transform_13(%arg0: i32, %arg1: i32) -> (i32, i32) {
    %c0_i32 = arith.constant 0 : i32
    %c0_i32_0 = arith.constant 0 : i32
    %c0_i32_1 = arith.constant 0 : i32
    return %c0_i32, %c0_i32_0 : i32, i32
  }
  func.func @transform_14(%arg0: i32, %arg1: i32) -> (i32, i32) {
    %c0_i32 = arith.constant 0 : i32
    %c0_i32_0 = arith.constant 0 : i32
    %c0_i32_1 = arith.constant 0 : i32
    return %c0_i32, %c0_i32_0 : i32, i32
  }
  func.func @transform_15(%arg0: i32, %arg1: i32) -> (i32, i32, i32) {
    %c0_i32 = arith.constant 0 : i32
    %c0_i32_0 = arith.constant 0 : i32
    return %arg0, %arg1, %c0_i32 : i32, i32, i32
  }
}

module attributes {stable_mosaic.version = 11 : i64} {
  func.func @encoder_layer_kernel(%arg0: i32, %arg1: i32, %arg2: memref<1x8x32xf32, #tpu.memory_space<vmem>>, %arg3: memref<1x8x32xf32, #tpu.memory_space<vmem>>, %arg4: memref<1x1x8xf32, #tpu.memory_space<vmem>>, %arg5: memref<32x96xbf16, #tpu.memory_space<vmem>>, %arg6: memref<1x96xf32, #tpu.memory_space<vmem>>, %arg7: memref<32x32xbf16, #tpu.memory_space<vmem>>, %arg8: memref<1x32xf32, #tpu.memory_space<vmem>>, %arg9: memref<1x32xf32, #tpu.memory_space<vmem>>, %arg10: memref<1x32xf32, #tpu.memory_space<vmem>>, %arg11: memref<32x128xbf16, #tpu.memory_space<vmem>>, %arg12: memref<1x128xf32, #tpu.memory_space<vmem>>, %arg13: memref<128x32xbf16, #tpu.memory_space<vmem>>, %arg14: memref<1x32xf32, #tpu.memory_space<vmem>>, %arg15: memref<1x32xf32, #tpu.memory_space<vmem>>, %arg16: memref<1x32xf32, #tpu.memory_space<vmem>>, %arg17: memref<1x8x32xf32, #tpu.memory_space<vmem>>, %arg18: memref<3x8x32xbf16, #tpu.memory_space<vmem>>) attributes {dimension_semantics = [#tpu.dimension_semantics<parallel>, #tpu.dimension_semantics<arbitrary>], iteration_bounds = array<i64: 2, 1>, scalar_prefetch = 0 : i64, scratch_operands = 1 : i64, tpu.core_type = #tpu.core_type<tc>, window_params = [{transform_indices = @transform_0, window_bounds = array<i64: 1, 8, 32>}, {transform_indices = @transform_1, window_bounds = array<i64: 1, 8, 32>}, {transform_indices = @transform_2, window_bounds = array<i64: 1, 1, 8>}, {pipeline_mode = #tpu.pipeline_mode<synchronous>, transform_indices = @transform_3, window_bounds = array<i64: 32, 96>}, {pipeline_mode = #tpu.pipeline_mode<synchronous>, transform_indices = @transform_4, window_bounds = array<i64: 1, 96>}, {pipeline_mode = #tpu.pipeline_mode<synchronous>, transform_indices = @transform_5, window_bounds = array<i64: 32, 32>}, {pipeline_mode = #tpu.pipeline_mode<synchronous>, transform_indices = @transform_6, window_bounds = array<i64: 1, 32>}, {pipeline_mode = #tpu.pipeline_mode<synchronous>, transform_indices = @transform_7, window_bounds = array<i64: 1, 32>}, {pipeline_mode = #tpu.pipeline_mode<synchronous>, transform_indices = @transform_8, window_bounds = array<i64: 1, 32>}, {pipeline_mode = #tpu.pipeline_mode<synchronous>, transform_indices = @transform_9, window_bounds = array<i64: 32, 128>}, {pipeline_mode = #tpu.pipeline_mode<synchronous>, transform_indices = @transform_10, window_bounds = array<i64: 1, 128>}, {pipeline_mode = #tpu.pipeline_mode<synchronous>, transform_indices = @transform_11, window_bounds = array<i64: 128, 32>}, {pipeline_mode = #tpu.pipeline_mode<synchronous>, transform_indices = @transform_12, window_bounds = array<i64: 1, 32>}, {pipeline_mode = #tpu.pipeline_mode<synchronous>, transform_indices = @transform_13, window_bounds = array<i64: 1, 32>}, {pipeline_mode = #tpu.pipeline_mode<synchronous>, transform_indices = @transform_14, window_bounds = array<i64: 1, 32>}, {transform_indices = @transform_15, window_bounds = array<i64: 1, 8, 32>}]} {
    %c0_i32 = arith.constant 0 : i32
    %0 = arith.cmpi eq, %arg1, %c0_i32 : i32
    %1 = arith.extui %0 : i1 to i32
    %c0_i32_0 = arith.constant 0 : i32
    %2 = arith.cmpi ne, %1, %c0_i32_0 : i32
    scf.if %2 {
      %c0_54 = arith.constant 0 : index
      %c0_55 = arith.constant 0 : index
      %c0_56 = arith.constant 0 : index
      %116 = vector.load %arg2[%c0_54, %c0_55, %c0_56] : memref<1x8x32xf32, #tpu.memory_space<vmem>>, vector<1x8x32xf32>
      %117 = vector.shape_cast %116 : vector<1x8x32xf32> to vector<8x32xf32>
      %118 = arith.truncf %117 : vector<8x32xf32> to vector<8x32xbf16>
      %c0_57 = arith.constant 0 : index
      %c0_58 = arith.constant 0 : index
      %119 = vector.load %arg5[%c0_57, %c0_58] : memref<32x96xbf16, #tpu.memory_space<vmem>>, vector<32x96xbf16>
      %cst_59 = arith.constant dense<0.000000e+00> : vector<8x96xf32>
      %120 = tpu.matmul %118, %119, %cst_59 {dimension_numbers = #tpu.dot_dimension_numbers<[1], [0], [0], [1], [0, 0, 1, 1], [], []>} : vector<8x32xbf16>, vector<32x96xbf16>, vector<8x96xf32> -> vector<8x96xf32>
      %c0_60 = arith.constant 0 : index
      %c0_61 = arith.constant 0 : index
      %121 = vector.load %arg6[%c0_60, %c0_61] : memref<1x96xf32, #tpu.memory_space<vmem>>, vector<1x96xf32>
      %122 = vector.broadcast %121 : vector<1x96xf32> to vector<8x96xf32>
      %123 = arith.addf %120, %122 : vector<8x96xf32>
      %124 = vector.extract_strided_slice %123 {offsets = [0, 0], sizes = [8, 32], strides = [1, 1]} : vector<8x96xf32> to vector<8x32xf32>
      %cst_62 = arith.constant 0.353553385 : f32
      %125 = vector.broadcast %cst_62 : f32 to vector<8x32xf32>
      %126 = arith.mulf %124, %125 : vector<8x32xf32>
      %127 = arith.truncf %126 : vector<8x32xf32> to vector<8x32xbf16>
      %c0_63 = arith.constant 0 : index
      %c0_64 = arith.constant 0 : index
      %c0_65 = arith.constant 0 : index
      %128 = vector.load %arg18[%c0_63, %c0_64, %c0_65] : memref<3x8x32xbf16, #tpu.memory_space<vmem>>, vector<1x8x32xbf16>
      %129 = vector.shape_cast %128 : vector<1x8x32xbf16> to vector<8x32xbf16>
      %130 = vector.shape_cast %127 : vector<8x32xbf16> to vector<1x8x32xbf16>
      tpu.vector_store %arg18[%c0_63, %c0_64, %c0_65], %130 {strides = array<i32>} : memref<3x8x32xbf16, #tpu.memory_space<vmem>>, vector<1x8x32xbf16>,
      %131 = vector.extract_strided_slice %123 {offsets = [0, 32], sizes = [8, 32], strides = [1, 1]} : vector<8x96xf32> to vector<8x32xf32>
      %132 = arith.truncf %131 : vector<8x32xf32> to vector<8x32xbf16>
      %c1_66 = arith.constant 1 : index
      %c0_67 = arith.constant 0 : index
      %c0_68 = arith.constant 0 : index
      %133 = vector.load %arg18[%c1_66, %c0_67, %c0_68] : memref<3x8x32xbf16, #tpu.memory_space<vmem>>, vector<1x8x32xbf16>
      %134 = vector.shape_cast %133 : vector<1x8x32xbf16> to vector<8x32xbf16>
      %135 = vector.shape_cast %132 : vector<8x32xbf16> to vector<1x8x32xbf16>
      tpu.vector_store %arg18[%c1_66, %c0_67, %c0_68], %135 {strides = array<i32>} : memref<3x8x32xbf16, #tpu.memory_space<vmem>>, vector<1x8x32xbf16>,
      %136 = vector.extract_strided_slice %123 {offsets = [0, 64], sizes = [8, 32], strides = [1, 1]} : vector<8x96xf32> to vector<8x32xf32>
      %137 = arith.truncf %136 : vector<8x32xf32> to vector<8x32xbf16>
      %c2_69 = arith.constant 2 : index
      %c0_70 = arith.constant 0 : index
      %c0_71 = arith.constant 0 : index
      %138 = vector.load %arg18[%c2_69, %c0_70, %c0_71] : memref<3x8x32xbf16, #tpu.memory_space<vmem>>, vector<1x8x32xbf16>
      %139 = vector.shape_cast %138 : vector<1x8x32xbf16> to vector<8x32xbf16>
      %140 = vector.shape_cast %137 : vector<8x32xbf16> to vector<1x8x32xbf16>
      tpu.vector_store %arg18[%c2_69, %c0_70, %c0_71], %140 {strides = array<i32>} : memref<3x8x32xbf16, #tpu.memory_space<vmem>>, vector<1x8x32xbf16>,
    } else {
    }
    %c8_i32 = arith.constant 8 : i32
    %3 = arith.muli %arg1, %c8_i32 : i32
    %4 = tpu.assume_multiple %3, 8 : i32
    %c0 = arith.constant 0 : index
    %5 = arith.index_cast %4 : i32 to index
    %c0_1 = arith.constant 0 : index
    %6 = vector.load %arg18[%c0, %5, %c0_1] : memref<3x8x32xbf16, #tpu.memory_space<vmem>>, vector<1x8x32xbf16>
    %7 = vector.shape_cast %6 : vector<1x8x32xbf16> to vector<8x32xbf16>
    %c1 = arith.constant 1 : index
    %c0_2 = arith.constant 0 : index
    %c0_3 = arith.constant 0 : index
    %8 = vector.load %arg18[%c1, %c0_2, %c0_3] : memref<3x8x32xbf16, #tpu.memory_space<vmem>>, vector<1x8x32xbf16>
    %9 = vector.shape_cast %8 : vector<1x8x32xbf16> to vector<8x32xbf16>
    %c2 = arith.constant 2 : index
    %c0_4 = arith.constant 0 : index
    %c0_5 = arith.constant 0 : index
    %10 = vector.load %arg18[%c2, %c0_4, %c0_5] : memref<3x8x32xbf16, #tpu.memory_space<vmem>>, vector<1x8x32xbf16>
    %11 = vector.shape_cast %10 : vector<1x8x32xbf16> to vector<8x32xbf16>
    %12 = vector.shape_cast %7 : vector<8x32xbf16> to vector<8x4x8xbf16>
    %13 = vector.shape_cast %9 : vector<8x32xbf16> to vector<8x4x8xbf16>
    %14 = vector.shape_cast %11 : vector<8x32xbf16> to vector<8x4x8xbf16>
    "tpu.trace_start"() <{level = 10 : i32, message = "qnd,knd->nqk"}> : () -> ()
    %cst = arith.constant dense<0.000000e+00> : vector<4x8x8xf32>
    %15 = tpu.matmul %12, %13, %cst {dimension_numbers = #tpu.dot_dimension_numbers<[2], [2], [0], [0], [0, 1, 0, 0, 1, 0], [1], [1]>} : vector<8x4x8xbf16>, vector<8x4x8xbf16>, vector<4x8x8xf32> -> vector<4x8x8xf32>
    "tpu.trace_stop"() : () -> ()
    %c0_6 = arith.constant 0 : index
    %c0_7 = arith.constant 0 : index
    %c0_8 = arith.constant 0 : index
    %16 = vector.load %arg4[%c0_6, %c0_7, %c0_8] : memref<1x1x8xf32, #tpu.memory_space<vmem>>, vector<1x1x8xf32>
    %17 = vector.shape_cast %16 : vector<1x1x8xf32> to vector<1x8xf32>
    %18 = vector.shape_cast %17 : vector<1x8xf32> to vector<1x1x8xf32>
    %19 = vector.broadcast %18 : vector<1x1x8xf32> to vector<4x8x8xf32>
    %20 = arith.addf %15, %19 : vector<4x8x8xf32>
    %cst_9 = arith.constant dense<0xFF800000> : vector<4x8xf32>
    %21 = vector.multi_reduction <maximumf>, %20, %cst_9 [2] : vector<4x8x8xf32> to vector<4x8xf32>
    %22 = vector.shape_cast %21 : vector<4x8xf32> to vector<4x8x1xf32>
    %23 = vector.broadcast %22 : vector<4x8x1xf32> to vector<4x8x8xf32>
    %24 = arith.subf %20, %23 : vector<4x8x8xf32>
    %25 = math.exp %24 : vector<4x8x8xf32>
    %cst_10 = arith.constant dense<0.000000e+00> : vector<4x8xf32>
    %26 = vector.multi_reduction <add>, %25, %cst_10 [2] : vector<4x8x8xf32> to vector<4x8xf32>
    %27 = vector.shape_cast %26 : vector<4x8xf32> to vector<4x8x1xf32>
    %28 = tpu.reciprocal %27 {approx = true} : vector<4x8x1xf32> -> vector<4x8x1xf32>
    %29 = vector.broadcast %28 : vector<4x8x1xf32> to vector<4x8x8xf32>
    %30 = arith.mulf %25, %29 : vector<4x8x8xf32>
    %31 = arith.truncf %30 : vector<4x8x8xf32> to vector<4x8x8xbf16>
    "tpu.trace_start"() <{level = 10 : i32, message = "nqk,knd->qnd"}> : () -> ()
    %cst_11 = arith.constant dense<0.000000e+00> : vector<4x8x8xf32>
    %32 = tpu.matmul %14, %31, %cst_11 {dimension_numbers = #tpu.dot_dimension_numbers<[0], [2], [2], [1], [0, 1, 0, 2, 1, 1], [1], [0]>} : vector<8x4x8xbf16>, vector<4x8x8xbf16>, vector<4x8x8xf32> -> vector<4x8x8xf32>
    %33 = tpu.transpose %32, [2, 0, 1] : vector<4x8x8xf32> -> vector<8x4x8xf32>
    "tpu.trace_stop"() : () -> ()
    %34 = vector.shape_cast %33 : vector<8x4x8xf32> to vector<8x32xf32>
    %35 = arith.truncf %34 : vector<8x32xf32> to vector<8x32xbf16>
    %c0_12 = arith.constant 0 : index
    %c0_13 = arith.constant 0 : index
    %36 = vector.load %arg7[%c0_12, %c0_13] : memref<32x32xbf16, #tpu.memory_space<vmem>>, vector<32x32xbf16>
    %cst_14 = arith.constant dense<0.000000e+00> : vector<8x32xf32>
    %37 = tpu.matmul %35, %36, %cst_14 {dimension_numbers = #tpu.dot_dimension_numbers<[1], [0], [0], [1], [0, 0, 1, 1], [], []>} : vector<8x32xbf16>, vector<32x32xbf16>, vector<8x32xf32> -> vector<8x32xf32>
    %c0_15 = arith.constant 0 : index
    %c0_16 = arith.constant 0 : index
    %38 = vector.load %arg8[%c0_15, %c0_16] : memref<1x32xf32, #tpu.memory_space<vmem>>, vector<1x32xf32>
    %39 = vector.broadcast %38 : vector<1x32xf32> to vector<8x32xf32>
    %40 = arith.addf %37, %39 : vector<8x32xf32>
    %c0_17 = arith.constant 0 : index
    %c0_18 = arith.constant 0 : index
    %c0_19 = arith.constant 0 : index
    %41 = vector.load %arg3[%c0_17, %c0_18, %c0_19] : memref<1x8x32xf32, #tpu.memory_space<vmem>>, vector<1x8x32xf32>
    %42 = vector.shape_cast %41 : vector<1x8x32xf32> to vector<8x32xf32>
    %43 = arith.addf %42, %40 : vector<8x32xf32>
    %c0_20 = arith.constant 0 : index
    %c0_21 = arith.constant 0 : index
    %44 = vector.load %arg9[%c0_20, %c0_21] : memref<1x32xf32, #tpu.memory_space<vmem>>, vector<1x32xf32>
    %c0_22 = arith.constant 0 : index
    %c0_23 = arith.constant 0 : index
    %45 = vector.load %arg10[%c0_22, %c0_23] : memref<1x32xf32, #tpu.memory_space<vmem>>, vector<1x32xf32>
    %cst_24 = arith.constant dense<0.000000e+00> : vector<8xf32>
    %46 = vector.multi_reduction <add>, %43, %cst_24 [1] : vector<8x32xf32> to vector<8xf32>
    %47 = vector.shape_cast %46 : vector<8xf32> to vector<8x1xf32>
    %cst_25 = arith.constant 3.200000e+01 : f32
    %48 = vector.broadcast %cst_25 : f32 to vector<8x1xf32>
    %49 = arith.divf %47, %48 : vector<8x1xf32>
    %50 = vector.broadcast %49 : vector<8x1xf32> to vector<8x32xf32>
    %51 = arith.subf %43, %50 : vector<8x32xf32>
    %52 = arith.mulf %51, %51 : vector<8x32xf32>
    %cst_26 = arith.constant dense<0.000000e+00> : vector<8xf32>
    %53 = vector.multi_reduction <add>, %52, %cst_26 [1] : vector<8x32xf32> to vector<8xf32>
    %54 = vector.shape_cast %53 : vector<8xf32> to vector<8x1xf32>
    %cst_27 = arith.constant 3.200000e+01 : f32
    %55 = vector.broadcast %cst_27 : f32 to vector<8x1xf32>
    %56 = arith.divf %54, %55 : vector<8x1xf32>
    %57 = vector.broadcast %49 : vector<8x1xf32> to vector<8x32xf32>
    %58 = arith.subf %43, %57 : vector<8x32xf32>
    %cst_28 = arith.constant 9.99999996E-13 : f32
    %59 = vector.broadcast %cst_28 : f32 to vector<8x1xf32>
    %60 = arith.addf %56, %59 : vector<8x1xf32>
    %61 = math.rsqrt %60 : vector<8x1xf32>
    %62 = vector.broadcast %61 : vector<8x1xf32> to vector<8x32xf32>
    %63 = arith.mulf %58, %62 : vector<8x32xf32>
    %64 = vector.broadcast %44 : vector<1x32xf32> to vector<8x32xf32>
    %65 = arith.mulf %63, %64 : vector<8x32xf32>
    %66 = vector.broadcast %45 : vector<1x32xf32> to vector<8x32xf32>
    %67 = arith.addf %65, %66 : vector<8x32xf32>
    %68 = arith.truncf %67 : vector<8x32xf32> to vector<8x32xbf16>
    %c0_29 = arith.constant 0 : index
    %c0_30 = arith.constant 0 : index
    %69 = vector.load %arg11[%c0_29, %c0_30] : memref<32x128xbf16, #tpu.memory_space<vmem>>, vector<32x128xbf16>
    %cst_31 = arith.constant dense<0.000000e+00> : vector<8x128xf32>
    %70 = tpu.matmul %68, %69, %cst_31 {dimension_numbers = #tpu.dot_dimension_numbers<[1], [0], [0], [1], [0, 0, 1, 1], [], []>} : vector<8x32xbf16>, vector<32x128xbf16>, vector<8x128xf32> -> vector<8x128xf32>
    %c0_32 = arith.constant 0 : index
    %c0_33 = arith.constant 0 : index
    %71 = vector.load %arg12[%c0_32, %c0_33] : memref<1x128xf32, #tpu.memory_space<vmem>>, vector<1x128xf32>
    %72 = vector.broadcast %71 : vector<1x128xf32> to vector<8x128xf32>
    %73 = arith.addf %70, %72 : vector<8x128xf32>
    %cst_34 = arith.constant 5.000000e-01 : f32
    %74 = vector.broadcast %cst_34 : f32 to vector<8x128xf32>
    %75 = arith.mulf %74, %73 : vector<8x128xf32>
    %cst_35 = arith.constant 0.707106769 : f32
    %76 = vector.broadcast %cst_35 : f32 to vector<8x128xf32>
    %77 = arith.mulf %73, %76 : vector<8x128xf32>
    %78 = math.erf %77 : vector<8x128xf32>
    %cst_36 = arith.constant 1.000000e+00 : f32
    %79 = vector.broadcast %cst_36 : f32 to vector<8x128xf32>
    %80 = arith.addf %79, %78 : vector<8x128xf32>
    %81 = arith.mulf %75, %80 : vector<8x128xf32>
    %82 = arith.truncf %81 : vector<8x128xf32> to vector<8x128xbf16>
    %c0_37 = arith.constant 0 : index
    %c0_38 = arith.constant 0 : index
    %83 = vector.load %arg13[%c0_37, %c0_38] : memref<128x32xbf16, #tpu.memory_space<vmem>>, vector<128x32xbf16>
    %cst_39 = arith.constant dense<0.000000e+00> : vector<8x32xf32>
    %84 = tpu.matmul %82, %83, %cst_39 {dimension_numbers = #tpu.dot_dimension_numbers<[1], [0], [0], [1], [0, 0, 1, 1], [], []>} : vector<8x128xbf16>, vector<128x32xbf16>, vector<8x32xf32> -> vector<8x32xf32>
    %c0_40 = arith.constant 0 : index
    %c0_41 = arith.constant 0 : index
    %85 = vector.load %arg14[%c0_40, %c0_41] : memref<1x32xf32, #tpu.memory_space<vmem>>, vector<1x32xf32>
    %86 = vector.broadcast %85 : vector<1x32xf32> to vector<8x32xf32>
    %87 = arith.addf %84, %86 : vector<8x32xf32>
    %88 = arith.addf %67, %87 : vector<8x32xf32>
    %c0_42 = arith.constant 0 : index
    %c0_43 = arith.constant 0 : index
    %89 = vector.load %arg15[%c0_42, %c0_43] : memref<1x32xf32, #tpu.memory_space<vmem>>, vector<1x32xf32>
    %c0_44 = arith.constant 0 : index
    %c0_45 = arith.constant 0 : index
    %90 = vector.load %arg16[%c0_44, %c0_45] : memref<1x32xf32, #tpu.memory_space<vmem>>, vector<1x32xf32>
    %cst_46 = arith.constant dense<0.000000e+00> : vector<8xf32>
    %91 = vector.multi_reduction <add>, %88, %cst_46 [1] : vector<8x32xf32> to vector<8xf32>
    %92 = vector.shape_cast %91 : vector<8xf32> to vector<8x1xf32>
    %cst_47 = arith.constant 3.200000e+01 : f32
    %93 = vector.broadcast %cst_47 : f32 to vector<8x1xf32>
    %94 = arith.divf %92, %93 : vector<8x1xf32>
    %95 = vector.broadcast %94 : vector<8x1xf32> to vector<8x32xf32>
    %96 = arith.subf %88, %95 : vector<8x32xf32>
    %97 = arith.mulf %96, %96 : vector<8x32xf32>
    %cst_48 = arith.constant dense<0.000000e+00> : vector<8xf32>
    %98 = vector.multi_reduction <add>, %97, %cst_48 [1] : vector<8x32xf32> to vector<8xf32>
    %99 = vector.shape_cast %98 : vector<8xf32> to vector<8x1xf32>
    %cst_49 = arith.constant 3.200000e+01 : f32
    %100 = vector.broadcast %cst_49 : f32 to vector<8x1xf32>
    %101 = arith.divf %99, %100 : vector<8x1xf32>
    %102 = vector.broadcast %94 : vector<8x1xf32> to vector<8x32xf32>
    %103 = arith.subf %88, %102 : vector<8x32xf32>
    %cst_50 = arith.constant 9.99999996E-13 : f32
    %104 = vector.broadcast %cst_50 : f32 to vector<8x1xf32>
    %105 = arith.addf %101, %104 : vector<8x1xf32>
    %106 = math.rsqrt %105 : vector<8x1xf32>
    %107 = vector.broadcast %106 : vector<8x1xf32> to vector<8x32xf32>
    %108 = arith.mulf %103, %107 : vector<8x32xf32>
    %109 = vector.broadcast %89 : vector<1x32xf32> to vector<8x32xf32>
    %110 = arith.mulf %108, %109 : vector<8x32xf32>
    %111 = vector.broadcast %90 : vector<1x32xf32> to vector<8x32xf32>
    %112 = arith.addf %110, %111 : vector<8x32xf32>
    %c0_51 = arith.constant 0 : index
    %c0_52 = arith.constant 0 : index
    %c0_53 = arith.constant 0 : index
    %113 = vector.load %arg17[%c0_51, %c0_52, %c0_53] : memref<1x8x32xf32, #tpu.memory_space<vmem>>, vector<1x8x32xf32>
    %114 = vector.shape_cast %113 : vector<1x8x32xf32> to vector<8x32xf32>
    %115 = vector.shape_cast %112 : vector<8x32xf32> to vector<1x8x32xf32>
    tpu.vector_store %arg17[%c0_51, %c0_52, %c0_53], %115 {strides = array<i32>} : memref<1x8x32xf32, #tpu.memory_space<vmem>>, vector<1x8x32xf32>,
    return
  }
  func.func @transform_0(%arg0: i32, %arg1: i32) -> (i32, i32, i32) {
    %c0_i32 = arith.constant 0 : i32
    %c0_i32_0 = arith.constant 0 : i32
    %c0_i32_1 = arith.constant 0 : i32
    return %arg0, %c0_i32, %c0_i32_0 : i32, i32, i32
  }
  func.func @transform_1(%arg0: i32, %arg1: i32) -> (i32, i32, i32) {
    %c0_i32 = arith.constant 0 : i32
    %c0_i32_0 = arith.constant 0 : i32
    return %arg0, %arg1, %c0_i32 : i32, i32, i32
  }
  func.func @transform_2(%arg0: i32, %arg1: i32) -> (i32, i32, i32) {
    %c0_i32 = arith.constant 0 : i32
    %c0_i32_0 = arith.constant 0 : i32
    %c0_i32_1 = arith.constant 0 : i32
    return %arg0, %c0_i32, %c0_i32_0 : i32, i32, i32
  }
  func.func @transform_3(%arg0: i32, %arg1: i32) -> (i32, i32) {
    %c0_i32 = arith.constant 0 : i32
    %c0_i32_0 = arith.constant 0 : i32
    %c0_i32_1 = arith.constant 0 : i32
    return %c0_i32, %c0_i32_0 : i32, i32
  }
  func.func @transform_4(%arg0: i32, %arg1: i32) -> (i32, i32) {
    %c0_i32 = arith.constant 0 : i32
    %c0_i32_0 = arith.constant 0 : i32
    %c0_i32_1 = arith.constant 0 : i32
    return %c0_i32, %c0_i32_0 : i32, i32
  }
  func.func @transform_5(%arg0: i32, %arg1: i32) -> (i32, i32) {
    %c0_i32 = arith.constant 0 : i32
    %c0_i32_0 = arith.constant 0 : i32
    %c0_i32_1 = arith.constant 0 : i32
    return %c0_i32, %c0_i32_0 : i32, i32
  }
  func.func @transform_6(%arg0: i32, %arg1: i32) -> (i32, i32) {
    %c0_i32 = arith.constant 0 : i32
    %c0_i32_0 = arith.constant 0 : i32
    %c0_i32_1 = arith.constant 0 : i32
    return %c0_i32, %c0_i32_0 : i32, i32
  }
  func.func @transform_7(%arg0: i32, %arg1: i32) -> (i32, i32) {
    %c0_i32 = arith.constant 0 : i32
    %c0_i32_0 = arith.constant 0 : i32
    %c0_i32_1 = arith.constant 0 : i32
    return %c0_i32, %c0_i32_0 : i32, i32
  }
  func.func @transform_8(%arg0: i32, %arg1: i32) -> (i32, i32) {
    %c0_i32 = arith.constant 0 : i32
    %c0_i32_0 = arith.constant 0 : i32
    %c0_i32_1 = arith.constant 0 : i32
    return %c0_i32, %c0_i32_0 : i32, i32
  }
  func.func @transform_9(%arg0: i32, %arg1: i32) -> (i32, i32) {
    %c0_i32 = arith.constant 0 : i32
    %c0_i32_0 = arith.constant 0 : i32
    %c0_i32_1 = arith.constant 0 : i32
    return %c0_i32, %c0_i32_0 : i32, i32
  }
  func.func @transform_10(%arg0: i32, %arg1: i32) -> (i32, i32) {
    %c0_i32 = arith.constant 0 : i32
    %c0_i32_0 = arith.constant 0 : i32
    %c0_i32_1 = arith.constant 0 : i32
    return %c0_i32, %c0_i32_0 : i32, i32
  }
  func.func @transform_11(%arg0: i32, %arg1: i32) -> (i32, i32) {
    %c0_i32 = arith.constant 0 : i32
    %c0_i32_0 = arith.constant 0 : i32
    %c0_i32_1 = arith.constant 0 : i32
    return %c0_i32, %c0_i32_0 : i32, i32
  }
  func.func @transform_12(%arg0: i32, %arg1: i32) -> (i32, i32) {
    %c0_i32 = arith.constant 0 : i32
    %c0_i32_0 = arith.constant 0 : i32
    %c0_i32_1 = arith.constant 0 : i32
    return %c0_i32, %c0_i32_0 : i32, i32
  }
  func.func @transform_13(%arg0: i32, %arg1: i32) -> (i32, i32) {
    %c0_i32 = arith.constant 0 : i32
    %c0_i32_0 = arith.constant 0 : i32
    %c0_i32_1 = arith.constant 0 : i32
    return %c0_i32, %c0_i32_0 : i32, i32
  }
  func.func @transform_14(%arg0: i32, %arg1: i32) -> (i32, i32) {
    %c0_i32 = arith.constant 0 : i32
    %c0_i32_0 = arith.constant 0 : i32
    %c0_i32_1 = arith.constant 0 : i32
    return %c0_i32, %c0_i32_0 : i32, i32
  }
  func.func @transform_15(%arg0: i32, %arg1: i32) -> (i32, i32, i32) {
    %c0_i32 = arith.constant 0 : i32
    %c0_i32_0 = arith.constant 0 : i32
    return %arg0, %arg1, %c0_i32 : i32, i32, i32
  }
}

</mosaic_0001>

<bundles_post_ra>
// kernel: bert_forward.3
= control target key start
LH: loop header
LB: loop body
LE: loop exit
PB: predicated region body
PF: predicated region fallthrough
CT: control target
= control target key end

     0   :  { %s335_s15 = smov 0   ;;  %s364_s0 = inlined_call_operand.vmem [shape: f32[2,8,32], index: 0, kind: input, shape index: {}]   ;;  %s365_s1 = inlined_call_operand.vmem [shape: f32[8,32], index: 1, kind: input, shape index: {}]   ;;  %s366_s2 = inlined_call_operand.vmem [shape: f32[1,32], index: 2, kind: input, shape index: {}]   ;;  %s367_s3 = inlined_call_operand.vmem [shape: f32[1,32], index: 3, kind: input, shape index: {}]   ;;  %s368_s4 = inlined_call_operand.vmem [shape: f32[2,8,32], index: 4, kind: output, shape index: {}]  }
   0x1 LB: > { %s281_s16 = sadd.s32 4294967295, %s308_s15   ;;  %p285_p0 = scmp.ge.s32.totalorder %s308_s15, 1  ;;  %s308_s15 = sphi %s335_s15, %s14_s15  }
   0x2   : > { %p161_p1 = scmp.lt.s32.totalorder %s308_s15, 3 }
   0x4   : > { %p162_p2 = pnand %p285_p0, %p161_p1 }
   0x5   : > { %p185_p3 = scmp.lt.s32.totalorder (!%p162_p2), %s281_s16, 1  ;;  %v194_v0 = vld [vmem:[%s365_s1] sm:$0xff] (!%p162_p2)  ;;  %vm198_vm0 = vcmask (!%p162_p2), 261120  }
   0x6   : > { %165 = sbr.rel (%p162_p2) target bundleno = 333 (0x14d), region = 36  ;;  %v288_v13 = vld [vmem:[%s366_s2] ss:$0 sm:$0xff] (!%p162_p2) }
   0x7   : > { %v289_v15 = vld [vmem:[%s367_s3] ss:$0 sm:$0xff] (!%p162_p2) }
   0xd   : > { %s370_s16 = smov (!%p185_p3, %s281_s16), 1 }
   0xe   : > { %s286_s17 = sshll.u32 %s370_s16, 3 }
   0xf   : > { %s188_s22 = scalar_lea.vmem %s364_s0, %s286_s17  ;;  %s192_s29 = scalar_lea.vmem %s368_s4, %s286_s17 }
  0x10   : > { %v193_v1 = vld [vmem:[%s188_s22] sm:$0xff] }
  0x11   : > { %v195_v2 = vadd.f32 %v194_v0, %v193_v1 }
  0x13   : > { %v199_v3 = vsel %vm198_vm0, %v195_v2, 0.0 }
  0x14   : > { %200 = vadd.xlane.f32.xlu0 %v199_v3 }
  0xa1   : > { %v201_v4 = vpop.xlane.xlu0 %200 }
  0xa2   : > { %v203_v5 = vmul.f32 0.03125, %v201_v4 }
  0xa4   : > { %v204_v6 = vsub.f32 %v195_v2, %v203_v5 }
  0xa6   : > { %v205_v7 = vmul.f32 %v204_v6, %v204_v6 }
  0xa8   : > { %v206_v8 = vsel %vm198_vm0, %v205_v7, 0.0 }
  0xa9   : > { %207 = vadd.xlane.f32.xlu0 %v206_v8 }
 0x136   : > { %v208_v9 = vpop.xlane.xlu0 %207 }
 0x137   : > { %v209_v10 = vmul.f32 0.03125, %v208_v9 }
 0x139   : > { %v210_v11 = vadd.f32 1e-12, %v209_v10 }
 0x13b   : > { %300 = vrsqrt.f32 %v210_v11 }
 0x145   : > { %v301_v12 = vpop.eup %300 }
 0x146   : > { %v212_v14 = vmul.f32 %v301_v12, %v204_v6 }
 0x148   : > { %v219_v16 = vmul.f32 %v288_v13, %v212_v14 }
 0x14a   : > { %v226_v17 = vadd.f32 %v289_v15, %v219_v16 }
 0x14c   : > { %227 = vst.msk [vmem:[%s192_s29] sm:$0xff] %vm198_vm0, %v226_v17 }
 0x14d PF: > { %s14_s15 = sadd.s32 1, %s308_s15  }
 0x14e   : > { %p11_p4 = scmp.ge.s32.totalorder %s14_s15, 4  }
 0x150   :  { %13 = sbr.rel (!%p11_p4) target bundleno = 1 (0x1), region = 66 }

// kernel: bert_forward.4
= control target key start
LH: loop header
LB: loop body
LE: loop exit
PB: predicated region body
PF: predicated region fallthrough
CT: control target
= control target key end

     0   :  { %s3297_s18 = smov 0   ;;  %s3299_s19 = smov 0   ;;  %s3632_s0 = inlined_call_operand.vmem [shape: f32[2,8,32], index: 0, kind: input, shape index: {}, may-alias: {0,1}]   ;;  %s3633_s1 = inlined_call_operand.vmem [shape: f32[2,8,32], index: 1, kind: input, shape index: {}, may-alias: {0,1}]   ;;  %s3634_s2 = inlined_call_operand.vmem [shape: f32[2,1,8], index: 2, kind: input, shape index: {}]   ;;  %s3635_s3 = inlined_call_operand.vmem [shape: bf16[32,96], index: 3, kind: input, shape index: {}]   ;;  %s3636_s4 = inlined_call_operand.vmem [shape: f32[1,96], index: 4, kind: input, shape index: {}]   ;;  %s3637_s5 = inlined_call_operand.vmem [shape: bf16[32,32], index: 5, kind: input, shape index: {}]   ;;  %s3638_s6 = inlined_call_operand.vmem [shape: f32[1,32], index: 6, kind: input, shape index: {}]   ;;  %s3639_s7 = inlined_call_operand.vmem [shape: f32[1,32], index: 7, kind: input, shape index: {}]   ;;  %s3640_s8 = inlined_call_operand.vmem [shape: f32[1,32], index: 8, kind: input, shape index: {}]   ;;  %s3641_s9 = inlined_call_operand.vmem [shape: bf16[32,128], index: 9, kind: input, shape index: {}]   ;;  %s3642_s10 = inlined_call_operand.vmem [shape: f32[1,128], index: 10, kind: input, shape index: {}]   ;;  %s3643_s11 = inlined_call_operand.vmem [shape: bf16[128,32], index: 11, kind: input, shape index: {}]   ;;  %s3644_s12 = inlined_call_operand.vmem [shape: f32[1,32], index: 12, kind: input, shape index: {}]   ;;  %s3645_s13 = inlined_call_operand.vmem [shape: f32[1,32], index: 13, kind: input, shape index: {}]   ;;  %s3646_s14 = inlined_call_operand.vmem [shape: f32[1,32], index: 14, kind: input, shape index: {}]   ;;  %s3647_s15 = inlined_call_operand.vmem [shape: f32[2,8,32], index: 15, kind: output, shape index: {}]  }
   0x1   :  { %s3301_s20 = smov 0  }
   0x2 LB: > { %s37_s21 = sadd.s32 1, %s3198_s19  ;;  %p2935_p0 = scmp.ge.s32.totalorder %s3202_s20, 1  ;;  %s3202_s20 = sphi %s3301_s20, %s25_s20   ;;  %s3198_s19 = sphi %s3299_s19, %s3649_s19   ;;  %s3194_s18 = sphi %s3297_s18, %s3648_s18  }
   0x3   : > { %p39_p1 = scmp.ge.s32.totalorder %s37_s21, 2  ;;  %p472_p2 = scmp.lt.s32.totalorder %s3202_s20, 3 }
   0x5   : > { %s3651_s21 = smov (%p39_p1, %s37_s21), 0  ;;  %p473_p3 = pnand %p2935_p0, %p472_p2 }
   0x6   : > { %v3144_v0 = vld [vmem:[%s3635_s3] sm:$0xff] (!%p473_p3)   ;;  %v3204_v1 = vmov (!%p473_p3), 0.0   ;;  %v3145_v2 = vld [vmem:[%s3635_s3 + $0x8] sm:$0xff] (!%p473_p3)   ;;  %vm3205_vm0 = vmmov (!%p473_p3), 0   ;;  %p531_p4 = scmp.lt.s32.totalorder (!%p473_p3), %s3194_s18, 1  ;;  %vm582_vm1 = vcmask (!%p473_p3), 261120   ;;  %v677_v18 = vlaneseq (!%p473_p3) }
   0x7   : > { %476 = sbr.rel (%p473_p3) target bundleno = 3281 (0xcd1), region = 80  ;;  %3015 = vmatprep.subr.bf16.mxu1 (!%p473_p3), %v3204_v1  ;;  %3035 = vmatprep.subr.bf16.mxu0 (!%p473_p3), %v3204_v1  ;;  %v2939_v5 = vld [vmem:[%s3636_s4] ss:$0 sm:$0xff] (!%p473_p3)  ;;  %vm628_vm2 = vcmask (!%p473_p3), 257024   ;;  %s3206_s17 = smov (!%p473_p3), 96   ;;  %v3212_v46 = vmov (!%p473_p3), 0  }
   0x8   : > { %3016 = vmatpush3.bf16.msra.mxu1 (!%p473_p3), %v3144_v0  ;;  %3019 = vmatprep.mubr.msk.bf16.mxu1 (!%p473_p3), %vm3205_vm0, %v3204_v1  ;;  %s3207_s22 = smov (!%p473_p3), 112   ;;  %s3208_s23 = smov (!%p473_p3), 120   ;;  %v3210_v16 = vmov (!%p473_p3), 1983009808   ;;  %v678_v20 = vshrl.u32 (!%p473_p3), %v677_v18, 7  ;;  %vm1406_vm3 = vcmask (!%p473_p3), 1043456  }
   0x9   : > { %3017 = vmatprep.subr.bf16.mxu1 (!%p473_p3), %v3204_v1  ;;  %3037 = vmatprep.mubr.msk.bf16.mxu0 (!%p473_p3), %vm3205_vm0, %v3204_v1  ;;  %s3209_s24 = smov (!%p473_p3), 104   ;;  %v675_v17 = vunpack.c.l.s4 (!%p473_p3), %v3210_v16  ;;  %v3211_v21 = vmov (!%p473_p3), 1934713408   ;;  %s3213_s25 = smov (!%p473_p3), 64   ;;  %vm1402_vm4 = vcmask (!%p473_p3), 64512   ;;  %vm2515_vm5 = vcmask (!%p473_p3), 130048  }
   0xa   : > { %v692_v22 = vunpack.c.l.s4 (!%p473_p3), %v3211_v21  ;;  %vm2517_vm6 = vcmask (!%p473_p3), 195584  }
   0xb   : > { %v676_v19 = vunpack.c.0.s8 (!%p473_p3), %v675_v17 }
   0xc   : > { %3018 = vmatpush3.bf16.msra.mxu1 (!%p473_p3), %v3145_v2  ;;  %v693_v29 = vunpack.c.0.s8 (!%p473_p3), %v692_v22 }
   0xd   : > { %3023 = vmatprep.subr.bf16.mxu1 (!%p473_p3), %v3204_v1  ;;  %v3352_v26 = vsub.s32 (!%p473_p3), %v676_v19, %v678_v20 }
   0xe   : > { %s3653_s18 = smov (!%p531_p4, %s3194_s18), 1  ;;  %v3356_v38 = vsub.s32 %v693_v29, %v678_v20 }
   0xf   : > { %s3331_s26 = sshll.u32 %s3653_s18, 3 }
  0x10   : > { %s534_s29 = scalar_lea.vmem %s3632_s0, %s3331_s26  ;;  %s541_s28 = scalar_lea.vmem %s3633_s1, %s3331_s26 }
  0x11   : > { %v557_v3 = vld [vmem:[%s534_s29] sm:$0xff]  ;;  %s544_s29 = scalar_lea.vmem %s3634_s2, %s3653_s18  ;;  %s551_s16 = scalar_lea.vmem %s3647_s15, %s3331_s26 }
  0x12   : > { %v558_v4 = vpack.c.bf16 %v557_v3, %v557_v3 }
  0x14   : > { %3020 = vmatmul.mubr.msk.bf16.vlgmr.msra.gmra.mrb[0].mxu1 %vm582_vm1, %v558_v4 }
  0x15   : > { %3025 = vmatprep.mubr.msk.bf16.mxu1 %vm3205_vm0, %v3204_v1 }
  0xe7   : > { %v620_v6 = vpop.f32.mrb[0].mxu1 }
  0xe8   : > { %v621_v7 = vadd.f32 %v2939_v5, %v620_v6  ;;  %v3021_v8 = vpop.f32.mrb[1].mxu1 }
  0xe9   : > { %v623_v9 = vpop.f32.mrb[2].mxu1 }
  0xea   : > { %v626_v10 = vmul.f32 0.35355338, %v621_v7  ;;  %v3022_v11 = vpop.f32.mrb[3].mxu1  ;;  %v3344_v12 = vpack.c.bf16 %v621_v7, %v621_v7 }
  0xec   : > { %v627_v13 = vpack.c.bf16 %v626_v10, %v626_v10  ;;  %634 = vrot.lane.b32.xlu0 %v3344_v12, %s3206_s17 }
  0xee   : > { %629 = vst.msk [vmem:[#allocation2] sm:$0xf] %vm628_vm2, %v627_v13 }
  0xf5   : > { %v3367_v53 = vld [vmem:[#allocation2] sm:$0xf] }
 0x15e   : > { %v635_v14 = vpop.permute.xlu0 %634 }
 0x15f   : > { %638 = vst.msk [vmem:[#allocation2 + $0x4] sm:$0xf] %vm628_vm2, %v635_v14 }
 0x166   : > { %v651_v15 = vld [vmem:[#allocation2 + $0x4] sm:$0xf] }
 0x167   : > { %744 = vrot.lane.b32.xlu1 %v651_v15, %s3207_s22  ;;  %742 = vrot.lane.b32.xlu0 %v651_v15, %s3208_s23  ;;  %v751_v28 = vshrl.u32 %v651_v15, 16 }
 0x16b   : > { %746 = vrot.lane.b32.xlu1 %v651_v15, %s3209_s24 }
 0x1d9   : > { %v745_v23 = vpop.permute.xlu1 %744  ;;  %v743_v24 = vpop.permute.xlu0 %742 }
 0x1da   : > { %v752_v25 = vshrl.u32 %v743_v24, 16  ;;  %v750_v27 = vpack.i.b16 %v743_v24, %v651_v15  ;;  %v757_v31 = vshrl.u32 %v745_v23, 16 }
 0x1dc   : > { %v753_v32 = vpack.i.b16 %v752_v25, %v751_v28  ;;  %v767_v35 = vrot.slane %v750_v27, %v3352_v26 }
 0x1dd   : > { %v747_v30 = vpop.permute.xlu1 %746 }
 0x1de   : > { %v756_v33 = vpack.i.b16 %v747_v30, %v745_v23  ;;  %v758_v34 = vshrl.u32 %v747_v30, 16  ;;  %v801_v41 = vrot.slane %v753_v32, %v3352_v26 }
 0x1e0   : > { %v759_v36 = vpack.i.b16 %v758_v34, %v757_v31  ;;  %v775_v37 = vrot.slane %v756_v33, %v3352_v26 }
 0x1e2   : > { %v777_v39 = vcombine.high %v767_v35, %v775_v37  ;;  %v776_v40 = vcombine.low %v767_v35, %v775_v37  ;;  %v809_v42 = vrot.slane %v759_v36, %v3352_v26 }
 0x1e4   : > { %v791_v43 = vrot.slane %v777_v39, %v3356_v38  ;;  %v784_v44 = vrot.slane %v776_v40, %v3356_v38  ;;  %v810_v45 = vcombine.low %v801_v41, %v809_v42  ;;  %v811_v49 = vcombine.high %v801_v41, %v809_v42 }
 0x1e6   : > { %1048 = vxpose.xlu1.c.b16.start.end [1/1] (short) (narrow) %v791_v43, 16  ;;  %984 = vxpose.xlu0.c.b16.start.end [1/1] (short) (narrow) %v784_v44, 16  ;;  %v792_v47 = vcombine.high %v784_v44, %v3212_v46  ;;  %v818_v48 = vrot.slane %v810_v45, %v3356_v38  ;;  %v825_v50 = vrot.slane %v811_v49, %v3356_v38  ;;  %v664_v45 = vshrl.u32 %v3367_v53, 16 }
 0x1e7   : > { %v793_v51 = vcombine.high %v791_v43, %v3212_v46 }
 0x1e8   : > { %v826_v52 = vcombine.high %v818_v48, %v3212_v46  ;;  %v827_v54 = vcombine.high %v825_v50, %v3212_v46 }
 0x1ea   : > { %1016 = vxpose.xlu0.c.b16.start.end [1/1] (short) (narrow) %v792_v47, 16  ;;  %1000 = vxpose.xlu1.c.b16.start.end [1/1] (short) (narrow) %v818_v48, 16 }
 0x1ee   : > { %1064 = vxpose.xlu0.c.b16.start.end [1/1] (short) (narrow) %v825_v50, 16  ;;  %1080 = vxpose.xlu1.c.b16.start.end [1/1] (short) (narrow) %v793_v51, 16 }
 0x1f2   : > { %1032 = vxpose.xlu0.c.b16.start.end [1/1] (short) (narrow) %v826_v52, 16  ;;  %655 = vrot.lane.b32.xlu1 %v3367_v53, %s3208_s23 }
 0x1f6   : > { %1096 = vxpose.xlu0.c.b16.start.end [1/1] (short) (narrow) %v827_v54, 16  ;;  %659 = vrot.lane.b32.xlu1 %v3367_v53, %s3209_s24 }
 0x1ff   : > { %657 = vrot.lane.b32.xlu0 %v3367_v53, %s3207_s22 }
 0x24c   : > { %v1056_v55 = vpop.trf.xlu1  ;;  %v992_v56 = vpop.trf.xlu0 }
 0x24d   : > { %v1112_v63 = vcombine.low %v992_v56, %v1056_v55 }
 0x24f   : > { %v1119_v4 = vrot.slane %v1112_v63, %v3352_v26 }
 0x250   : > { %v1024_v57 = vpop.trf.xlu0  ;;  %v1008_v58 = vpop.trf.xlu1 }
 0x254   : > { %v1072_v59 = vpop.trf.xlu0  ;;  %v1088_v60 = vpop.trf.xlu1 }
 0x255   : > { %v1120_v61 = vcombine.low %v1024_v57, %v1088_v60  ;;  %v1146_v0 = vcombine.low %v1008_v58, %v1072_v59 }
 0x257   : > { %v1127_v2 = vrot.slane %v1120_v61, %v3352_v26  ;;  %v1153_v6 = vrot.slane %v1146_v0, %v3352_v26 }
 0x258   : > { %v1040_v62 = vpop.trf.xlu0 }
 0x259   : > { %v1128_v7 = vcombine.low %v1119_v4, %v1127_v2  ;;  %v1129_v8 = vcombine.high %v1119_v4, %v1127_v2 }
 0x25b   : > { %v1136_v13 = vrot.slane %v1128_v7, %v3356_v38  ;;  %v1143_v14 = vrot.slane %v1129_v8, %v3356_v38 }
 0x25c   : > { %v1104_v3 = vpop.trf.xlu0 }
 0x25d   : > { %v1154_v5 = vcombine.low %v1040_v62, %v1104_v3  ;;  %v1184_v22 = vshrl.u32 %v1136_v13, 16  ;;  %v1200_v23 = vshrl.u32 %v1143_v14, 16  ;;  %v1144_v24 = vcombine.high %v1136_v13, %v3212_v46 }
 0x25e   : > { %v1145_v31 = vcombine.high %v1143_v14, %v3212_v46 }
 0x25f   : > { %v1161_v9 = vrot.slane %v1154_v5, %v3352_v26  ;;  %v1192_v30 = vshrl.u32 %v1144_v24, 16 }
 0x260   : > { %v1208_v35 = vshrl.u32 %v1145_v31, 16 }
 0x261   : > { %v1162_v10 = vcombine.low %v1153_v6, %v1161_v9  ;;  %v1163_v11 = vcombine.high %v1153_v6, %v1161_v9 }
 0x263   : > { %v1170_v15 = vrot.slane %v1162_v10, %v3356_v38  ;;  %v1177_v16 = vrot.slane %v1163_v11, %v3356_v38 }
 0x264   : > { %v656_v39 = vpop.permute.xlu1 %655 }
 0x265   : > { %v1198_v17 = vpack.i.b16 %v1177_v16, %v1143_v14  ;;  %v1182_v18 = vpack.i.b16 %v1170_v15, %v1136_v13  ;;  %v1185_v19 = vshrl.u32 %v1170_v15, 16  ;;  %v1201_v20 = vshrl.u32 %v1177_v16, 16 }
 0x266   : > { %v1178_v21 = vcombine.high %v1170_v15, %v3212_v46  ;;  %v1179_v29 = vcombine.high %v1177_v16, %v3212_v46  ;;  %v665_v43 = vshrl.u32 %v656_v39, 16  ;;  %v663_v50 = vpack.i.b16 %v656_v39, %v3367_v53 }
 0x267   : > { %1276 = vxpose.xlu0.c.b16.start.end [1/1] (short) (narrow) %v1198_v17, 16  ;;  %1212 = vxpose.xlu1.c.b16.start.end [1/1] (short) (narrow) %v1182_v18, 16  ;;  %v1186_v25 = vpack.i.b16 %v1185_v19, %v1184_v22  ;;  %v1202_v27 = vpack.i.b16 %v1201_v20, %v1200_v23 }
 0x268   : > { %v1193_v28 = vshrl.u32 %v1178_v21, 16  ;;  %v1190_v32 = vpack.i.b16 %v1178_v21, %v1144_v24  ;;  %v1209_v34 = vshrl.u32 %v1179_v29, 16  ;;  %v1206_v36 = vpack.i.b16 %v1179_v29, %v1145_v31  ;;  %v660_v41 = vpop.permute.xlu1 %659 }
 0x269   : > { %v671_v44 = vshrl.u32 %v660_v41, 16  ;;  %v666_v48 = vpack.i.b16 %v665_v43, %v664_v45 }
 0x26a   : > { %v1194_v33 = vpack.i.b16 %v1193_v28, %v1192_v30  ;;  %v1210_v37 = vpack.i.b16 %v1209_v34, %v1208_v35 }
 0x26b   : > { %1228 = vxpose.xlu0.c.b16.start.end [1/1] (short) (narrow) %v1186_v25, 16  ;;  %1292 = vxpose.xlu1.c.b16.start.end [1/1] (short) (narrow) %v1202_v27, 16  ;;  %v714_v52 = vrot.slane %v666_v48, %v3352_v26 }
 0x26f   : > { %1244 = vxpose.xlu0.c.b16.start.end [1/1] (short) (narrow) %v1190_v32, 16  ;;  %1260 = vxpose.xlu1.c.b16.start.end [1/1] (short) (narrow) %v1194_v33, 16 }
 0x271   : > { %v658_v40 = vpop.permute.xlu0 %657 }
 0x272   : > { %v670_v42 = vshrl.u32 %v658_v40, 16  ;;  %v669_v49 = vpack.i.b16 %v660_v41, %v658_v40 }
 0x273   : > { %1308 = vxpose.xlu0.c.b16.start.end [1/1] (short) (narrow) %v1206_v36, 16  ;;  %1324 = vxpose.xlu1.c.b16.start.end [1/1] (short) (narrow) %v1210_v37, 16 }
 0x274   : > { %v672_v47 = vpack.i.b16 %v671_v44, %v670_v42  ;;  %v688_v54 = vrot.slane %v669_v49, %v3352_v26 }
 0x276   : > { %v722_v51 = vrot.slane %v672_v47, %v3352_v26 }
 0x278   : > { %v723_v55 = vcombine.low %v714_v52, %v722_v51  ;;  %v724_v56 = vcombine.high %v714_v52, %v722_v51 }
 0x27a   : > { %v731_v61 = vrot.slane %v723_v55, %v3356_v38  ;;  %v738_v62 = vrot.slane %v724_v56, %v3356_v38 }
 0x27c   : > { %639 = vrot.lane.b32.xlu0 %v3344_v12, %s3213_s25  ;;  %v680_v12 = vrot.slane %v663_v50, %v3352_v26  ;;  %v947_v3 = vcombine.low %v731_v61, %v738_v62  ;;  %v2946_v4 = vcombine.high %v731_v61, %v738_v62  ;;  %v2944_v61 = vld [vmem:[%s544_s29] ss:$0 sm:$0xff] }
 0x27e   : > { %v689_v57 = vcombine.low %v680_v12, %v688_v54  ;;  %v690_v58 = vcombine.high %v680_v12, %v688_v54  ;;  %v954_v9 = vrot.slane %v947_v3, %v3352_v26  ;;  %v962_v10 = vrot.slane %v2946_v4, %v3352_v26 }
 0x280   : > { %v697_v53 = vrot.slane %v689_v57, %v3356_v38  ;;  %v704_v63 = vrot.slane %v690_v58, %v3356_v38  ;;  %v963_v20 = vcombine.low %v954_v9, %v962_v10 }
 0x282   : > { %v922_v5 = vcombine.low %v697_v53, %v704_v63  ;;  %v2945_v6 = vcombine.high %v697_v53, %v704_v63  ;;  %v970_v31 = vrot.slane %v963_v20, %v3356_v38 }
 0x284   : > { %v929_v14 = vrot.slane %v922_v5, %v3352_v26  ;;  %v937_v15 = vrot.slane %v2945_v6, %v3352_v26  ;;  %v971_v41 = vcombine.high %v970_v31, %v3212_v46  ;;  %v976_v51 = vshrl.u32 %v970_v31, 16 }
 0x286   : > { %v938_v25 = vcombine.low %v929_v14, %v937_v15  ;;  %v982_v57 = vshrl.u32 %v971_v41, 16 }
 0x288   : > { %v945_v32 = vrot.slane %v938_v25, %v3356_v38 }
 0x28a   : > { %v974_v44 = vpack.i.b16 %v970_v31, %v945_v32  ;;  %v946_v45 = vcombine.high %v945_v32, %v3212_v46  ;;  %v975_v52 = vshrl.u32 %v945_v32, 16 }
 0x28c   : > { %v980_v50 = vpack.i.b16 %v971_v41, %v946_v45  ;;  %v977_v55 = vpack.i.b16 %v976_v51, %v975_v52  ;;  %v981_v58 = vshrl.u32 %v946_v45, 16 }
 0x2cd   : > { %v1284_v59 = vpop.trf.xlu0  ;;  %v1220_v60 = vpop.trf.xlu1 }
 0x2ce   : > { %v1340_v11 = vcombine.low %v1220_v60, %v1284_v59  ;;  %v983_v60 = vpack.i.b16 %v982_v57, %v981_v58 }
 0x2d0   : > { %v1347_v21 = vrot.slane %v1340_v11, %v3352_v26 }
 0x2d1   : > { %v1236_v0 = vpop.trf.xlu0  ;;  %v1300_v2 = vpop.trf.xlu1 }
 0x2d2   : > { %v1365_v13 = vcombine.low %v1236_v0, %v1300_v2 }
 0x2d4   : > { %v1372_v22 = vrot.slane %v1365_v13, %v3352_v26 }
 0x2d5   : > { %v1252_v7 = vpop.trf.xlu0  ;;  %v1268_v8 = vpop.trf.xlu1 }
 0x2d9   : > { %v1316_v16 = vpop.trf.xlu0  ;;  %v1332_v17 = vpop.trf.xlu1 }
 0x2da   : > { %v1348_v18 = vcombine.low %v1252_v7, %v1316_v16  ;;  %v1373_v19 = vcombine.low %v1268_v8, %v1332_v17 }
 0x2dc   : > { %v1355_v23 = vrot.slane %v1348_v18, %v3352_v26  ;;  %v1380_v24 = vrot.slane %v1373_v19, %v3352_v26 }
 0x2de   : > { %v1356_v27 = vcombine.low %v1347_v21, %v1355_v23  ;;  %v1381_v28 = vcombine.low %v1372_v22, %v1380_v24 }
 0x2e0   : > { %v1363_v29 = vrot.slane %v1356_v27, %v3356_v38  ;;  %v1388_v30 = vrot.slane %v1381_v28, %v3356_v38 }
 0x2e2   : > { %v1392_v33 = vpack.i.b16 %v1388_v30, %v1363_v29  ;;  %v1364_v34 = vcombine.high %v1363_v29, %v3212_v46  ;;  %v1389_v35 = vcombine.high %v1388_v30, %v3212_v46  ;;  %v1393_v36 = vshrl.u32 %v1363_v29, 16 }
 0x2e3   : > { %v1394_v37 = vshrl.u32 %v1388_v30, 16 }
 0x2e4   : > { %v1408_v39 = vsel %vm1406_vm3, %v1392_v33, 0  ;;  %v1398_v40 = vpack.i.b16 %v1389_v35, %v1364_v34  ;;  %v1399_v47 = vshrl.u32 %v1364_v34, 16  ;;  %v1400_v48 = vshrl.u32 %v1389_v35, 16 }
 0x2e5   : > { %3024 = vmatpush3.bf16.msra.mxu1 %v1408_v39  ;;  %v1395_v42 = vpack.i.b16 %v1394_v37, %v1393_v36 }
 0x2e6   : > { %v1500_v43 = vsel %vm1406_vm3, %v1398_v40, 0  ;;  %3029 = vmatprep.subr.bf16.mxu1 %v3204_v1  ;;  %v1401_v54 = vpack.i.b16 %v1400_v48, %v1399_v47 }
 0x2e7   : > { %3036 = vmatpush3.bf16.msra.mxu0 %v1500_v43  ;;  %v1454_v49 = vsel %vm1406_vm3, %v1395_v42, 0 }
 0x2e8   : > { %3026 = vmatmul.mubr.msk.bf16.vlgmr.msra.gmra.mrb[4].mxu1 %vm1402_vm4, %v974_v44  ;;  %3047 = vmatprep.subr.bf16.mxu0 %v3204_v1  ;;  %v1546_v56 = vsel %vm1406_vm3, %v1401_v54, 0 }
 0x2e9   : > { %3030 = vmatpush3.bf16.msra.mxu1 %v1454_v49  ;;  %3031 = vmatprep.mubr.msk.bf16.mxu1 %vm3205_vm0, %v3204_v1 }
 0x2ea   : > { %3038 = vmatmul.mubr.msk.bf16.vlgmr.msra.gmra.mrb[0].mxu0 %vm1402_vm4, %v980_v50  ;;  %3041 = vmatprep.subr.bf16.mxu1 %v3204_v1 }
 0x2eb   : > { %3049 = vmatprep.mubr.msk.bf16.mxu0 %vm3205_vm0, %v3204_v1 }
 0x2ee   : > { %v640_v12 = vpop.permute.xlu0 %639 }
 0x2ef   : > { %643 = vst.msk [vmem:[#allocation2 + $0x8] sm:$0xf] %vm628_vm2, %v640_v12 }
 0x2f0   : > { %3032 = vmatmul.mubr.msk.bf16.vlgmr.msra.gmra.mrb[8].mxu1 %vm1402_vm4, %v977_v55 }
 0x2f1   : > { %3042 = vmatpush3.bf16.msra.mxu1 %v1546_v56  ;;  %3043 = vmatprep.mubr.msk.bf16.mxu1 %vm3205_vm0, %v3204_v1 }
 0x2f2   : > { %3053 = vmatprep.subr.bf16.mxu1 %v3204_v1 }
 0x2f6   : > { %v653_v59 = vld [vmem:[#allocation2 + $0x8] sm:$0xf] }
 0x2f7   : > { %829 = vrot.lane.b32.xlu1 %v653_v59, %s3208_s23  ;;  %v838_v27 = vshrl.u32 %v653_v59, 16  ;;  %s3215_s23 = smov 8  }
 0x2f8   : > { %3044 = vmatmul.mubr.msk.bf16.vlgmr.msra.gmra.mrb[12].mxu1 %vm1402_vm4, %v983_v60 }
 0x2f9   : > { %3055 = vmatprep.mubr.msk.bf16.mxu1 %vm3205_vm0, %v3204_v1 }
 0x2fb   : > { %831 = vrot.lane.b32.xlu1 %v653_v59, %s3207_s22  ;;  %s3214_s22 = smov 16  }
 0x369   : > { %v830_v22 = vpop.permute.xlu1 %829 }
 0x36a   : > { %v839_v24 = vshrl.u32 %v830_v22, 16  ;;  %v837_v28 = vpack.i.b16 %v830_v22, %v653_v59 }
 0x36c   : > { %v840_v30 = vpack.i.b16 %v839_v24, %v838_v27  ;;  %v854_v34 = vrot.slane %v837_v28, %v3352_v26 }
 0x36d   : > { %v832_v25 = vpop.permute.xlu1 %831 }
 0x36e   : > { %v844_v31 = vshrl.u32 %v832_v25, 16  ;;  %v888_v37 = vrot.slane %v840_v30, %v3352_v26 }
 0x3bb   : > { %v1444_v62 = vpop.f32.mrb[4].mxu1 }
 0x3bc   : > { %v3442_v53 = vadd.f32 %v2944_v61, %v1444_v62  ;;  %v3027_v63 = vpop.f32.mrb[5].mxu1 }
 0x3bd   : > { %v1447_v0 = vpop.f32.mrb[6].mxu1  ;;  %v1536_v2 = vpop.f32.mrb[0].mxu0 }
 0x3be   : > { %v3444_v3 = vadd.f32 %v2944_v61, %v1536_v2  ;;  %v3028_v4 = vpop.f32.mrb[7].mxu1  ;;  %v3039_v5 = vpop.f32.mrb[1].mxu0  ;;  %v1588_v6 = vsel %vm1402_vm4, %v3442_v53, -inf }
 0x3bf   : > { %v1539_v7 = vpop.f32.mrb[2].mxu0  ;;  %1589 = vmax.xlane.f32.xlu1 %v1588_v6 }
 0x3c0   : > { %v3040_v8 = vpop.f32.mrb[3].mxu0  ;;  %v1594_v9 = vsel %vm1402_vm4, %v3444_v3, -inf }
 0x3c3   : > { %1595 = vmax.xlane.f32.xlu1 %v1594_v9  ;;  %v1490_v10 = vpop.f32.mrb[8].mxu1 }
 0x3c4   : > { %v3450_v11 = vadd.f32 %v2944_v61, %v1490_v10  ;;  %v3033_v13 = vpop.f32.mrb[9].mxu1 }
 0x3c5   : > { %v1493_v14 = vpop.f32.mrb[10].mxu1 }
 0x3c6   : > { %v3034_v15 = vpop.f32.mrb[11].mxu1  ;;  %v1591_v16 = vsel %vm1402_vm4, %v3450_v11, -inf }
 0x3c7   : > { %1592 = vmax.xlane.f32.xlu0 %v1591_v16 }
 0x3cb   : > { %v1582_v17 = vpop.f32.mrb[12].mxu1 }
 0x3cc   : > { %v3454_v18 = vadd.f32 %v2944_v61, %v1582_v17  ;;  %v3045_v19 = vpop.f32.mrb[13].mxu1 }
 0x3cd   : > { %v1585_v20 = vpop.f32.mrb[14].mxu1 }
 0x3ce   : > { %v3046_v21 = vpop.f32.mrb[15].mxu1  ;;  %v1597_v51 = vsel %vm1402_vm4, %v3454_v18, -inf }
 0x3dd   : > { %833 = vrot.lane.b32.xlu0 %v653_v59, %s3209_s24  ;;  %s3216_s24 = smov 24  }
 0x44c   : > { %v1590_v12 = vpop.xlane.xlu1 %1589 }
 0x44d   : > { %v1600_v27 = vsub.f32 %v3442_v53, %v1590_v12 }
 0x450   : > { %v1596_v55 = vpop.xlane.xlu1 %1595 }
 0x454   : > { %v3457_v23 = vpop.xlane.xlu0 %1592 }
 0x458   : > { %v834_v29 = vpop.permute.xlu0 %833 }
 0x459   : > { %v843_v32 = vpack.i.b16 %v834_v29, %v832_v25  ;;  %v845_v33 = vshrl.u32 %v834_v29, 16 }
 0x45b   : > { %v846_v35 = vpack.i.b16 %v845_v33, %v844_v31  ;;  %v862_v36 = vrot.slane %v843_v32, %v3352_v26  ;;  %v1601_v31 = vsub.f32 %v3450_v11, %v3457_v23 }
 0x45d   : > { %v863_v39 = vcombine.low %v854_v34, %v862_v36  ;;  %v896_v40 = vrot.slane %v846_v35, %v3352_v26  ;;  %v864_v41 = vcombine.high %v854_v34, %v862_v36  ;;  %v1604_v35 = vmul.f32 1.442695, %v1600_v27 }
 0x45e   : > { %v1602_v36 = vsub.f32 %v3444_v3, %v1596_v55  ;;  %v1606_v53 = vmul.f32 1.442695, %v1601_v31 }
 0x45f   : > { %v871_v42 = vrot.slane %v863_v39, %v3356_v38  ;;  %v897_v43 = vcombine.low %v888_v37, %v896_v40  ;;  %v898_v44 = vcombine.high %v888_v37, %v896_v40  ;;  %v878_v47 = vrot.slane %v864_v41, %v3356_v38 }
 0x460   : > { %3158 = vpow2.f32 %v1604_v35 }
 0x461   : > { %1636 = vxpose.xlu1.c.b16.start.end [1/1] (short) (narrow) %v871_v42, 16  ;;  %v905_v45 = vrot.slane %v897_v43, %v3356_v38  ;;  %v879_v48 = vcombine.high %v871_v42, %v3212_v46  ;;  %v880_v49 = vcombine.high %v878_v47, %v3212_v46  ;;  %v912_v52 = vrot.slane %v898_v44, %v3356_v38 }
 0x462   : > { %v1608_v43 = vmul.f32 1.442695, %v1602_v36  ;;  %3160 = vpow2.f32 %v1606_v53 }
 0x463   : > { %1652 = vxpose.xlu0.c.b16.start.end [1/1] (short) (narrow) %v905_v45, 16  ;;  %v913_v50 = vcombine.high %v905_v45, %v3212_v46  ;;  %v914_v54 = vcombine.high %v912_v52, %v3212_v46 }
 0x464   : > { %3162 = vpow2.f32 %v1608_v43 }
 0x465   : > { %1668 = vxpose.xlu1.c.b16.start.end [1/1] (short) (narrow) %v879_v48, 16 }
 0x467   : > { %1732 = vxpose.xlu0.c.b16.start.end [1/1] (short) (narrow) %v880_v49, 16 }
 0x469   : > { %1684 = vxpose.xlu1.c.b16.start.end [1/1] (short) (narrow) %v913_v50, 16 }
 0x46a   : > { %v3159_v44 = vpop.eup %3158 }
 0x46b   : > { %v1612_v45 = vsel %vm1402_vm4, %v3159_v44, 0.0 }
 0x46c   : > { %v3161_v3 = vpop.eup %3160 }
 0x476   : > { %1598 = vmax.xlane.f32.xlu1 %v1597_v51 }
 0x4a3   : > { %1700 = vxpose.xlu1.c.b16.start.end [1/1] (short) (narrow) %v878_v47, 16  ;;  %v3163_v47 = vpop.eup %3162 }
 0x4a4   : > { %v1618_v49 = vsel %vm1402_vm4, %v3163_v47, 0.0 }
 0x4a7   : > { %1716 = vxpose.xlu1.c.b16.start.end [1/1] (short) (narrow) %v912_v52, 16 }
 0x4ab   : > { %1748 = vxpose.xlu1.c.b16.start.end [1/1] (short) (narrow) %v914_v54, 16 }
 0x4c7   : > { %v1644_v56 = vpop.trf.xlu1 }
 0x4c9   : > { %v1660_v59 = vpop.trf.xlu0 }
 0x4cb   : > { %v1676_v57 = vpop.trf.xlu1 }
 0x4cd   : > { %v1740_v61 = vpop.trf.xlu0 }
 0x4ce   : > { %v1772_v0 = vcombine.low %v1676_v57, %v1740_v61 }
 0x4cf   : > { %v1692_v58 = vpop.trf.xlu1 }
 0x4d0   : > { %v1779_v5 = vrot.slane %v1772_v0, %v3352_v26 }
 0x503   : > { %v1599_v60 = vpop.xlane.xlu1 %1598 }
 0x504   : > { %v1603_v40 = vsub.f32 %v3454_v18, %v1599_v60  ;;  %v1615_v18 = vsel %vm1402_vm4, %v3161_v3, 0.0 }
 0x506   : > { %v1610_v23 = vmul.f32 1.442695, %v1603_v40 }
 0x508   : > { %3164 = vpow2.f32 %v1610_v23 }
 0x509   : > { %v1708_v62 = vpop.trf.xlu1 }
 0x50a   : > { %v1764_v63 = vcombine.low %v1644_v56, %v1708_v62 }
 0x50c   : > { %v1771_v2 = vrot.slane %v1764_v63, %v3352_v26 }
 0x50d   : > { %v1724_v4 = vpop.trf.xlu1 }
 0x50e   : > { %v1798_v6 = vcombine.low %v1660_v59, %v1724_v4  ;;  %v1780_v7 = vcombine.low %v1771_v2, %v1779_v5  ;;  %v1781_v19 = vcombine.high %v1771_v2, %v1779_v5 }
 0x510   : > { %v1805_v10 = vrot.slane %v1798_v6, %v3352_v26  ;;  %v1788_v14 = vrot.slane %v1780_v7, %v3356_v38  ;;  %v1795_v34 = vrot.slane %v1781_v19, %v3356_v38 }
 0x511   : > { %v1756_v8 = vpop.trf.xlu1 }
 0x512   : > { %v1806_v9 = vcombine.low %v1692_v58, %v1756_v8  ;;  %v1836_v20 = vshrl.u32 %v1788_v14, 16  ;;  %v1796_v24 = vcombine.high %v1788_v14, %v3212_v46  ;;  %v1852_v42 = vshrl.u32 %v1795_v34, 16  ;;  %v3165_v48 = vpop.eup %3164 }
 0x513   : > { %v1621_v50 = vsel %vm1402_vm4, %v3165_v48, 0.0  ;;  %v1797_v52 = vcombine.high %v1795_v34, %v3212_v46 }
 0x514   : > { %v1813_v13 = vrot.slane %v1806_v9, %v3352_v26  ;;  %v1844_v33 = vshrl.u32 %v1796_v24, 16 }
 0x515   : > { %v1860_v55 = vshrl.u32 %v1797_v52, 16 }
 0x516   : > { %v1814_v15 = vcombine.low %v1805_v10, %v1813_v13  ;;  %v1815_v16 = vcombine.high %v1805_v10, %v1813_v13 }
 0x518   : > { %v1822_v17 = vrot.slane %v1814_v15, %v3356_v38  ;;  %v1829_v30 = vrot.slane %v1815_v16, %v3356_v38 }
 0x51a   : > { %v1834_v21 = vpack.i.b16 %v1822_v17, %v1788_v14  ;;  %v1837_v22 = vshrl.u32 %v1822_v17, 16  ;;  %v1830_v25 = vcombine.high %v1822_v17, %v3212_v46  ;;  %v1853_v39 = vshrl.u32 %v1829_v30, 16 }
 0x51b   : > { %v1850_v41 = vpack.i.b16 %v1829_v30, %v1795_v34  ;;  %v1831_v51 = vcombine.high %v1829_v30, %v3212_v46 }
 0x51c   : > { %1864 = vxpose.xlu0.c.b16.start.end [1/1] (short) (narrow) %v1834_v21, 16  ;;  %v1838_v28 = vpack.i.b16 %v1837_v22, %v1836_v20  ;;  %v1845_v29 = vshrl.u32 %v1830_v25, 16  ;;  %v1842_v32 = vpack.i.b16 %v1830_v25, %v1796_v24  ;;  %v1854_v11 = vpack.i.b16 %v1853_v39, %v1852_v42 }
 0x51d   : > { %v1861_v54 = vshrl.u32 %v1831_v51, 16  ;;  %v1858_v12 = vpack.i.b16 %v1831_v51, %v1797_v52 }
 0x51e   : > { %1880 = vxpose.xlu1.c.b16.start.end [1/1] (short) (narrow) %v1838_v28, 16  ;;  %v1846_v37 = vpack.i.b16 %v1845_v29, %v1844_v33 }
 0x51f   : > { %v1862_v56 = vpack.i.b16 %v1861_v54, %v1860_v55 }
 0x520   : > { %1896 = vxpose.xlu0.c.b16.start.end [1/1] (short) (narrow) %v1842_v32, 16 }
 0x522   : > { %1912 = vxpose.xlu1.c.b16.start.end [1/1] (short) (narrow) %v1846_v37, 16 }
 0x524   : > { %1928 = vxpose.xlu0.c.b16.start.end [1/1] (short) (narrow) %v1850_v41, 16 }
 0x526   : > { %1944 = vxpose.xlu1.c.b16.start.end [1/1] (short) (narrow) %v1854_v11, 16 }
 0x531   : > { %1613 = vadd.xlane.f32.xlu0 %v1612_v45 }
 0x533   : > { %1616 = vadd.xlane.f32.xlu1 %v1615_v18 }
 0x535   : > { %1619 = vadd.xlane.f32.xlu0 %v1618_v49 }
 0x537   : > { %1622 = vadd.xlane.f32.xlu1 %v1621_v50 }
 0x562   : > { %1960 = vxpose.xlu0.c.b16.start.end [1/1] (short) (narrow) %v1858_v12, 16 }
 0x564   : > { %1976 = vxpose.xlu1.c.b16.start.end [1/1] (short) (narrow) %v1862_v56, 16 }
 0x582   : > { %v1872_v57 = vpop.trf.xlu0 }
 0x584   : > { %v1888_v58 = vpop.trf.xlu1 }
 0x586   : > { %v1904_v59 = vpop.trf.xlu0 }
 0x588   : > { %v1920_v60 = vpop.trf.xlu1 }
 0x58a   : > { %v1936_v61 = vpop.trf.xlu0 }
 0x58b   : > { %v1992_v5 = vcombine.low %v1872_v57, %v1936_v61 }
 0x58c   : > { %v1952_v62 = vpop.trf.xlu1 }
 0x58d   : > { %v2017_v8 = vcombine.low %v1888_v58, %v1952_v62  ;;  %v1999_v15 = vrot.slane %v1992_v5, %v3352_v26 }
 0x58f   : > { %v2024_v22 = vrot.slane %v2017_v8, %v3352_v26 }
 0x5be   : > { %v1614_v63 = vpop.xlane.xlu0 %1613 }
 0x5bf   : > { %3166 = vrcp.f32 %v1614_v63 }
 0x5c0   : > { %v1617_v0 = vpop.xlane.xlu1 %1616 }
 0x5c1   : > { %3168 = vrcp.f32 %v1617_v0 }
 0x5c2   : > { %v1620_v2 = vpop.xlane.xlu0 %1619 }
 0x5c3   : > { %3170 = vrcp.f32 %v1620_v2 }
 0x5c4   : > { %v1623_v4 = vpop.xlane.xlu1 %1622 }
 0x5c5   : > { %3172 = vrcp.f32 %v1623_v4 }
 0x5c8   : > { %v1968_v6 = vpop.trf.xlu0 }
 0x5c9   : > { %v3167_v7 = vpop.eup %3166  ;;  %v2000_v9 = vcombine.low %v1904_v59, %v1968_v6 }
 0x5ca   : > { %v1984_v10 = vpop.trf.xlu1  ;;  %v1628_v13 = vmul.f32 %v3167_v7, %v3159_v44 }
 0x5cb   : > { %v3169_v14 = vpop.eup %3168  ;;  %v2007_v16 = vrot.slane %v2000_v9, %v3352_v26  ;;  %v2025_v17 = vcombine.low %v1920_v60, %v1984_v10 }
 0x5cc   : > { %v1632_v19 = vpack.c.bf16 %v1628_v13, %v1628_v13  ;;  %v1629_v20 = vmul.f32 %v3169_v14, %v3161_v3 }
 0x5cd   : > { %v3171_v21 = vpop.eup %3170  ;;  %v2008_v24 = vcombine.low %v1999_v15, %v2007_v16  ;;  %v2032_v25 = vrot.slane %v2025_v17, %v3352_v26 }
 0x5ce   : > { %v2058_v27 = vsel %vm1402_vm4, %v1632_v19, 0  ;;  %v1633_v28 = vpack.c.bf16 %v1629_v20, %v1629_v20  ;;  %v1630_v29 = vmul.f32 %v3171_v21, %v3163_v47  ;;  %v3146_v19 = vld [vmem:[%s3637_s5] sm:$0xff]  }
 0x5cf   : > { %v3173_v30 = vpop.eup %3172  ;;  %v2015_v31 = vrot.slane %v2008_v24, %v3356_v38  ;;  %v2033_v32 = vcombine.low %v2024_v22, %v2032_v25  ;;  %3048 = vmatpush3.bf16.xpose.msra.mxu0 %v2058_v27 }
 0x5d0   : > { %v2104_v33 = vsel %vm1402_vm4, %v1633_v28, 0  ;;  %3059 = vmatprep.subr.bf16.mxu0 %v3204_v1  ;;  %v1631_v34 = vmul.f32 %v3173_v30, %v3165_v48  ;;  %v1634_v36 = vpack.c.bf16 %v1630_v29, %v1630_v29  ;;  %v3147_v30 = vld [vmem:[%s3637_s5 + $0x8] sm:$0xff]  }
 0x5d1   : > { %v2040_v35 = vrot.slane %v2033_v32, %v3356_v38  ;;  %3054 = vmatpush3.bf16.xpose.msra.mxu1 %v2104_v33  ;;  %v2045_v37 = vshrl.u32 %v2015_v31, 16  ;;  %v2016_v11 = vcombine.high %v2015_v31, %v3212_v46 }
 0x5d2   : > { %3065 = vmatprep.subr.bf16.mxu1 %v3204_v1  ;;  %v1635_v40 = vpack.c.bf16 %v1631_v34, %v1631_v34  ;;  %v2150_v43 = vsel %vm1402_vm4, %v1634_v36, 0 }
 0x5d3   : > { %v2044_v39 = vpack.i.b16 %v2040_v35, %v2015_v31  ;;  %v2046_v53 = vshrl.u32 %v2040_v35, 16  ;;  %v2041_v42 = vcombine.high %v2040_v35, %v3212_v46  ;;  %v2051_v3 = vshrl.u32 %v2016_v11, 16 }
 0x5d4   : > { %v2196_v23 = vsel %vm1402_vm4, %v1635_v40, 0 }
 0x5d5   : > { %v2047_v41 = vpack.i.b16 %v2046_v53, %v2045_v37  ;;  %v2052_v44 = vshrl.u32 %v2041_v42, 16  ;;  %v2050_v45 = vpack.i.b16 %v2041_v42, %v2016_v11 }
 0x5d6   : > { %3050 = vmatmul.mubr.msk.bf16.vlgmr.msra.gmra.mrb[4].mxu0 %vm1402_vm4, %v2044_v39 }
 0x5d7   : > { %3060 = vmatpush3.bf16.xpose.msra.mxu0 %v2150_v43  ;;  %3061 = vmatprep.mubr.msk.bf16.mxu0 %vm3205_vm0, %v3204_v1  ;;  %v2053_v47 = vpack.i.b16 %v2052_v44, %v2051_v3 }
 0x5d8   : > { %3056 = vmatmul.mubr.msk.bf16.vlgmr.msra.gmra.mrb[16].mxu1 %vm1402_vm4, %v2047_v41  ;;  %3071 = vmatprep.subr.bf16.mxu0 %v3204_v1 }
 0x5d9   : > { %3066 = vmatpush3.bf16.xpose.msra.mxu1 %v2196_v23  ;;  %3067 = vmatprep.mubr.msk.bf16.mxu1 %vm3205_vm0, %v3204_v1 }
 0x5da   : > { %3079 = vmatprep.subr.bf16.mxu1 %v3204_v1 }
 0x5de   : > { %3062 = vmatmul.mubr.msk.bf16.vlgmr.msra.gmra.mrb[8].mxu0 %vm1402_vm4, %v2050_v45 }
 0x5df   : > { %3075 = vmatprep.mubr.msk.bf16.mxu0 %vm3205_vm0, %v3204_v1  ;;  %3072 = vmatpush3.bf16.msra.mxu0 %v3146_v19  ;;  %v3154_v19 = vld [vmem:[%s3643_s11 + $0x20] sm:$0xff]  }
 0x5e0   : > { %3068 = vmatmul.mubr.msk.bf16.vlgmr.msra.gmra.mrb[20].mxu1 %vm1402_vm4, %v2053_v47  ;;  %3073 = vmatprep.subr.bf16.mxu0 %v3204_v1 }
 0x5e1   : > { %3083 = vmatprep.mubr.msk.bf16.mxu1 %vm3205_vm0, %v3204_v1 }
 0x5e3   : > { %3074 = vmatpush3.bf16.msra.mxu0 %v3147_v30 }
 0x5e4   : > { %3087 = vmatprep.subr.bf16.mxu0 %v3204_v1 }
 0x6a9   : > { %v2094_v46 = vpop.f32.mrb[4].mxu0 }
 0x6aa   : > { %2238 = vxpose.xlu0.b32.start.end [1/1] (short) (narrow) %v2094_v46, 8  ;;  %v3051_v18 = vpop.f32.mrb[5].mxu0 }
 0x6ab   : > { %v2097_v48 = vpop.f32.mrb[6].mxu0  ;;  %v2140_v49 = vpop.f32.mrb[16].mxu1 }
 0x6ac   : > { %v3052_v50 = vpop.f32.mrb[7].mxu0  ;;  %2270 = vxpose.xlu1.b32.start.end [1/1] (short) (narrow) %v2140_v49, 8  ;;  %v3057_v51 = vpop.f32.mrb[17].mxu1  ;;  %v2957_v48 = vld [vmem:[%s3638_s6] ss:$0 sm:$0xff] }
 0x6ad   : > { %v2143_v52 = vpop.f32.mrb[18].mxu1  ;;  %v2587_v50 = vld [vmem:[%s541_s28] sm:$0xff] }
 0x6ae   : > { %v3058_v54 = vpop.f32.mrb[19].mxu1 }
 0x6b1   : > { %v2186_v12 = vpop.f32.mrb[8].mxu0 }
 0x6b2   : > { %2302 = vxpose.xlu0.b32.start.end [1/1] (short) (narrow) %v2186_v12, 8  ;;  %v3063_v55 = vpop.f32.mrb[9].mxu0 }
 0x6b3   : > { %v2189_v56 = vpop.f32.mrb[10].mxu0  ;;  %v2232_v57 = vpop.f32.mrb[20].mxu1 }
 0x6b4   : > { %v3064_v58 = vpop.f32.mrb[11].mxu0  ;;  %v3069_v59 = vpop.f32.mrb[21].mxu1 }
 0x6b5   : > { %v2235_v60 = vpop.f32.mrb[22].mxu1 }
 0x6b6   : > { %2334 = vxpose.xlu0.b32.start.end [1/1] (short) (narrow) %v2232_v57, 8  ;;  %v3070_v61 = vpop.f32.mrb[23].mxu1 }
 0x72a   : > { %v2254_v62 = vpop.trf.xlu0 }
 0x72c   : > { %v2286_v0 = vpop.trf.xlu1 }
 0x732   : > { %v2318_v63 = vpop.trf.xlu0 }
 0x733   : > { %v2366_v2 = vcombine.low %v2254_v62, %v2318_v63  ;;  %v2367_v4 = vcombine.high %v2254_v62, %v2318_v63  ;;  %v3148_v62 = vld [vmem:[%s3641_s9] sm:$0xff]   ;;  %v3149_v63 = vld [vmem:[%s3641_s9 + $0x8] sm:$0xff]  }
 0x734   : > { %3080 = vmatpush3.bf16.msra.mxu1 %v3148_v62 }
 0x735   : > { %v2374_v8 = vrot.slane %v2366_v2, %v3352_v26  ;;  %v2381_v9 = vrot.slane %v2367_v4, %v3352_v26  ;;  %3081 = vmatprep.subr.bf16.mxu1 %v3204_v1  ;;  %v3151_v2 = vld [vmem:[%s3643_s11 + $0x8] sm:$0xff]   ;;  %v3152_v4 = vld [vmem:[%s3643_s11 + $0x10] sm:$0xff]  }
 0x736   : > { %v2350_v5 = vpop.trf.xlu0 }
 0x737   : > { %v2382_v6 = vcombine.low %v2286_v0, %v2350_v5  ;;  %v2383_v7 = vcombine.high %v2286_v0, %v2350_v5  ;;  %v3150_v0 = vld [vmem:[%s3643_s11] sm:$0xff]  }
 0x738   : > { %3082 = vmatpush3.bf16.msra.mxu1 %v3149_v63 }
 0x739   : > { %v2390_v10 = vrot.slane %v2382_v6, %v3352_v26  ;;  %v2397_v13 = vrot.slane %v2383_v7, %v3352_v26 }
 0x73b   : > { %v2398_v14 = vcombine.low %v2374_v8, %v2390_v10  ;;  %v2399_v15 = vcombine.high %v2374_v8, %v2390_v10  ;;  %v2414_v16 = vcombine.low %v2381_v9, %v2397_v13  ;;  %v2415_v17 = vcombine.high %v2381_v9, %v2397_v13  ;;  %v2961_v9 = vld [vmem:[%s3639_s7] ss:$0 sm:$0xff] }
 0x73c   : > { %v2962_v13 = vld [vmem:[%s3640_s8] ss:$0 sm:$0xff] }
 0x73d   : > { %v2406_v20 = vrot.slane %v2398_v14, %v3356_v38  ;;  %v2413_v21 = vrot.slane %v2399_v15, %v3356_v38  ;;  %v2422_v22 = vrot.slane %v2414_v16, %v3356_v38  ;;  %v2429_v24 = vrot.slane %v2415_v17, %v3356_v38  ;;  %v3153_v17 = vld [vmem:[%s3643_s11 + $0x18] sm:$0xff]  }
 0x73f   : > { %v2434_v25 = vcombine.low %v2406_v20, %v2413_v21  ;;  %v2955_v27 = vcombine.high %v2406_v20, %v2413_v21  ;;  %v2450_v28 = vcombine.low %v2422_v22, %v2429_v24  ;;  %v2956_v29 = vcombine.high %v2422_v22, %v2429_v24  ;;  %v3155_v20 = vld [vmem:[%s3643_s11 + $0x28] sm:$0xff]   ;;  %v3156_v21 = vld [vmem:[%s3643_s11 + $0x30] sm:$0xff]   ;;  %v3157_v22 = vld [vmem:[%s3643_s11 + $0x38] sm:$0xff]  }
 0x740   : > { %v2963_v24 = vld [vmem:[%s3642_s10] ss:$0 sm:$0xff] }
 0x741   : > { %v2441_v31 = vrot.slane %v2434_v25, %v3352_v26  ;;  %v2449_v32 = vrot.slane %v2955_v27, %v3352_v26  ;;  %v2457_v33 = vrot.slane %v2450_v28, %v3352_v26  ;;  %v2465_v34 = vrot.slane %v2956_v29, %v3352_v26 }
 0x743   : > { %v2467_v35 = vcombine.high %v2441_v31, %v2449_v32  ;;  %v2483_v36 = vcombine.high %v2457_v33, %v2465_v34  ;;  %v2466_v37 = vcombine.low %v2441_v31, %v2449_v32  ;;  %v2482_v39 = vcombine.low %v2457_v33, %v2465_v34 }
 0x745   : > { %v2481_v53 = vrot.slane %v2467_v35, %v3356_v38  ;;  %v2497_v40 = vrot.slane %v2483_v36, %v3356_v38  ;;  %v2474_v41 = vrot.slane %v2466_v37, %v3356_v38  ;;  %v2490_v42 = vrot.slane %v2482_v39, %v3356_v38  ;;  %v2967_v36 = vld [vmem:[%s3644_s12] ss:$0 sm:$0xff] }
 0x747   : > { %v2500_v43 = vcombine.low %v2481_v53, %v2497_v40  ;;  %v2499_v11 = vcombine.high %v2474_v41, %v2490_v42  ;;  %v2498_v23 = vcombine.low %v2474_v41, %v2490_v42  ;;  %v2501_v26 = vcombine.high %v2481_v53, %v2497_v40 }
 0x749   : > { %2507 = vrot.lane.b32.xlu1 %v2500_v43, %s3214_s22  ;;  %2503 = vrot.lane.b32.xlu0 %v2499_v11, %s3215_s23 }
 0x74d   : > { %2511 = vrot.lane.b32.xlu1 %v2501_v26, %s3216_s24 }
 0x7bb   : > { %v2508_v44 = vpop.permute.xlu1 %2507  ;;  %v2504_v3 = vpop.permute.xlu0 %2503 }
 0x7bc   : > { %v2514_v45 = vsel %vm1402_vm4, %v2498_v23, %v2504_v3 }
 0x7bd   : > { %v2516_v46 = vsel %vm2515_vm5, %v2514_v45, %v2508_v44 }
 0x7bf   : > { %v2512_v47 = vpop.permute.xlu1 %2511 }
 0x7c0   : > { %v2518_v38 = vsel %vm2517_vm6, %v2516_v46, %v2512_v47 }
 0x7c1   : > { %v2519_v18 = vpack.c.bf16 %v2518_v38, %v2518_v38 }
 0x7c3   : > { %3076 = vmatmul.mubr.msk.bf16.vlgmr.msra.gmra.mrb[12].mxu0 %vm582_vm1, %v2519_v18  ;;  %v2976_v18 = vld [vmem:[%s3645_s13] ss:$0 sm:$0xff] }
 0x7c4   : > { %3103 = vmatprep.mubr.msk.bf16.mxu0 %vm3205_vm0, %v3204_v1  ;;  %3088 = vmatpush3.bf16.msra.mxu0 %v3150_v0 }
 0x7c5   : > { %3089 = vmatprep.subr.bf16.mxu0 %v3204_v1 }
 0x7c8   : > { %3090 = vmatpush3.bf16.msra.mxu0 %v3151_v2 }
 0x7c9   : > { %3091 = vmatprep.subr.bf16.mxu0 %v3204_v1 }
 0x7cc   : > { %3092 = vmatpush3.bf16.msra.mxu0 %v3152_v4 }
 0x7cd   : > { %3093 = vmatprep.subr.bf16.mxu0 %v3204_v1 }
 0x7d0   : > { %3094 = vmatpush3.bf16.msra.mxu0 %v3153_v17 }
 0x7d1   : > { %3095 = vmatprep.subr.bf16.mxu0 %v3204_v1 }
 0x7d4   : > { %3096 = vmatpush3.bf16.msra.mxu0 %v3154_v19 }
 0x7d5   : > { %3097 = vmatprep.subr.bf16.mxu0 %v3204_v1 }
 0x7d8   : > { %3098 = vmatpush3.bf16.msra.mxu0 %v3155_v20 }
 0x7d9   : > { %3099 = vmatprep.subr.bf16.mxu0 %v3204_v1 }
 0x7dc   : > { %3100 = vmatpush3.bf16.msra.mxu0 %v3156_v21 }
 0x7dd   : > { %3101 = vmatprep.subr.bf16.mxu0 %v3204_v1 }
 0x7e0   : > { %3102 = vmatpush3.bf16.msra.mxu0 %v3157_v22 }
 0x896   : > { %v2581_v49 = vpop.f32.mrb[12].mxu0 }
 0x897   : > { %v2582_v51 = vadd.f32 %v2957_v48, %v2581_v49  ;;  %v3077_v52 = vpop.f32.mrb[13].mxu0  ;;  %v2977_v49 = vld [vmem:[%s3646_s14] ss:$0 sm:$0xff] }
 0x898   : > { %v2584_v54 = vpop.f32.mrb[14].mxu0 }
 0x899   : > { %v3078_v12 = vpop.f32.mrb[15].mxu0  ;;  %v2588_v55 = vadd.f32 %v2587_v50, %v2582_v51 }
 0x89b   : > { %v2591_v56 = vsel %vm582_vm1, %v2588_v55, 0.0 }
 0x89c   : > { %2592 = vadd.xlane.f32.xlu1 %v2591_v56 }
 0x929   : > { %v2593_v57 = vpop.xlane.xlu1 %2592 }
 0x92a   : > { %v2595_v58 = vmul.f32 0.03125, %v2593_v57 }
 0x92c   : > { %v2596_v59 = vsub.f32 %v2588_v55, %v2595_v58 }
 0x92e   : > { %v2597_v60 = vmul.f32 %v2596_v59, %v2596_v59 }
 0x930   : > { %v2598_v61 = vsel %vm582_vm1, %v2597_v60, 0.0 }
 0x931   : > { %2599 = vadd.xlane.f32.xlu0 %v2598_v61 }
 0x9be   : > { %v2600_v5 = vpop.xlane.xlu0 %2599 }
 0x9bf   : > { %v2601_v6 = vmul.f32 0.03125, %v2600_v5 }
 0x9c1   : > { %v2602_v7 = vadd.f32 1e-12, %v2601_v6 }
 0x9c3   : > { %3174 = vrsqrt.f32 %v2602_v7 }
 0x9cd   : > { %v3175_v8 = vpop.eup %3174 }
 0x9ce   : > { %v2604_v10 = vmul.f32 %v3175_v8, %v2596_v59 }
 0x9d0   : > { %v2611_v14 = vmul.f32 %v2961_v9, %v2604_v10 }
 0x9d2   : > { %v2618_v15 = vadd.f32 %v2962_v13, %v2611_v14 }
 0x9d4   : > { %v2619_v16 = vpack.c.bf16 %v2618_v15, %v2618_v15 }
 0x9d6   : > { %3084 = vmatmul.mubr.msk.bf16.vlgmr.msra.gmra.mrb[24].mxu1 %vm582_vm1, %v2619_v16 }
 0xaa9   : > { %v2680_v25 = vpop.f32.mrb[24].mxu1 }
 0xaaa   : > { %v2681_v27 = vadd.f32 %v2963_v24, %v2680_v25  ;;  %v3085_v28 = vpop.f32.mrb[25].mxu1 }
 0xaab   : > { %v2683_v29 = vpop.f32.mrb[26].mxu1 }
 0xaac   : > { %v2687_v30 = vmul.f32 0.70710677, %v2681_v27  ;;  %v3086_v31 = vpop.f32.mrb[27].mxu1  ;;  %v2686_v33 = vmul.f32 0.5, %v2681_v27 }
 0xaae   : > { %3176 = verf.f32 %v2687_v30 }
 0xab8   : > { %v3177_v32 = vpop.eup %3176 }
 0xab9   : > { %v2689_v34 = vadd.f32 1.0, %v3177_v32 }
 0xabb   : > { %v2690_v1 = vmul.f32 %v2689_v34, %v2686_v33 }
 0xabd   : > { %v2691_v35 = vpack.c.bf16 %v2690_v1, %v2690_v1 }
 0xabf   : > { %3104 = vmatmul.mubr.bf16.vlgmr.msra.gmra.mrb[16].mxu0 %v2691_v35 }
 0xb92   : > { %v2797_v37 = vpop.f32.mrb[16].mxu0 }
 0xb93   : > { %v2798_v39 = vadd.f32 %v2967_v36, %v2797_v37  ;;  %v3105_v53 = vpop.f32.mrb[17].mxu0 }
 0xb94   : > { %v2800_v40 = vpop.f32.mrb[18].mxu0 }
 0xb95   : > { %v3106_v41 = vpop.f32.mrb[19].mxu0  ;;  %v2803_v42 = vadd.f32 %v2798_v39, %v2618_v15 }
 0xb97   : > { %v2806_v43 = vsel %vm582_vm1, %v2803_v42, 0.0 }
 0xb98   : > { %2807 = vadd.xlane.f32.xlu1 %v2806_v43 }
 0xc25   : > { %v2808_v11 = vpop.xlane.xlu1 %2807 }
 0xc26   : > { %v2809_v23 = vmul.f32 0.03125, %v2808_v11 }
 0xc28   : > { %v2810_v26 = vsub.f32 %v2803_v42, %v2809_v23 }
 0xc2a   : > { %v2811_v44 = vmul.f32 %v2810_v26, %v2810_v26 }
 0xc2c   : > { %v2812_v3 = vsel %vm582_vm1, %v2811_v44, 0.0 }
 0xc2d   : > { %2813 = vadd.xlane.f32.xlu0 %v2812_v3 }
 0xcba   : > { %v2814_v45 = vpop.xlane.xlu0 %2813 }
 0xcbb   : > { %v2815_v47 = vmul.f32 0.03125, %v2814_v45 }
 0xcbd   : > { %v2816_v46 = vadd.f32 1e-12, %v2815_v47 }
 0xcbf   : > { %3178 = vrsqrt.f32 %v2816_v46 }
 0xcc9   : > { %v3179_v38 = vpop.eup %3178 }
 0xcca   : > { %v2818_v48 = vmul.f32 %v3179_v38, %v2810_v26 }
 0xccc   : > { %v2825_v50 = vmul.f32 %v2976_v18, %v2818_v48 }
 0xcce   : > { %v2832_v51 = vadd.f32 %v2977_v49, %v2825_v50 }
 0xcd0   : > { %2833 = vst.msk [vmem:[%s551_s16] sm:$0xff] %vm582_vm1, %v2832_v51 }
 0xcd1 PF: > { %s25_s20 = sadd.s32 1, %s3202_s20   ;;  %s3648_s18 = smov %s3198_s19 }
 0xcd2   : > { %p22_p5 = scmp.ge.s32.totalorder %s25_s20, 4   ;;  %s3649_s19 = smov %s3651_s21 }
 0xcd4   :  { %24 = sbr.rel (!%p22_p5) target bundleno = 2 (0x2), region = 125 }

// kernel: bert_forward.5
= control target key start
LH: loop header
LB: loop body
LE: loop exit
PB: predicated region body
PF: predicated region fallthrough
CT: control target
= control target key end

     0   :  { %s3806_s0 = inlined_call_operand.vmem [shape: f32[2,8,32], index: 0, kind: input, shape index: {}, may-alias: {0,1}]   ;;  %s3807_s1 = inlined_call_operand.vmem [shape: f32[2,8,32], index: 1, kind: input, shape index: {}, may-alias: {0,1}]   ;;  %s3808_s2 = inlined_call_operand.vmem [shape: f32[2,1,8], index: 2, kind: input, shape index: {}]   ;;  %s3809_s3 = inlined_call_operand.vmem [shape: bf16[32,96], index: 3, kind: input, shape index: {}]   ;;  %s3810_s4 = inlined_call_operand.vmem [shape: f32[1,96], index: 4, kind: input, shape index: {}]   ;;  %s3811_s5 = inlined_call_operand.vmem [shape: bf16[32,32], index: 5, kind: input, shape index: {}]   ;;  %s3812_s6 = inlined_call_operand.vmem [shape: f32[1,32], index: 6, kind: input, shape index: {}]   ;;  %s3813_s7 = inlined_call_operand.vmem [shape: f32[1,32], index: 7, kind: input, shape index: {}]   ;;  %s3814_s8 = inlined_call_operand.vmem [shape: f32[1,32], index: 8, kind: input, shape index: {}]   ;;  %s3815_s9 = inlined_call_operand.vmem [shape: bf16[32,128], index: 9, kind: input, shape index: {}]   ;;  %s3816_s10 = inlined_call_operand.vmem [shape: f32[1,128], index: 10, kind: input, shape index: {}]   ;;  %s3817_s11 = inlined_call_operand.vmem [shape: bf16[128,32], index: 11, kind: input, shape index: {}]   ;;  %s3818_s12 = inlined_call_operand.vmem [shape: f32[1,32], index: 12, kind: input, shape index: {}]   ;;  %s3819_s13 = inlined_call_operand.vmem [shape: f32[1,32], index: 13, kind: input, shape index: {}]   ;;  %s3820_s14 = inlined_call_operand.vmem [shape: f32[1,32], index: 14, kind: input, shape index: {}]   ;;  %s3821_s15 = inlined_call_operand.hbm [shape: f32[2,8,32], index: 15, kind: output, shape index: {}]  }
   0x1   :  { %3824 = sst [smem:[#allocation7_spill]] %s3806_s0 }
   0x2   :  { %3825 = sst [smem:[#allocation8_spill]] %s3807_s1 }
   0x3   :  { %3826 = sst [smem:[#allocation9_spill]] %s3808_s2 }
   0x4   :  { %3827 = sst [smem:[#allocation10_spill]] %s3809_s3 }
   0x5   :  { %3828 = sst [smem:[#allocation11_spill]] %s3810_s4 }
   0x6   :  { %3829 = sst [smem:[#allocation12_spill]] %s3811_s5 }
   0x7   :  { %20 = vsyncpa [#allocation4], 0 }
   0x8   :  { %22 = vsyncpa [#allocation4 + $0x1], 0  ;;  %s3393_s18 = smov 0   ;;  %s3395_s19 = smov 0  }
   0x9   :  { %s3397_s20 = smov 0   ;;  %s3399_s21 = smov 0  }
   0xa   :  { %s3401_s22 = smov 0   ;;  %s3403_s23 = smov 0  }
   0xb LB: > { %s2937_s24 = sadd.s32 4294967295, %s3297_s23   ;;  %s2938_s25 = sadd.s32 4294967294, %s3297_s23   ;;  %s3297_s23 = sphi %s3403_s23, %s28_s23   ;;  %s3293_s22 = sphi %s3401_s22, %s3845_s22   ;;  %s3289_s21 = sphi %s3399_s21, %s3844_s21   ;;  %s3285_s20 = sphi %s3397_s20, %s3843_s20   ;;  %s3281_s19 = sphi %s3395_s19, %s3842_s19   ;;  %s3277_s18 = sphi %s3393_s18, %s3841_s18  }
   0xc   : > { %s40_s26 = sadd.s32 1, %s3293_s22  ;;  %s381_s27 = sadd.s32 1, %s3285_s20 }
   0xd   : > { %p42_p0 = scmp.ge.s32.totalorder %s40_s26, 2  ;;  %p391_p1 = scmp.ne.s32.totalorder %s3285_s20, %s3281_s19 }
   0xe   : > { %p392_p2 = scmp.eq.s32.totalorder %s2937_s24, 1  ;;  %p397_p3 = scmp.ne.s32.totalorder %s3281_s19, %s3277_s18 }
   0xf   : > { %s3847_s26 = smov (%p42_p0, %s40_s26), 0  ;;  %p398_p5 = scmp.eq.s32.totalorder %s2938_s25, 1 }
  0x10   : > { %3830 = sst [smem:[#allocation6_spill]] %s3847_s26  ;;  %p3433_p4 = por %p392_p2, %p391_p1 }
  0x11   : > { %s376_s29 = ssub.s32 %s3293_s22, %s3847_s26  ;;  %p2941_p6 = scmp.ge.s32.totalorder %s3297_s23, 1 }
  0x12   : > { %p379_p7 = scmp.eq.s32.totalorder %s376_s29, 0  ;;  %p3440_p8 = por %p398_p5, %p397_p3 }
  0x13   : > { %p475_p9 = scmp.lt.s32.totalorder %s3297_s23, 3 }
  0x14   : > { %s3446_s16 = scalar_select %p379_p7, %s3285_s20, %s381_s27  }
  0x15   : > { %p476_p10 = pnand %p2941_p6, %p475_p9 }
  0x16   : > { %s3833_s3 = sld [smem:[#allocation10_spill]] (!%p476_p10)  ;;  %v3299_v1 = vmov (!%p476_p10), 0.0   ;;  %vm3300_vm0 = vmmov (!%p476_p10), 0   ;;  %p532_p11 = scmp.lt.s32.totalorder (!%p476_p10), %s3289_s21, 1  ;;  %vm576_vm1 = vcmask (!%p476_p10), 261120   ;;  %vm622_vm2 = vcmask (!%p476_p10), 257024  }
  0x17   : > { %479 = sbr.rel (%p476_p10) target bundleno = 3311 (0xcef), region = 80  ;;  %3023 = vmatprep.subr.bf16.mxu1 (!%p476_p10), %v3299_v1  ;;  %3043 = vmatprep.subr.bf16.mxu0 (!%p476_p10), %v3299_v1  ;;  %s3834_s0 = sld [smem:[#allocation7_spill]] (!%p476_p10)  ;;  %v3305_v16 = vmov (!%p476_p10), 1983009808   ;;  %v671_v18 = vlaneseq (!%p476_p10)  ;;  %v3306_v21 = vmov (!%p476_p10), 1934713408  }
  0x18   : > { %3027 = vmatprep.mubr.msk.bf16.mxu1 (!%p476_p10), %vm3300_vm0, %v3299_v1  ;;  %3045 = vmatprep.mubr.msk.bf16.mxu0 (!%p476_p10), %vm3300_vm0, %v3299_v1  ;;  %s3835_s4 = sld [smem:[#allocation11_spill]] (!%p476_p10)  ;;  %s3301_s24 = smov (!%p476_p10), 96   ;;  %v669_v17 = vunpack.c.l.s4 (!%p476_p10), %v3305_v16  ;;  %v686_v22 = vunpack.c.l.s4 (!%p476_p10), %v3306_v21  ;;  %v3307_v46 = vmov (!%p476_p10), 0   ;;  %vm1400_vm3 = vcmask (!%p476_p10), 1043456  }
  0x19   : > { %s3303_s26 = smov (!%p476_p10), 120   ;;  %s3304_s25 = smov (!%p476_p10), 104   ;;  %v672_v20 = vshrl.u32 (!%p476_p10), %v671_v18, 7  ;;  %vm1396_vm4 = vcmask (!%p476_p10), 64512   ;;  %vm2509_vm5 = vcmask (!%p476_p10), 130048   ;;  %vm2511_vm6 = vcmask (!%p476_p10), 195584  }
  0x1a   : > { %v670_v19 = vunpack.c.0.s8 (!%p476_p10), %v669_v17  ;;  %v687_v29 = vunpack.c.0.s8 (!%p476_p10), %v686_v22  ;;  %s3836_s2 = sld [smem:[#allocation9_spill]] (!%p476_p10)  ;;  %s3837_s5 = sld [smem:[#allocation12_spill]] (!%p476_p10) }
  0x1b   : > { %s3839_s1 = sld [smem:[#allocation8_spill]] (!%p476_p10) }
  0x1c   : > { %v3183_v0 = vld [vmem:[%s3833_s3] sm:$0xff] (!%p476_p10)   ;;  %v3184_v2 = vld [vmem:[%s3833_s3 + $0x8] sm:$0xff] (!%p476_p10)   ;;  %s3302_s3 = smov (!%p476_p10), 112   ;;  %v3486_v26 = vsub.s32 (!%p476_p10), %v670_v19, %v672_v20  ;;  %v3490_v38 = vsub.s32 (!%p476_p10), %v687_v29, %v672_v20 }
  0x1d   : > { %3024 = vmatpush3.bf16.msra.mxu1 (!%p476_p10), %v3183_v0 }
  0x1e   : > { %3025 = vmatprep.subr.bf16.mxu1 %v3299_v1  ;;  %s3463_s27 = scalar_select %p532_p11, %s3289_s21, 1  ;;  %v2945_v5 = vld [vmem:[%s3835_s4] ss:$0 sm:$0xff] }
  0x20   : > { %s3823_s17 = sshll.u32 %s3463_s27, 3 }
  0x21   : > { %3026 = vmatpush3.bf16.msra.mxu1 %v3184_v2  ;;  %s535_s29 = scalar_lea.vmem %s3834_s0, %s3823_s17  ;;  %s545_s17 = scalar_lea.vmem %s3836_s2, %s3463_s27 }
  0x22   : > { %3031 = vmatprep.subr.bf16.mxu1 %v3299_v1  ;;  %v551_v3 = vld [vmem:[%s535_s29] sm:$0xff]  ;;  %s3308_s29 = smov 64  }
  0x23   : > { %v552_v4 = vpack.c.bf16 %v551_v3, %v551_v3 }
  0x25   : > { %3028 = vmatmul.mubr.msk.bf16.vlgmr.msra.gmra.mrb[0].mxu1 %vm576_vm1, %v552_v4 }
  0x26   : > { %3033 = vmatprep.mubr.msk.bf16.mxu1 %vm3300_vm0, %v3299_v1 }
  0xf8   : > { %v614_v6 = vpop.f32.mrb[0].mxu1 }
  0xf9   : > { %v615_v7 = vadd.f32 %v2945_v5, %v614_v6  ;;  %v3029_v8 = vpop.f32.mrb[1].mxu1 }
  0xfa   : > { %v617_v9 = vpop.f32.mrb[2].mxu1 }
  0xfb   : > { %v620_v10 = vmul.f32 0.35355338, %v615_v7  ;;  %v3030_v11 = vpop.f32.mrb[3].mxu1  ;;  %v3478_v12 = vpack.c.bf16 %v615_v7, %v615_v7 }
  0xfd   : > { %v621_v13 = vpack.c.bf16 %v620_v10, %v620_v10  ;;  %628 = vrot.lane.b32.xlu0 %v3478_v12, %s3301_s24  ;;  %s3309_s24 = smov 16  }
  0xff   : > { %623 = vst.msk [vmem:[#allocation2] sm:$0xf] %vm622_vm2, %v621_v13 }
 0x106   : > { %v3501_v53 = vld [vmem:[#allocation2] sm:$0xf] }
 0x16f   : > { %v629_v14 = vpop.permute.xlu0 %628 }
 0x170   : > { %632 = vst.msk [vmem:[#allocation2 + $0x4] sm:$0xf] %vm622_vm2, %v629_v14 }
 0x177   : > { %v645_v15 = vld [vmem:[#allocation2 + $0x4] sm:$0xf] }
 0x178   : > { %738 = vrot.lane.b32.xlu1 %v645_v15, %s3302_s3  ;;  %736 = vrot.lane.b32.xlu0 %v645_v15, %s3303_s26  ;;  %v745_v28 = vshrl.u32 %v645_v15, 16 }
 0x17c   : > { %740 = vrot.lane.b32.xlu1 %v645_v15, %s3304_s25 }
 0x1ea   : > { %v739_v23 = vpop.permute.xlu1 %738  ;;  %v737_v24 = vpop.permute.xlu0 %736 }
 0x1eb   : > { %v746_v25 = vshrl.u32 %v737_v24, 16  ;;  %v744_v27 = vpack.i.b16 %v737_v24, %v645_v15  ;;  %v751_v31 = vshrl.u32 %v739_v23, 16 }
 0x1ed   : > { %v747_v32 = vpack.i.b16 %v746_v25, %v745_v28  ;;  %v761_v35 = vrot.slane %v744_v27, %v3486_v26 }
 0x1ee   : > { %v741_v30 = vpop.permute.xlu1 %740 }
 0x1ef   : > { %v750_v33 = vpack.i.b16 %v741_v30, %v739_v23  ;;  %v752_v34 = vshrl.u32 %v741_v30, 16  ;;  %v795_v41 = vrot.slane %v747_v32, %v3486_v26 }
 0x1f1   : > { %v753_v36 = vpack.i.b16 %v752_v34, %v751_v31  ;;  %v769_v37 = vrot.slane %v750_v33, %v3486_v26 }
 0x1f3   : > { %v771_v39 = vcombine.high %v761_v35, %v769_v37  ;;  %v770_v40 = vcombine.low %v761_v35, %v769_v37  ;;  %v803_v42 = vrot.slane %v753_v36, %v3486_v26 }
 0x1f5   : > { %v785_v43 = vrot.slane %v771_v39, %v3490_v38  ;;  %v778_v44 = vrot.slane %v770_v40, %v3490_v38  ;;  %v804_v45 = vcombine.low %v795_v41, %v803_v42  ;;  %v805_v49 = vcombine.high %v795_v41, %v803_v42 }
 0x1f7   : > { %1042 = vxpose.xlu1.c.b16.start.end [1/1] (short) (narrow) %v785_v43, 16  ;;  %978 = vxpose.xlu0.c.b16.start.end [1/1] (short) (narrow) %v778_v44, 16  ;;  %v786_v47 = vcombine.high %v778_v44, %v3307_v46  ;;  %v812_v48 = vrot.slane %v804_v45, %v3490_v38  ;;  %v819_v50 = vrot.slane %v805_v49, %v3490_v38  ;;  %v658_v45 = vshrl.u32 %v3501_v53, 16 }
 0x1f8   : > { %v787_v51 = vcombine.high %v785_v43, %v3307_v46 }
 0x1f9   : > { %v820_v52 = vcombine.high %v812_v48, %v3307_v46  ;;  %v821_v54 = vcombine.high %v819_v50, %v3307_v46 }
 0x1fb   : > { %1010 = vxpose.xlu0.c.b16.start.end [1/1] (short) (narrow) %v786_v47, 16  ;;  %994 = vxpose.xlu1.c.b16.start.end [1/1] (short) (narrow) %v812_v48, 16 }
 0x1ff   : > { %1058 = vxpose.xlu0.c.b16.start.end [1/1] (short) (narrow) %v819_v50, 16  ;;  %1074 = vxpose.xlu1.c.b16.start.end [1/1] (short) (narrow) %v787_v51, 16 }
 0x203   : > { %1026 = vxpose.xlu0.c.b16.start.end [1/1] (short) (narrow) %v820_v52, 16  ;;  %649 = vrot.lane.b32.xlu1 %v3501_v53, %s3303_s26 }
 0x207   : > { %1090 = vxpose.xlu0.c.b16.start.end [1/1] (short) (narrow) %v821_v54, 16  ;;  %653 = vrot.lane.b32.xlu1 %v3501_v53, %s3304_s25 }
 0x210   : > { %651 = vrot.lane.b32.xlu0 %v3501_v53, %s3302_s3 }
 0x25d   : > { %v1050_v55 = vpop.trf.xlu1  ;;  %v986_v56 = vpop.trf.xlu0 }
 0x25e   : > { %v1106_v63 = vcombine.low %v986_v56, %v1050_v55 }
 0x260   : > { %v1113_v4 = vrot.slane %v1106_v63, %v3486_v26 }
 0x261   : > { %v1018_v57 = vpop.trf.xlu0  ;;  %v1002_v58 = vpop.trf.xlu1 }
 0x265   : > { %v1066_v59 = vpop.trf.xlu0  ;;  %v1082_v60 = vpop.trf.xlu1 }
 0x266   : > { %v1114_v61 = vcombine.low %v1018_v57, %v1082_v60  ;;  %v1140_v0 = vcombine.low %v1002_v58, %v1066_v59 }
 0x268   : > { %v1121_v2 = vrot.slane %v1114_v61, %v3486_v26  ;;  %v1147_v6 = vrot.slane %v1140_v0, %v3486_v26 }
 0x269   : > { %v1034_v62 = vpop.trf.xlu0 }
 0x26a   : > { %v1122_v7 = vcombine.low %v1113_v4, %v1121_v2  ;;  %v1123_v8 = vcombine.high %v1113_v4, %v1121_v2 }
 0x26c   : > { %v1130_v13 = vrot.slane %v1122_v7, %v3490_v38  ;;  %v1137_v14 = vrot.slane %v1123_v8, %v3490_v38 }
 0x26d   : > { %v1098_v3 = vpop.trf.xlu0 }
 0x26e   : > { %v1148_v5 = vcombine.low %v1034_v62, %v1098_v3  ;;  %v1178_v22 = vshrl.u32 %v1130_v13, 16  ;;  %v1194_v23 = vshrl.u32 %v1137_v14, 16  ;;  %v1138_v24 = vcombine.high %v1130_v13, %v3307_v46 }
 0x26f   : > { %v1139_v31 = vcombine.high %v1137_v14, %v3307_v46 }
 0x270   : > { %v1155_v9 = vrot.slane %v1148_v5, %v3486_v26  ;;  %v1186_v30 = vshrl.u32 %v1138_v24, 16 }
 0x271   : > { %v1202_v35 = vshrl.u32 %v1139_v31, 16 }
 0x272   : > { %v1156_v10 = vcombine.low %v1147_v6, %v1155_v9  ;;  %v1157_v11 = vcombine.high %v1147_v6, %v1155_v9 }
 0x274   : > { %v1164_v15 = vrot.slane %v1156_v10, %v3490_v38  ;;  %v1171_v16 = vrot.slane %v1157_v11, %v3490_v38 }
 0x275   : > { %v650_v39 = vpop.permute.xlu1 %649 }
 0x276   : > { %v1192_v17 = vpack.i.b16 %v1171_v16, %v1137_v14  ;;  %v1176_v18 = vpack.i.b16 %v1164_v15, %v1130_v13  ;;  %v1179_v19 = vshrl.u32 %v1164_v15, 16  ;;  %v1195_v20 = vshrl.u32 %v1171_v16, 16 }
 0x277   : > { %v1172_v21 = vcombine.high %v1164_v15, %v3307_v46  ;;  %v1173_v29 = vcombine.high %v1171_v16, %v3307_v46  ;;  %v659_v43 = vshrl.u32 %v650_v39, 16  ;;  %v657_v50 = vpack.i.b16 %v650_v39, %v3501_v53 }
 0x278   : > { %1270 = vxpose.xlu0.c.b16.start.end [1/1] (short) (narrow) %v1192_v17, 16  ;;  %1206 = vxpose.xlu1.c.b16.start.end [1/1] (short) (narrow) %v1176_v18, 16  ;;  %v1180_v25 = vpack.i.b16 %v1179_v19, %v1178_v22  ;;  %v1196_v27 = vpack.i.b16 %v1195_v20, %v1194_v23 }
 0x279   : > { %v1187_v28 = vshrl.u32 %v1172_v21, 16  ;;  %v1184_v32 = vpack.i.b16 %v1172_v21, %v1138_v24  ;;  %v1203_v34 = vshrl.u32 %v1173_v29, 16  ;;  %v1200_v36 = vpack.i.b16 %v1173_v29, %v1139_v31  ;;  %v654_v41 = vpop.permute.xlu1 %653 }
 0x27a   : > { %v665_v44 = vshrl.u32 %v654_v41, 16  ;;  %v660_v48 = vpack.i.b16 %v659_v43, %v658_v45 }
 0x27b   : > { %v1188_v33 = vpack.i.b16 %v1187_v28, %v1186_v30  ;;  %v1204_v37 = vpack.i.b16 %v1203_v34, %v1202_v35 }
 0x27c   : > { %1222 = vxpose.xlu0.c.b16.start.end [1/1] (short) (narrow) %v1180_v25, 16  ;;  %1286 = vxpose.xlu1.c.b16.start.end [1/1] (short) (narrow) %v1196_v27, 16  ;;  %v708_v52 = vrot.slane %v660_v48, %v3486_v26 }
 0x280   : > { %1238 = vxpose.xlu0.c.b16.start.end [1/1] (short) (narrow) %v1184_v32, 16  ;;  %1254 = vxpose.xlu1.c.b16.start.end [1/1] (short) (narrow) %v1188_v33, 16 }
 0x282   : > { %v652_v40 = vpop.permute.xlu0 %651 }
 0x283   : > { %v664_v42 = vshrl.u32 %v652_v40, 16  ;;  %v663_v49 = vpack.i.b16 %v654_v41, %v652_v40 }
 0x284   : > { %1302 = vxpose.xlu0.c.b16.start.end [1/1] (short) (narrow) %v1200_v36, 16  ;;  %1318 = vxpose.xlu1.c.b16.start.end [1/1] (short) (narrow) %v1204_v37, 16 }
 0x285   : > { %v666_v47 = vpack.i.b16 %v665_v44, %v664_v42  ;;  %v682_v54 = vrot.slane %v663_v49, %v3486_v26 }
 0x287   : > { %v716_v51 = vrot.slane %v666_v47, %v3486_v26 }
 0x289   : > { %v717_v55 = vcombine.low %v708_v52, %v716_v51  ;;  %v718_v56 = vcombine.high %v708_v52, %v716_v51 }
 0x28b   : > { %v725_v61 = vrot.slane %v717_v55, %v3490_v38  ;;  %v732_v62 = vrot.slane %v718_v56, %v3490_v38 }
 0x28d   : > { %633 = vrot.lane.b32.xlu0 %v3478_v12, %s3308_s29  ;;  %v674_v12 = vrot.slane %v657_v50, %v3486_v26  ;;  %v941_v3 = vcombine.low %v725_v61, %v732_v62  ;;  %v2952_v4 = vcombine.high %v725_v61, %v732_v62  ;;  %v2950_v61 = vld [vmem:[%s545_s17] ss:$0 sm:$0xff]  ;;  %s3310_s29 = smov 8   ;;  %s3311_s17 = smov 24  }
 0x28f   : > { %v683_v57 = vcombine.low %v674_v12, %v682_v54  ;;  %v684_v58 = vcombine.high %v674_v12, %v682_v54  ;;  %v948_v9 = vrot.slane %v941_v3, %v3486_v26  ;;  %v956_v10 = vrot.slane %v2952_v4, %v3486_v26 }
 0x291   : > { %v691_v53 = vrot.slane %v683_v57, %v3490_v38  ;;  %v698_v63 = vrot.slane %v684_v58, %v3490_v38  ;;  %v957_v20 = vcombine.low %v948_v9, %v956_v10 }
 0x293   : > { %v916_v5 = vcombine.low %v691_v53, %v698_v63  ;;  %v2951_v6 = vcombine.high %v691_v53, %v698_v63  ;;  %v964_v31 = vrot.slane %v957_v20, %v3490_v38 }
 0x295   : > { %v923_v14 = vrot.slane %v916_v5, %v3486_v26  ;;  %v931_v15 = vrot.slane %v2951_v6, %v3486_v26  ;;  %v965_v41 = vcombine.high %v964_v31, %v3307_v46  ;;  %v970_v51 = vshrl.u32 %v964_v31, 16 }
 0x297   : > { %v932_v25 = vcombine.low %v923_v14, %v931_v15  ;;  %v976_v57 = vshrl.u32 %v965_v41, 16 }
 0x299   : > { %v939_v32 = vrot.slane %v932_v25, %v3490_v38 }
 0x29b   : > { %v968_v44 = vpack.i.b16 %v964_v31, %v939_v32  ;;  %v940_v45 = vcombine.high %v939_v32, %v3307_v46  ;;  %v969_v52 = vshrl.u32 %v939_v32, 16 }
 0x29d   : > { %v974_v50 = vpack.i.b16 %v965_v41, %v940_v45  ;;  %v971_v55 = vpack.i.b16 %v970_v51, %v969_v52  ;;  %v975_v58 = vshrl.u32 %v940_v45, 16 }
 0x2de   : > { %v1278_v59 = vpop.trf.xlu0  ;;  %v1214_v60 = vpop.trf.xlu1 }
 0x2df   : > { %v1334_v11 = vcombine.low %v1214_v60, %v1278_v59  ;;  %v977_v60 = vpack.i.b16 %v976_v57, %v975_v58 }
 0x2e1   : > { %v1341_v21 = vrot.slane %v1334_v11, %v3486_v26 }
 0x2e2   : > { %v1230_v0 = vpop.trf.xlu0  ;;  %v1294_v2 = vpop.trf.xlu1 }
 0x2e3   : > { %v1359_v13 = vcombine.low %v1230_v0, %v1294_v2 }
 0x2e5   : > { %v1366_v22 = vrot.slane %v1359_v13, %v3486_v26 }
 0x2e6   : > { %v1246_v7 = vpop.trf.xlu0  ;;  %v1262_v8 = vpop.trf.xlu1 }
 0x2ea   : > { %v1310_v16 = vpop.trf.xlu0  ;;  %v1326_v17 = vpop.trf.xlu1 }
 0x2eb   : > { %v1342_v18 = vcombine.low %v1246_v7, %v1310_v16  ;;  %v1367_v19 = vcombine.low %v1262_v8, %v1326_v17 }
 0x2ed   : > { %v1349_v23 = vrot.slane %v1342_v18, %v3486_v26  ;;  %v1374_v24 = vrot.slane %v1367_v19, %v3486_v26 }
 0x2ef   : > { %v1350_v27 = vcombine.low %v1341_v21, %v1349_v23  ;;  %v1375_v28 = vcombine.low %v1366_v22, %v1374_v24 }
 0x2f1   : > { %v1357_v29 = vrot.slane %v1350_v27, %v3490_v38  ;;  %v1382_v30 = vrot.slane %v1375_v28, %v3490_v38 }
 0x2f3   : > { %v1386_v33 = vpack.i.b16 %v1382_v30, %v1357_v29  ;;  %v1358_v34 = vcombine.high %v1357_v29, %v3307_v46  ;;  %v1383_v35 = vcombine.high %v1382_v30, %v3307_v46  ;;  %v1387_v36 = vshrl.u32 %v1357_v29, 16 }
 0x2f4   : > { %v1388_v37 = vshrl.u32 %v1382_v30, 16 }
 0x2f5   : > { %v1402_v39 = vsel %vm1400_vm3, %v1386_v33, 0  ;;  %v1392_v40 = vpack.i.b16 %v1383_v35, %v1358_v34  ;;  %v1393_v47 = vshrl.u32 %v1358_v34, 16  ;;  %v1394_v48 = vshrl.u32 %v1383_v35, 16 }
 0x2f6   : > { %3032 = vmatpush3.bf16.msra.mxu1 %v1402_v39  ;;  %v1389_v42 = vpack.i.b16 %v1388_v37, %v1387_v36 }
 0x2f7   : > { %v1494_v43 = vsel %vm1400_vm3, %v1392_v40, 0  ;;  %3037 = vmatprep.subr.bf16.mxu1 %v3299_v1  ;;  %v1395_v54 = vpack.i.b16 %v1394_v48, %v1393_v47 }
 0x2f8   : > { %3044 = vmatpush3.bf16.msra.mxu0 %v1494_v43  ;;  %v1448_v49 = vsel %vm1400_vm3, %v1389_v42, 0 }
 0x2f9   : > { %3034 = vmatmul.mubr.msk.bf16.vlgmr.msra.gmra.mrb[4].mxu1 %vm1396_vm4, %v968_v44  ;;  %3055 = vmatprep.subr.bf16.mxu0 %v3299_v1  ;;  %v1540_v56 = vsel %vm1400_vm3, %v1395_v54, 0 }
 0x2fa   : > { %3038 = vmatpush3.bf16.msra.mxu1 %v1448_v49  ;;  %3039 = vmatprep.mubr.msk.bf16.mxu1 %vm3300_vm0, %v3299_v1 }
 0x2fb   : > { %3046 = vmatmul.mubr.msk.bf16.vlgmr.msra.gmra.mrb[0].mxu0 %vm1396_vm4, %v974_v50  ;;  %3049 = vmatprep.subr.bf16.mxu1 %v3299_v1 }
 0x2fc   : > { %3057 = vmatprep.mubr.msk.bf16.mxu0 %vm3300_vm0, %v3299_v1 }
 0x2ff   : > { %v634_v12 = vpop.permute.xlu0 %633 }
 0x300   : > { %637 = vst.msk [vmem:[#allocation2 + $0x8] sm:$0xf] %vm622_vm2, %v634_v12 }
 0x301   : > { %3040 = vmatmul.mubr.msk.bf16.vlgmr.msra.gmra.mrb[8].mxu1 %vm1396_vm4, %v971_v55 }
 0x302   : > { %3050 = vmatpush3.bf16.msra.mxu1 %v1540_v56  ;;  %3051 = vmatprep.mubr.msk.bf16.mxu1 %vm3300_vm0, %v3299_v1 }
 0x303   : > { %3061 = vmatprep.subr.bf16.mxu1 %v3299_v1 }
 0x307   : > { %v647_v59 = vld [vmem:[#allocation2 + $0x8] sm:$0xf] }
 0x308   : > { %823 = vrot.lane.b32.xlu1 %v647_v59, %s3303_s26  ;;  %v832_v27 = vshrl.u32 %v647_v59, 16  ;;  %s2985_s26 = sshll.u32 %s3289_s21, 7  ;;  %s3312_s21 = smov [#allocation3]  }
 0x309   : > { %3052 = vmatmul.mubr.msk.bf16.vlgmr.msra.gmra.mrb[12].mxu1 %vm1396_vm4, %v977_v60 }
 0x30a   : > { %3063 = vmatprep.mubr.msk.bf16.mxu1 %vm3300_vm0, %v3299_v1 }
 0x30c   : > { %825 = vrot.lane.b32.xlu1 %v647_v59, %s3302_s3  ;;  %s3838_s3 = sshll.u32 %s3463_s27, 3 }
 0x37a   : > { %v824_v22 = vpop.permute.xlu1 %823 }
 0x37b   : > { %v833_v24 = vshrl.u32 %v824_v22, 16  ;;  %v831_v28 = vpack.i.b16 %v824_v22, %v647_v59 }
 0x37d   : > { %v834_v30 = vpack.i.b16 %v833_v24, %v832_v27  ;;  %v848_v34 = vrot.slane %v831_v28, %v3486_v26 }
 0x37e   : > { %v826_v25 = vpop.permute.xlu1 %825 }
 0x37f   : > { %v838_v31 = vshrl.u32 %v826_v25, 16  ;;  %v882_v37 = vrot.slane %v834_v30, %v3486_v26 }
 0x3cc   : > { %v1438_v62 = vpop.f32.mrb[4].mxu1 }
 0x3cd   : > { %v3576_v53 = vadd.f32 %v2950_v61, %v1438_v62  ;;  %v3035_v63 = vpop.f32.mrb[5].mxu1 }
 0x3ce   : > { %v1441_v0 = vpop.f32.mrb[6].mxu1  ;;  %v1530_v2 = vpop.f32.mrb[0].mxu0 }
 0x3cf   : > { %v3578_v3 = vadd.f32 %v2950_v61, %v1530_v2  ;;  %v3036_v4 = vpop.f32.mrb[7].mxu1  ;;  %v3047_v5 = vpop.f32.mrb[1].mxu0  ;;  %v1582_v6 = vsel %vm1396_vm4, %v3576_v53, -inf }
 0x3d0   : > { %v1533_v7 = vpop.f32.mrb[2].mxu0  ;;  %1583 = vmax.xlane.f32.xlu1 %v1582_v6 }
 0x3d1   : > { %v3048_v8 = vpop.f32.mrb[3].mxu0  ;;  %v1588_v9 = vsel %vm1396_vm4, %v3578_v3, -inf }
 0x3d4   : > { %1589 = vmax.xlane.f32.xlu1 %v1588_v9  ;;  %v1484_v10 = vpop.f32.mrb[8].mxu1 }
 0x3d5   : > { %v3584_v11 = vadd.f32 %v2950_v61, %v1484_v10  ;;  %v3041_v13 = vpop.f32.mrb[9].mxu1 }
 0x3d6   : > { %v1487_v14 = vpop.f32.mrb[10].mxu1 }
 0x3d7   : > { %v3042_v15 = vpop.f32.mrb[11].mxu1  ;;  %v1585_v16 = vsel %vm1396_vm4, %v3584_v11, -inf }
 0x3d8   : > { %1586 = vmax.xlane.f32.xlu0 %v1585_v16 }
 0x3dc   : > { %v1576_v17 = vpop.f32.mrb[12].mxu1 }
 0x3dd   : > { %v3588_v18 = vadd.f32 %v2950_v61, %v1576_v17  ;;  %v3053_v19 = vpop.f32.mrb[13].mxu1 }
 0x3de   : > { %v1579_v20 = vpop.f32.mrb[14].mxu1 }
 0x3df   : > { %v3054_v21 = vpop.f32.mrb[15].mxu1  ;;  %v1591_v51 = vsel %vm1396_vm4, %v3588_v18, -inf }
 0x3ee   : > { %827 = vrot.lane.b32.xlu0 %v647_v59, %s3304_s25  ;;  %s529_s25 = sand.u32 1, %s3281_s19  }
 0x45d   : > { %v1584_v12 = vpop.xlane.xlu1 %1583 }
 0x45e   : > { %v1594_v27 = vsub.f32 %v3576_v53, %v1584_v12 }
 0x461   : > { %v1590_v55 = vpop.xlane.xlu1 %1589 }
 0x465   : > { %v3591_v23 = vpop.xlane.xlu0 %1586 }
 0x469   : > { %v828_v29 = vpop.permute.xlu0 %827 }
 0x46a   : > { %v837_v32 = vpack.i.b16 %v828_v29, %v826_v25  ;;  %v839_v33 = vshrl.u32 %v828_v29, 16 }
 0x46c   : > { %v840_v35 = vpack.i.b16 %v839_v33, %v838_v31  ;;  %v856_v36 = vrot.slane %v837_v32, %v3486_v26  ;;  %v1595_v31 = vsub.f32 %v3584_v11, %v3591_v23 }
 0x46e   : > { %v857_v39 = vcombine.low %v848_v34, %v856_v36  ;;  %v890_v40 = vrot.slane %v840_v35, %v3486_v26  ;;  %v858_v41 = vcombine.high %v848_v34, %v856_v36  ;;  %v1598_v35 = vmul.f32 1.442695, %v1594_v27 }
 0x46f   : > { %v1596_v36 = vsub.f32 %v3578_v3, %v1590_v55  ;;  %v1600_v53 = vmul.f32 1.442695, %v1595_v31 }
 0x470   : > { %v865_v42 = vrot.slane %v857_v39, %v3490_v38  ;;  %v891_v43 = vcombine.low %v882_v37, %v890_v40  ;;  %v892_v44 = vcombine.high %v882_v37, %v890_v40  ;;  %v872_v47 = vrot.slane %v858_v41, %v3490_v38 }
 0x471   : > { %3197 = vpow2.f32 %v1598_v35 }
 0x472   : > { %1630 = vxpose.xlu1.c.b16.start.end [1/1] (short) (narrow) %v865_v42, 16  ;;  %v899_v45 = vrot.slane %v891_v43, %v3490_v38  ;;  %v873_v48 = vcombine.high %v865_v42, %v3307_v46  ;;  %v874_v49 = vcombine.high %v872_v47, %v3307_v46  ;;  %v906_v52 = vrot.slane %v892_v44, %v3490_v38 }
 0x473   : > { %v1602_v43 = vmul.f32 1.442695, %v1596_v36  ;;  %3199 = vpow2.f32 %v1600_v53 }
 0x474   : > { %1646 = vxpose.xlu0.c.b16.start.end [1/1] (short) (narrow) %v899_v45, 16  ;;  %v907_v50 = vcombine.high %v899_v45, %v3307_v46  ;;  %v908_v54 = vcombine.high %v906_v52, %v3307_v46 }
 0x475   : > { %3201 = vpow2.f32 %v1602_v43 }
 0x476   : > { %1662 = vxpose.xlu1.c.b16.start.end [1/1] (short) (narrow) %v873_v48, 16 }
 0x478   : > { %1726 = vxpose.xlu0.c.b16.start.end [1/1] (short) (narrow) %v874_v49, 16 }
 0x47a   : > { %1678 = vxpose.xlu1.c.b16.start.end [1/1] (short) (narrow) %v907_v50, 16 }
 0x47b   : > { %v3198_v44 = vpop.eup %3197 }
 0x47c   : > { %v1606_v45 = vsel %vm1396_vm4, %v3198_v44, 0.0 }
 0x47d   : > { %v3200_v3 = vpop.eup %3199 }
 0x487   : > { %1592 = vmax.xlane.f32.xlu1 %v1591_v51 }
 0x4b4   : > { %1694 = vxpose.xlu1.c.b16.start.end [1/1] (short) (narrow) %v872_v47, 16  ;;  %v3202_v47 = vpop.eup %3201 }
 0x4b5   : > { %v1612_v49 = vsel %vm1396_vm4, %v3202_v47, 0.0 }
 0x4b8   : > { %1710 = vxpose.xlu1.c.b16.start.end [1/1] (short) (narrow) %v906_v52, 16 }
 0x4bc   : > { %1742 = vxpose.xlu1.c.b16.start.end [1/1] (short) (narrow) %v908_v54, 16 }
 0x4d8   : > { %v1638_v56 = vpop.trf.xlu1 }
 0x4da   : > { %v1654_v59 = vpop.trf.xlu0 }
 0x4dc   : > { %v1670_v57 = vpop.trf.xlu1 }
 0x4de   : > { %v1734_v61 = vpop.trf.xlu0 }
 0x4df   : > { %v1766_v0 = vcombine.low %v1670_v57, %v1734_v61 }
 0x4e0   : > { %v1686_v58 = vpop.trf.xlu1 }
 0x4e1   : > { %v1773_v5 = vrot.slane %v1766_v0, %v3486_v26 }
 0x514   : > { %v1593_v60 = vpop.xlane.xlu1 %1592 }
 0x515   : > { %v1597_v40 = vsub.f32 %v3588_v18, %v1593_v60  ;;  %v1609_v18 = vsel %vm1396_vm4, %v3200_v3, 0.0 }
 0x517   : > { %v1604_v23 = vmul.f32 1.442695, %v1597_v40 }
 0x519   : > { %3203 = vpow2.f32 %v1604_v23 }
 0x51a   : > { %v1702_v62 = vpop.trf.xlu1 }
 0x51b   : > { %v1758_v63 = vcombine.low %v1638_v56, %v1702_v62 }
 0x51d   : > { %v1765_v2 = vrot.slane %v1758_v63, %v3486_v26 }
 0x51e   : > { %v1718_v4 = vpop.trf.xlu1 }
 0x51f   : > { %v1792_v6 = vcombine.low %v1654_v59, %v1718_v4  ;;  %v1774_v7 = vcombine.low %v1765_v2, %v1773_v5  ;;  %v1775_v19 = vcombine.high %v1765_v2, %v1773_v5 }
 0x521   : > { %v1799_v10 = vrot.slane %v1792_v6, %v3486_v26  ;;  %v1782_v14 = vrot.slane %v1774_v7, %v3490_v38  ;;  %v1789_v34 = vrot.slane %v1775_v19, %v3490_v38 }
 0x522   : > { %v1750_v8 = vpop.trf.xlu1 }
 0x523   : > { %v1800_v9 = vcombine.low %v1686_v58, %v1750_v8  ;;  %v1830_v20 = vshrl.u32 %v1782_v14, 16  ;;  %v1790_v24 = vcombine.high %v1782_v14, %v3307_v46  ;;  %v1846_v42 = vshrl.u32 %v1789_v34, 16  ;;  %v3204_v48 = vpop.eup %3203 }
 0x524   : > { %v1615_v50 = vsel %vm1396_vm4, %v3204_v48, 0.0  ;;  %v1791_v52 = vcombine.high %v1789_v34, %v3307_v46 }
 0x525   : > { %v1807_v13 = vrot.slane %v1800_v9, %v3486_v26  ;;  %v1838_v33 = vshrl.u32 %v1790_v24, 16 }
 0x526   : > { %v1854_v55 = vshrl.u32 %v1791_v52, 16 }
 0x527   : > { %v1808_v15 = vcombine.low %v1799_v10, %v1807_v13  ;;  %v1809_v16 = vcombine.high %v1799_v10, %v1807_v13 }
 0x529   : > { %v1816_v17 = vrot.slane %v1808_v15, %v3490_v38  ;;  %v1823_v30 = vrot.slane %v1809_v16, %v3490_v38 }
 0x52b   : > { %v1828_v21 = vpack.i.b16 %v1816_v17, %v1782_v14  ;;  %v1831_v22 = vshrl.u32 %v1816_v17, 16  ;;  %v1824_v25 = vcombine.high %v1816_v17, %v3307_v46  ;;  %v1847_v39 = vshrl.u32 %v1823_v30, 16 }
 0x52c   : > { %v1844_v41 = vpack.i.b16 %v1823_v30, %v1789_v34  ;;  %v1825_v51 = vcombine.high %v1823_v30, %v3307_v46 }
 0x52d   : > { %1858 = vxpose.xlu0.c.b16.start.end [1/1] (short) (narrow) %v1828_v21, 16  ;;  %v1832_v28 = vpack.i.b16 %v1831_v22, %v1830_v20  ;;  %v1839_v29 = vshrl.u32 %v1824_v25, 16  ;;  %v1836_v32 = vpack.i.b16 %v1824_v25, %v1790_v24  ;;  %v1848_v11 = vpack.i.b16 %v1847_v39, %v1846_v42 }
 0x52e   : > { %v1855_v54 = vshrl.u32 %v1825_v51, 16  ;;  %v1852_v12 = vpack.i.b16 %v1825_v51, %v1791_v52 }
 0x52f   : > { %1874 = vxpose.xlu1.c.b16.start.end [1/1] (short) (narrow) %v1832_v28, 16  ;;  %v1840_v37 = vpack.i.b16 %v1839_v29, %v1838_v33 }
 0x530   : > { %v1856_v56 = vpack.i.b16 %v1855_v54, %v1854_v55 }
 0x531   : > { %1890 = vxpose.xlu0.c.b16.start.end [1/1] (short) (narrow) %v1836_v32, 16 }
 0x533   : > { %1906 = vxpose.xlu1.c.b16.start.end [1/1] (short) (narrow) %v1840_v37, 16 }
 0x535   : > { %1922 = vxpose.xlu0.c.b16.start.end [1/1] (short) (narrow) %v1844_v41, 16 }
 0x537   : > { %1938 = vxpose.xlu1.c.b16.start.end [1/1] (short) (narrow) %v1848_v11, 16 }
 0x542   : > { %1607 = vadd.xlane.f32.xlu0 %v1606_v45 }
 0x544   : > { %1610 = vadd.xlane.f32.xlu1 %v1609_v18 }
 0x546   : > { %1613 = vadd.xlane.f32.xlu0 %v1612_v49 }
 0x548   : > { %1616 = vadd.xlane.f32.xlu1 %v1615_v50 }
 0x573   : > { %1954 = vxpose.xlu0.c.b16.start.end [1/1] (short) (narrow) %v1852_v12, 16 }
 0x575   : > { %1970 = vxpose.xlu1.c.b16.start.end [1/1] (short) (narrow) %v1856_v56, 16 }
 0x593   : > { %v1866_v57 = vpop.trf.xlu0 }
 0x595   : > { %v1882_v58 = vpop.trf.xlu1 }
 0x597   : > { %v1898_v59 = vpop.trf.xlu0 }
 0x599   : > { %v1914_v60 = vpop.trf.xlu1 }
 0x59b   : > { %v1930_v61 = vpop.trf.xlu0 }
 0x59c   : > { %v1986_v5 = vcombine.low %v1866_v57, %v1930_v61 }
 0x59d   : > { %v1946_v62 = vpop.trf.xlu1 }
 0x59e   : > { %v2011_v8 = vcombine.low %v1882_v58, %v1946_v62  ;;  %v1993_v15 = vrot.slane %v1986_v5, %v3486_v26 }
 0x5a0   : > { %v2018_v22 = vrot.slane %v2011_v8, %v3486_v26 }
 0x5cf   : > { %v1608_v63 = vpop.xlane.xlu0 %1607 }
 0x5d0   : > { %3205 = vrcp.f32 %v1608_v63 }
 0x5d1   : > { %v1611_v0 = vpop.xlane.xlu1 %1610 }
 0x5d2   : > { %3207 = vrcp.f32 %v1611_v0 }
 0x5d3   : > { %v1614_v2 = vpop.xlane.xlu0 %1613 }
 0x5d4   : > { %3209 = vrcp.f32 %v1614_v2 }
 0x5d5   : > { %v1617_v4 = vpop.xlane.xlu1 %1616 }
 0x5d6   : > { %3211 = vrcp.f32 %v1617_v4 }
 0x5d9   : > { %v1962_v6 = vpop.trf.xlu0 }
 0x5da   : > { %v3206_v7 = vpop.eup %3205  ;;  %v1994_v9 = vcombine.low %v1898_v59, %v1962_v6 }
 0x5db   : > { %v1978_v10 = vpop.trf.xlu1  ;;  %v1622_v13 = vmul.f32 %v3206_v7, %v3198_v44 }
 0x5dc   : > { %v3208_v14 = vpop.eup %3207  ;;  %v2001_v16 = vrot.slane %v1994_v9, %v3486_v26  ;;  %v2019_v17 = vcombine.low %v1914_v60, %v1978_v10 }
 0x5dd   : > { %v1626_v19 = vpack.c.bf16 %v1622_v13, %v1622_v13  ;;  %v1623_v20 = vmul.f32 %v3208_v14, %v3200_v3 }
 0x5de   : > { %v3210_v21 = vpop.eup %3209  ;;  %v2002_v24 = vcombine.low %v1993_v15, %v2001_v16  ;;  %v2026_v25 = vrot.slane %v2019_v17, %v3486_v26 }
 0x5df   : > { %v2052_v27 = vsel %vm1396_vm4, %v1626_v19, 0  ;;  %v1627_v28 = vpack.c.bf16 %v1623_v20, %v1623_v20  ;;  %v1624_v29 = vmul.f32 %v3210_v21, %v3202_v47  ;;  %v3185_v19 = vld [vmem:[%s3837_s5] sm:$0xff]  }
 0x5e0   : > { %v3212_v30 = vpop.eup %3211  ;;  %v2009_v31 = vrot.slane %v2002_v24, %v3490_v38  ;;  %v2027_v32 = vcombine.low %v2018_v22, %v2026_v25  ;;  %3056 = vmatpush3.bf16.xpose.msra.mxu0 %v2052_v27 }
 0x5e1   : > { %v2098_v33 = vsel %vm1396_vm4, %v1627_v28, 0  ;;  %3067 = vmatprep.subr.bf16.mxu0 %v3299_v1  ;;  %v1625_v34 = vmul.f32 %v3212_v30, %v3204_v48  ;;  %v1628_v36 = vpack.c.bf16 %v1624_v29, %v1624_v29  ;;  %v3186_v30 = vld [vmem:[%s3837_s5 + $0x8] sm:$0xff]   ;;  %s3758_s5 = scalar_lea.hbm %s3821_s15, %s2985_s26 }
 0x5e2   : > { %v2034_v35 = vrot.slane %v2027_v32, %v3490_v38  ;;  %3062 = vmatpush3.bf16.xpose.msra.mxu1 %v2098_v33  ;;  %v2039_v37 = vshrl.u32 %v2009_v31, 16  ;;  %v2010_v11 = vcombine.high %v2009_v31, %v3307_v46 }
 0x5e3   : > { %3073 = vmatprep.subr.bf16.mxu1 %v3299_v1  ;;  %v1629_v40 = vpack.c.bf16 %v1625_v34, %v1625_v34  ;;  %v2144_v43 = vsel %vm1396_vm4, %v1628_v36, 0 }
 0x5e4   : > { %v2038_v39 = vpack.i.b16 %v2034_v35, %v2009_v31  ;;  %v2040_v53 = vshrl.u32 %v2034_v35, 16  ;;  %v2035_v42 = vcombine.high %v2034_v35, %v3307_v46  ;;  %v2045_v3 = vshrl.u32 %v2010_v11, 16 }
 0x5e5   : > { %v2190_v23 = vsel %vm1396_vm4, %v1629_v40, 0 }
 0x5e6   : > { %v2041_v41 = vpack.i.b16 %v2040_v53, %v2039_v37  ;;  %v2046_v44 = vshrl.u32 %v2035_v42, 16  ;;  %v2044_v45 = vpack.i.b16 %v2035_v42, %v2010_v11 }
 0x5e7   : > { %3058 = vmatmul.mubr.msk.bf16.vlgmr.msra.gmra.mrb[4].mxu0 %vm1396_vm4, %v2038_v39 }
 0x5e8   : > { %3068 = vmatpush3.bf16.xpose.msra.mxu0 %v2144_v43  ;;  %3069 = vmatprep.mubr.msk.bf16.mxu0 %vm3300_vm0, %v3299_v1  ;;  %v2047_v47 = vpack.i.b16 %v2046_v44, %v2045_v3 }
 0x5e9   : > { %3064 = vmatmul.mubr.msk.bf16.vlgmr.msra.gmra.mrb[16].mxu1 %vm1396_vm4, %v2041_v41  ;;  %3079 = vmatprep.subr.bf16.mxu0 %v3299_v1 }
 0x5ea   : > { %3074 = vmatpush3.bf16.xpose.msra.mxu1 %v2190_v23  ;;  %3075 = vmatprep.mubr.msk.bf16.mxu1 %vm3300_vm0, %v3299_v1 }
 0x5eb   : > { %3087 = vmatprep.subr.bf16.mxu1 %v3299_v1 }
 0x5ef   : > { %3070 = vmatmul.mubr.msk.bf16.vlgmr.msra.gmra.mrb[8].mxu0 %vm1396_vm4, %v2044_v45 }
 0x5f0   : > { %3083 = vmatprep.mubr.msk.bf16.mxu0 %vm3300_vm0, %v3299_v1  ;;  %3080 = vmatpush3.bf16.msra.mxu0 %v3185_v19  ;;  %v3193_v19 = vld [vmem:[%s3817_s11 + $0x20] sm:$0xff]  }
 0x5f1   : > { %3076 = vmatmul.mubr.msk.bf16.vlgmr.msra.gmra.mrb[20].mxu1 %vm1396_vm4, %v2047_v47  ;;  %3081 = vmatprep.subr.bf16.mxu0 %v3299_v1 }
 0x5f2   : > { %3091 = vmatprep.mubr.msk.bf16.mxu1 %vm3300_vm0, %v3299_v1 }
 0x5f4   : > { %3082 = vmatpush3.bf16.msra.mxu0 %v3186_v30 }
 0x5f5   : > { %3095 = vmatprep.subr.bf16.mxu0 %v3299_v1 }
 0x6ba   : > { %v2088_v46 = vpop.f32.mrb[4].mxu0 }
 0x6bb   : > { %2232 = vxpose.xlu0.b32.start.end [1/1] (short) (narrow) %v2088_v46, 8  ;;  %v3059_v18 = vpop.f32.mrb[5].mxu0 }
 0x6bc   : > { %v2091_v48 = vpop.f32.mrb[6].mxu0  ;;  %v2134_v49 = vpop.f32.mrb[16].mxu1 }
 0x6bd   : > { %v3060_v50 = vpop.f32.mrb[7].mxu0  ;;  %2264 = vxpose.xlu1.b32.start.end [1/1] (short) (narrow) %v2134_v49, 8  ;;  %v3065_v51 = vpop.f32.mrb[17].mxu1  ;;  %v2963_v48 = vld [vmem:[%s3812_s6] ss:$0 sm:$0xff] }
 0x6be   : > { %v2137_v52 = vpop.f32.mrb[18].mxu1 }
 0x6bf   : > { %v3066_v54 = vpop.f32.mrb[19].mxu1 }
 0x6c2   : > { %v2180_v12 = vpop.f32.mrb[8].mxu0 }
 0x6c3   : > { %2296 = vxpose.xlu0.b32.start.end [1/1] (short) (narrow) %v2180_v12, 8  ;;  %v3071_v55 = vpop.f32.mrb[9].mxu0 }
 0x6c4   : > { %v2183_v56 = vpop.f32.mrb[10].mxu0  ;;  %v2226_v57 = vpop.f32.mrb[20].mxu1 }
 0x6c5   : > { %v3072_v58 = vpop.f32.mrb[11].mxu0  ;;  %v3077_v59 = vpop.f32.mrb[21].mxu1 }
 0x6c6   : > { %v2229_v60 = vpop.f32.mrb[22].mxu1 }
 0x6c7   : > { %2328 = vxpose.xlu0.b32.start.end [1/1] (short) (narrow) %v2226_v57, 8  ;;  %v3078_v61 = vpop.f32.mrb[23].mxu1 }
 0x73b   : > { %v2248_v62 = vpop.trf.xlu0 }
 0x73d   : > { %v2280_v0 = vpop.trf.xlu1 }
 0x743   : > { %v2312_v63 = vpop.trf.xlu0 }
 0x744   : > { %v2360_v2 = vcombine.low %v2248_v62, %v2312_v63  ;;  %v2361_v4 = vcombine.high %v2248_v62, %v2312_v63  ;;  %v3187_v62 = vld [vmem:[%s3815_s9] sm:$0xff]   ;;  %v3188_v63 = vld [vmem:[%s3815_s9 + $0x8] sm:$0xff]  }
 0x745   : > { %3088 = vmatpush3.bf16.msra.mxu1 %v3187_v62 }
 0x746   : > { %v2368_v8 = vrot.slane %v2360_v2, %v3486_v26  ;;  %v2375_v9 = vrot.slane %v2361_v4, %v3486_v26  ;;  %3089 = vmatprep.subr.bf16.mxu1 %v3299_v1  ;;  %v3190_v2 = vld [vmem:[%s3817_s11 + $0x8] sm:$0xff]   ;;  %v3191_v4 = vld [vmem:[%s3817_s11 + $0x10] sm:$0xff]  }
 0x747   : > { %v2344_v5 = vpop.trf.xlu0 }
 0x748   : > { %v2376_v6 = vcombine.low %v2280_v0, %v2344_v5  ;;  %v2377_v7 = vcombine.high %v2280_v0, %v2344_v5  ;;  %v3189_v0 = vld [vmem:[%s3817_s11] sm:$0xff]  }
 0x749   : > { %3090 = vmatpush3.bf16.msra.mxu1 %v3188_v63 }
 0x74a   : > { %v2384_v10 = vrot.slane %v2376_v6, %v3486_v26  ;;  %v2391_v13 = vrot.slane %v2377_v7, %v3486_v26 }
 0x74c   : > { %v2392_v14 = vcombine.low %v2368_v8, %v2384_v10  ;;  %v2393_v15 = vcombine.high %v2368_v8, %v2384_v10  ;;  %v2408_v16 = vcombine.low %v2375_v9, %v2391_v13  ;;  %v2409_v17 = vcombine.high %v2375_v9, %v2391_v13  ;;  %v2967_v9 = vld [vmem:[%s3813_s7] ss:$0 sm:$0xff] }
 0x74d   : > { %v2968_v13 = vld [vmem:[%s3814_s8] ss:$0 sm:$0xff] }
 0x74e   : > { %v2400_v20 = vrot.slane %v2392_v14, %v3490_v38  ;;  %v2407_v21 = vrot.slane %v2393_v15, %v3490_v38  ;;  %v2416_v22 = vrot.slane %v2408_v16, %v3490_v38  ;;  %v2423_v24 = vrot.slane %v2409_v17, %v3490_v38  ;;  %v3192_v17 = vld [vmem:[%s3817_s11 + $0x18] sm:$0xff]  }
 0x750   : > { %v2428_v25 = vcombine.low %v2400_v20, %v2407_v21  ;;  %v2961_v27 = vcombine.high %v2400_v20, %v2407_v21  ;;  %v2444_v28 = vcombine.low %v2416_v22, %v2423_v24  ;;  %v2962_v29 = vcombine.high %v2416_v22, %v2423_v24  ;;  %v3194_v20 = vld [vmem:[%s3817_s11 + $0x28] sm:$0xff]   ;;  %v3195_v21 = vld [vmem:[%s3817_s11 + $0x30] sm:$0xff]   ;;  %v3196_v22 = vld [vmem:[%s3817_s11 + $0x38] sm:$0xff]  }
 0x751   : > { %v2969_v24 = vld [vmem:[%s3816_s10] ss:$0 sm:$0xff] }
 0x752   : > { %v2435_v31 = vrot.slane %v2428_v25, %v3486_v26  ;;  %v2443_v32 = vrot.slane %v2961_v27, %v3486_v26  ;;  %v2451_v33 = vrot.slane %v2444_v28, %v3486_v26  ;;  %v2459_v34 = vrot.slane %v2962_v29, %v3486_v26 }
 0x754   : > { %v2461_v35 = vcombine.high %v2435_v31, %v2443_v32  ;;  %v2477_v36 = vcombine.high %v2451_v33, %v2459_v34  ;;  %v2460_v37 = vcombine.low %v2435_v31, %v2443_v32  ;;  %v2476_v39 = vcombine.low %v2451_v33, %v2459_v34 }
 0x756   : > { %v2475_v53 = vrot.slane %v2461_v35, %v3490_v38  ;;  %v2491_v40 = vrot.slane %v2477_v36, %v3490_v38  ;;  %v2468_v41 = vrot.slane %v2460_v37, %v3490_v38  ;;  %v2484_v42 = vrot.slane %v2476_v39, %v3490_v38  ;;  %v2973_v36 = vld [vmem:[%s3818_s12] ss:$0 sm:$0xff] }
 0x758   : > { %v2494_v43 = vcombine.low %v2475_v53, %v2491_v40  ;;  %v2493_v11 = vcombine.high %v2468_v41, %v2484_v42  ;;  %v2492_v23 = vcombine.low %v2468_v41, %v2484_v42  ;;  %v2495_v26 = vcombine.high %v2475_v53, %v2491_v40 }
 0x75a   : > { %2501 = vrot.lane.b32.xlu1 %v2494_v43, %s3309_s24  ;;  %2497 = vrot.lane.b32.xlu0 %v2493_v11, %s3310_s29  ;;  %s542_s24 = scalar_lea.vmem %s3839_s1, %s3838_s3  ;;  %s2829_s29 = scalar_lea.sflag [#allocation4], %s529_s25 }
 0x75b   : > { %v2581_v50 = vld [vmem:[%s542_s24] sm:$0xff]  ;;  %s2942_s24 = sshll.u32 %s529_s25, 3 }
 0x75c   : > { %s531_s0 = scalar_lea.vmem [#allocation3], %s2942_s24  ;;  %s3223_s24 = sshll.u32 %s3312_s21, 4  ;;  %s3224_s24 = int_to_ptr.vmem [resolvable:$false] %s3223_s24 }
 0x75d   : > { %s2843_s1 = sshll.u32 %s531_s0, 4  ;;  %s3225_s27 = scalar_lea.vmem %s3224_s24, 256  ;;  %s3760_s1 = int_to_ptr.vmem [resolvable:$true] %s2843_s1 }
 0x75e   : > { %2505 = vrot.lane.b32.xlu1 %v2495_v26, %s3311_s17  ;;  %s3219_s17 = scalar_lea.vmem %s3760_s1, 128  ;;  %p3226_p1 = scmp.lt.s32.totalorder %s3760_s1, %s3224_s24 }
 0x75f   : > { %p3220_p12 = scmp.ne.s32.totalorder %s3760_s1, %s3219_s17  ;;  %p3227_p2 = scmp.lt.s32.totalorder %s3225_s27, %s3219_s17 }
 0x761   : > { %p3221_p13 = pnand %p3220_p12, %p3433_p4  ;;  %p3228_p3 = por %p3227_p2, %p3226_p1 }
 0x763   : > { %p3222_p0 = pneg %p3221_p13 }
 0x765   : > { %p3229_p5 = pnand %p3228_p3, %p3222_p0 }
 0x7cc   : > { %v2502_v44 = vpop.permute.xlu1 %2501  ;;  %v2498_v3 = vpop.permute.xlu0 %2497 }
 0x7cd   : > { %v2508_v45 = vsel %vm1396_vm4, %v2492_v23, %v2498_v3 }
 0x7ce   : > { %v2510_v46 = vsel %vm2509_vm5, %v2508_v45, %v2502_v44 }
 0x7d0   : > { %v2506_v47 = vpop.permute.xlu1 %2505 }
 0x7d1   : > { %v2512_v38 = vsel %vm2511_vm6, %v2510_v46, %v2506_v47 }
 0x7d2   : > { %v2513_v18 = vpack.c.bf16 %v2512_v38, %v2512_v38 }
 0x7d4   : > { %3084 = vmatmul.mubr.msk.bf16.vlgmr.msra.gmra.mrb[12].mxu0 %vm576_vm1, %v2513_v18  ;;  %v2982_v18 = vld [vmem:[%s3819_s13] ss:$0 sm:$0xff] }
 0x7d5   : > { %3111 = vmatprep.mubr.msk.bf16.mxu0 %vm3300_vm0, %v3299_v1  ;;  %3096 = vmatpush3.bf16.msra.mxu0 %v3189_v0 }
 0x7d6   : > { %3097 = vmatprep.subr.bf16.mxu0 %v3299_v1 }
 0x7d9   : > { %3098 = vmatpush3.bf16.msra.mxu0 %v3190_v2 }
 0x7da   : > { %3099 = vmatprep.subr.bf16.mxu0 %v3299_v1 }
 0x7dd   : > { %3100 = vmatpush3.bf16.msra.mxu0 %v3191_v4 }
 0x7de   : > { %3101 = vmatprep.subr.bf16.mxu0 %v3299_v1 }
 0x7e1   : > { %3102 = vmatpush3.bf16.msra.mxu0 %v3192_v17 }
 0x7e2   : > { %3103 = vmatprep.subr.bf16.mxu0 %v3299_v1 }
 0x7e5   : > { %3104 = vmatpush3.bf16.msra.mxu0 %v3193_v19 }
 0x7e6   : > { %3105 = vmatprep.subr.bf16.mxu0 %v3299_v1 }
 0x7e9   : > { %3106 = vmatpush3.bf16.msra.mxu0 %v3194_v20 }
 0x7ea   : > { %3107 = vmatprep.subr.bf16.mxu0 %v3299_v1 }
 0x7ed   : > { %3108 = vmatpush3.bf16.msra.mxu0 %v3195_v21 }
 0x7ee   : > { %3109 = vmatprep.subr.bf16.mxu0 %v3299_v1 }
 0x7f1   : > { %3110 = vmatpush3.bf16.msra.mxu0 %v3196_v22 }
 0x8a7   : > { %v2575_v49 = vpop.f32.mrb[12].mxu0 }
 0x8a8   : > { %v2576_v51 = vadd.f32 %v2963_v48, %v2575_v49  ;;  %v3085_v52 = vpop.f32.mrb[13].mxu0  ;;  %v2983_v49 = vld [vmem:[%s3820_s14] ss:$0 sm:$0xff] }
 0x8a9   : > { %v2578_v54 = vpop.f32.mrb[14].mxu0 }
 0x8aa   : > { %v3086_v12 = vpop.f32.mrb[15].mxu0  ;;  %v2582_v55 = vadd.f32 %v2581_v50, %v2576_v51 }
 0x8ac   : > { %v2585_v56 = vsel %vm576_vm1, %v2582_v55, 0.0 }
 0x8ad   : > { %2586 = vadd.xlane.f32.xlu1 %v2585_v56 }
 0x93a   : > { %v2587_v57 = vpop.xlane.xlu1 %2586 }
 0x93b   : > { %v2589_v58 = vmul.f32 0.03125, %v2587_v57 }
 0x93d   : > { %v2590_v59 = vsub.f32 %v2582_v55, %v2589_v58 }
 0x93f   : > { %v2591_v60 = vmul.f32 %v2590_v59, %v2590_v59 }
 0x941   : > { %v2592_v61 = vsel %vm576_vm1, %v2591_v60, 0.0 }
 0x942   : > { %2593 = vadd.xlane.f32.xlu0 %v2592_v61 }
 0x9cf   : > { %v2594_v5 = vpop.xlane.xlu0 %2593 }
 0x9d0   : > { %v2595_v6 = vmul.f32 0.03125, %v2594_v5 }
 0x9d2   : > { %v2596_v7 = vadd.f32 1e-12, %v2595_v6 }
 0x9d4   : > { %3213 = vrsqrt.f32 %v2596_v7 }
 0x9de   : > { %v3214_v8 = vpop.eup %3213 }
 0x9df   : > { %v2598_v10 = vmul.f32 %v3214_v8, %v2590_v59 }
 0x9e1   : > { %v2605_v14 = vmul.f32 %v2967_v9, %v2598_v10 }
 0x9e3   : > { %v2612_v15 = vadd.f32 %v2968_v13, %v2605_v14 }
 0x9e5   : > { %v2613_v16 = vpack.c.bf16 %v2612_v15, %v2612_v15 }
 0x9e7   : > { %3092 = vmatmul.mubr.msk.bf16.vlgmr.msra.gmra.mrb[24].mxu1 %vm576_vm1, %v2613_v16 }
 0xaba   : > { %v2674_v25 = vpop.f32.mrb[24].mxu1 }
 0xabb   : > { %v2675_v27 = vadd.f32 %v2969_v24, %v2674_v25  ;;  %v3093_v28 = vpop.f32.mrb[25].mxu1 }
 0xabc   : > { %v2677_v29 = vpop.f32.mrb[26].mxu1 }
 0xabd   : > { %v2681_v30 = vmul.f32 0.70710677, %v2675_v27  ;;  %v3094_v31 = vpop.f32.mrb[27].mxu1  ;;  %v2680_v33 = vmul.f32 0.5, %v2675_v27 }
 0xabf   : > { %3215 = verf.f32 %v2681_v30 }
 0xac9   : > { %v3216_v32 = vpop.eup %3215 }
 0xaca   : > { %v2683_v34 = vadd.f32 1.0, %v3216_v32 }
 0xacc   : > { %v2684_v1 = vmul.f32 %v2683_v34, %v2680_v33 }
 0xace   : > { %v2685_v35 = vpack.c.bf16 %v2684_v1, %v2684_v1 }
 0xad0   : > { %3112 = vmatmul.mubr.bf16.vlgmr.msra.gmra.mrb[16].mxu0 %v2685_v35 }
 0xba3   : > { %v2791_v37 = vpop.f32.mrb[16].mxu0 }
 0xba4   : > { %v2792_v39 = vadd.f32 %v2973_v36, %v2791_v37  ;;  %v3113_v53 = vpop.f32.mrb[17].mxu0 }
 0xba5   : > { %v2794_v40 = vpop.f32.mrb[18].mxu0 }
 0xba6   : > { %v3114_v41 = vpop.f32.mrb[19].mxu0  ;;  %v2797_v42 = vadd.f32 %v2792_v39, %v2612_v15 }
 0xba8   : > { %v2800_v43 = vsel %vm576_vm1, %v2797_v42, 0.0 }
 0xba9   : > { %2801 = vadd.xlane.f32.xlu1 %v2800_v43 }
 0xc36   : > { %v2802_v11 = vpop.xlane.xlu1 %2801 }
 0xc37   : > { %v2803_v23 = vmul.f32 0.03125, %v2802_v11 }
 0xc39   : > { %v2804_v26 = vsub.f32 %v2797_v42, %v2803_v23 }
 0xc3b   : > { %v2805_v44 = vmul.f32 %v2804_v26, %v2804_v26 }
 0xc3d   : > { %v2806_v3 = vsel %vm576_vm1, %v2805_v44, 0.0 }
 0xc3e   : > { %2807 = vadd.xlane.f32.xlu0 %v2806_v3 }
 0xccb   : > { %v2808_v45 = vpop.xlane.xlu0 %2807 }
 0xccc   : > { %v2809_v47 = vmul.f32 0.03125, %v2808_v45 }
 0xcce   : > { %v2810_v46 = vadd.f32 1e-12, %v2809_v47 }
 0xcd0   : > { %3217 = vrsqrt.f32 %v2810_v46 }
 0xcda   : > { %v3218_v38 = vpop.eup %3217 }
 0xcdb   : > { %v2812_v48 = vmul.f32 %v3218_v38, %v2804_v26 }
 0xcdd   : > { %v2819_v50 = vmul.f32 %v2982_v18, %v2812_v48 }
 0xcdf   : > { %v2826_v51 = vadd.f32 %v2983_v49, %v2819_v50 }
 0xce1   : > { %2827 = vst.msk [vmem:[%s531_s0] sm:$0xff] %vm576_vm1, %v2826_v51 }
 0xce2   : > { %3232 = shalt.err (!%p3229_p5)
}
 0xce3   : > { %s3233_s2 = scalar_lea.hbm %s3758_s5, 128  ;;  %s3237_s3 = scalar_lea.hbm %s3821_s15, 256 }
 0xce4   : > { %p3234_p6 = scmp.ne.s32.totalorder %s3758_s5, %s3233_s2  ;;  %p3238_p10 = scmp.lt.u32.totalorder %s3758_s5, %s3821_s15 }
 0xce5   : > { %p3239_p11 = scmp.lt.u32.totalorder %s3237_s3, %s3233_s2  ;;  %p3241_p13 = scmp.lt.u32.totalorder %s3233_s2, %s3758_s5 }
 0xce6   : > { %p3235_p7 = pnand %p3234_p6, %p3433_p4 }
 0xce7   : > { %p3240_p12 = por %p3239_p11, %p3238_p10 }
 0xce8   : > { %p3236_p9 = pneg %p3235_p7 }
 0xce9   : > { %p3242_p0 = por %p3241_p13, %p3240_p12 }
 0xceb   : > { %p3243_p1 = pnand %p3242_p0, %p3236_p9 }
 0xced   : > { %3246 = shalt.err (!%p3243_p1)
}
 0xcee   : > { %3115 = dma.vmem_to_hbm [thread:$0]  (%p3433_p4), %s3760_s1, 128, %s3758_s5, %s2829_s29  }
 0xcef PF: > { %p3121_p2 = scmp.ge.s32.totalorder %s3297_s23, 2  ;;  %s2855_s17 = sand.u32 1, %s3277_s18  }
 0xcf0   : > { %s2856_s21 = scalar_lea.sflag [#allocation4], %s2855_s17 }
 0xcf1   : > { %p3118_p3 = pnand %p3121_p2, %p3440_p8 }
 0xcf3   : > { %3272 = dma.done.wait (!%p3118_p3), %s2856_s21, 128  }
 0xcf4   : > { %3274 = vsyncadd (!%p3118_p3), %s2856_s21, 4294967168  ;;  %s28_s23 = sadd.s32 1, %s3297_s23   ;;  %s3840_s28 = sld [smem:[#allocation6_spill]] }
 0xcf5   : > { %p25_p5 = scmp.ge.s32.totalorder %s28_s23, 4   ;;  %s3841_s18 = smov %s3281_s19 }
 0xcf6   : > { %s3842_s19 = smov %s3285_s20  ;;  %s3843_s20 = smov %s3446_s16 }
 0xcf7   : > { %s3844_s21 = smov %s3293_s22  ;;  %27 = sbr.rel (!%p25_p5) target bundleno = 11 (0xb), region = 130 }
 0xcfa   : > { %s3845_s22 = smov %s3840_s28 }
 0xcfe   :  { %2861 = vsyncpa [#allocation4], 1 }
 0xcff   :  { %2863 = vsyncpa [#allocation4 + $0x1], 1 }

</bundles_post_ra>
